<compile_context>
chip_gen: v7x
topology: tpu7x:2x2x1
jax: 0.10.0
libtpu: 0.0.40
codegen_flags: <defaults>
</compile_context>

<pallas_src>
import functools

import numpy as np
import jax
import jax.numpy as jnp
from jax.experimental import pallas as pl
from jax.experimental.pallas import tpu as pltpu

NC = 1
NDF = 28
EPS = 1e-5        # nn.BatchNorm2d default eps
LANES = 128       # channel lane padding -> lane-dense GEMMs and stores
KS = 4            # conv kernel 4x4, stride 2, pad 1


# ----------------------------------------------------------------------------
# Host-side (XLA) layout prep: weight packing, layer-1 im2col, select matrices.
# ----------------------------------------------------------------------------

def _im2col_layer1(x):
    """[B,1,H,W] f32 -> [B*(H//2)*(W//2), 16] bf16 im2col for Conv(k=4,s=2,p=1)."""
    B, _, H, W = x.shape
    OH, OW = H // 2, W // 2
    xp = jnp.pad(x[:, 0], ((0, 0), (1, 1), (1, 1)))          # spatial zero pad
    taps = []
    for kh in range(KS):
        for kw in range(KS):
            taps.append(xp[:, kh:kh + 2 * OH - 1:2, kw:kw + 2 * OW - 1:2])
    patch = jnp.stack(taps, axis=-1)                          # [B, OH, OW, 16]
    return patch.reshape(B * OH * OW, KS * KS).astype(jnp.bfloat16)


def _pack_w1(w1):
    """[28,1,4,4] -> [16,128] bf16, row = kh*4+kw, lanes = cout (zero padded)."""
    cout = w1.shape[0]
    wm = w1[:, 0].reshape(cout, KS * KS).T                    # [16, cout]
    return jnp.pad(wm, ((0, 0), (0, LANES - cout))).astype(jnp.bfloat16)


def _pack_w(w):
    """[cout,cin,4,4] -> [16,128,128] bf16 per-tap weights (cin/cout lane padded)."""
    cout, cin = w.shape[0], w.shape[1]
    wt = jnp.transpose(w, (2, 3, 1, 0)).reshape(KS * KS, cin, cout)
    wt = jnp.pad(wt, ((0, 0), (0, LANES - cin), (0, LANES - cout)))
    return wt.astype(jnp.bfloat16)


def _tap_select_mats(B, Hin, Win):
    """Constant one-hot row-select matrices S[t]: [Mo, Mi] bf16.

    S[t] @ A gathers, for every output position (b,oh,ow), the input row at
    (b, 2*oh+kh-1, 2*ow+kw-1); out-of-bounds taps get an all-zero row, which
    implements the conv zero padding exactly."""
    OH, OW = Hin // 2, Win // 2
    Mo, Mi = B * OH * OW, B * Hin * Win
    m = np.arange(Mo)
    b, r = m // (OH * OW), m % (OH * OW)
    oh, ow = r // OW, r % OW
    mats = np.zeros((KS * KS, Mo, Mi), np.float32)
    for kh in range(KS):
        for kw in range(KS):
            ih, iw = 2 * oh + kh - 1, 2 * ow + kw - 1
            valid = (ih >= 0) & (ih < Hin) & (iw >= 0) & (iw < Win)
            src = b * Hin * Win + np.clip(ih, 0, Hin - 1) * Win + np.clip(iw, 0, Win - 1)
            mats[kh * KS + kw, m[valid], src[valid]] = 1.0
    return jnp.asarray(mats, jnp.bfloat16)


# ----------------------------------------------------------------------------
# Kernel
# ----------------------------------------------------------------------------

def _conv_bn_act(a_prev_f32, s_ref, w_ref, *, use_bn, act):
    """One conv layer as 16 accumulating per-tap bf16 GEMMs + fused epilogue.

    a_prev_f32: [Mi, 128] f32 activation slab (channels on lanes, zero padded).
    s_ref:      [16, Mo, Mi] bf16 one-hot row-select matrices.
    w_ref:      [16, 128, 128] bf16 per-tap weights.
    """
    a_b = a_prev_f32.astype(jnp.bfloat16)                     # one cast per layer
    Mo = s_ref.shape[1]
    acc = jnp.zeros((Mo, LANES), jnp.float32)
    for t in range(KS * KS):
        # Exact one-hot selection of bf16 rows (also realizes the zero padding).
        g = jnp.dot(s_ref[t], a_b, preferred_element_type=jnp.float32)
        acc = acc + jnp.dot(g.astype(jnp.bfloat16), w_ref[t],
                            preferred_element_type=jnp.float32)
    if use_bn:
        # Training-mode BatchNorm2d (gamma=1, beta=0): biased batch stats over
        # all (N, H, W) rows of the layer slab; folded into one scale/shift.
        mean = jnp.mean(acc, axis=0, keepdims=True)
        var = jnp.mean(jnp.square(acc - mean), axis=0, keepdims=True)
        scale = jax.lax.rsqrt(var + EPS)
        acc = acc * scale - mean * scale
    if act == "leaky":
        acc = jnp.maximum(acc, 0.2 * acc)                     # LeakyReLU(0.2)
    else:  # sigmoid: exp + approx reciprocal both run on the EUP slot
        acc = pl.reciprocal(1.0 + jnp.exp(-acc), approx=True)
    return acc


def _disc_kernel(cols1_ref, w1_ref, w2_ref, w3_ref, w4_ref,
                 s2_ref, s3_ref, s4_ref, o_ref):
    # layer 1: Conv(1 -> 28) + LeakyReLU    -- one dense [M1,16]@[16,128] GEMM
    y1 = jnp.dot(cols1_ref[...], w1_ref[...], preferred_element_type=jnp.float32)
    a1 = jnp.maximum(y1, 0.2 * y1)
    # layer 2: Conv(28 -> 56)  + BN + LeakyReLU
    a2 = _conv_bn_act(a1, s2_ref, w2_ref, use_bn=True, act="leaky")
    # layer 3: Conv(56 -> 112) + BN + LeakyReLU
    a3 = _conv_bn_act(a2, s3_ref, w3_ref, use_bn=True, act="leaky")
    # layer 4: Conv(112 -> 1)  + Sigmoid
    a4 = _conv_bn_act(a3, s4_ref, w4_ref, use_bn=False, act="sigmoid")
    # lane-dense [M4, 128] store; the real probability lives in lane 0.
    o_ref[...] = a4


# ----------------------------------------------------------------------------
# Wrapper
# ----------------------------------------------------------------------------

def discriminator_forward(x, params):
    w1, w2, w3, w4 = params
    B, C, H0, W0 = x.shape
    assert C == NC and H0 == W0 and H0 % 16 == 0 and H0 >= 16

    cols1 = _im2col_layer1(x)                                  # [B*(H0/2)^2, 16] bf16
    w1p, w2p, w3p, w4p = _pack_w1(w1), _pack_w(w2), _pack_w(w3), _pack_w(w4)
    s2 = _tap_select_mats(B, H0 // 2, H0 // 2)
    s3 = _tap_select_mats(B, H0 // 4, H0 // 4)
    s4 = _tap_select_mats(B, H0 // 8, H0 // 8)
    M4 = B * (H0 // 16) * (H0 // 16)

    # Advisory cost estimate (per-tap select + weight GEMMs, bf16).
    flops = 2 * cols1.shape[0] * (KS * KS) * LANES
    for s in (s2, s3, s4):
        mo, mi = int(s.shape[1]), int(s.shape[2])
        flops += (KS * KS) * (2 * mo * mi * LANES + 2 * mo * LANES * LANES)
    bytes_accessed = (2 * (cols1.size + w1p.size + w2p.size + w3p.size + w4p.size
                           + s2.size + s3.size + s4.size) + 4 * M4 * LANES)
    cost = pl.CostEstimate(flops=int(flops),
                           transcendentals=int(M4 * LANES),
                           bytes_accessed=int(bytes_accessed))

    out = pl.pallas_call(
        _disc_kernel,
        out_shape=jax.ShapeDtypeStruct((M4, LANES), jnp.float32),
        in_specs=[pl.BlockSpec(memory_space=pltpu.MemorySpace.VMEM)] * 8,
        out_specs=pl.BlockSpec(memory_space=pltpu.MemorySpace.VMEM),
        cost_estimate=cost,
        compiler_params=pltpu.CompilerParams(vmem_limit_bytes=32 * 1024 * 1024),
    )(cols1, w1p, w2p, w3p, w4p, s2, s3, s4)

    # output.view(-1, 1).squeeze(1): row order (b, oh, ow) matches PyTorch.
    return out[:, 0]


def init_params(key):
    # Deterministic synthetic init (DCGAN-style N(0, 0.02)); shapes match __init__.
    k1, k2, k3, k4 = jax.random.split(key, 4)
    w1 = 0.02 * jax.random.normal(k1, (NDF, NC, 4, 4), jnp.float32)
    w2 = 0.02 * jax.random.normal(k2, (NDF * 2, NDF, 4, 4), jnp.float32)
    w3 = 0.02 * jax.random.normal(k3, (NDF * 4, NDF * 2, 4, 4), jnp.float32)
    w4 = 0.02 * jax.random.normal(k4, (1, NDF * 4, 4, 4), jnp.float32)
    return (w1, w2, w3, w4)


if __name__ == "__main__":
    key = jax.random.PRNGKey(0)
    params = init_params(key)
    # small input consistent with the module: batch=2, nc=1, 16x16 spatial
    x = jax.random.normal(jax.random.fold_in(key, 99), (2, NC, 16, 16), jnp.float32)

    out = jax.jit(discriminator_forward)(x, params)
    jax.block_until_ready(out)

    assert out.shape == (2,), out.shape          # 16x16 -> 8 -> 4 -> 2 -> 1 per sample
    assert bool(jnp.all(jnp.isfinite(out)))
    assert bool(jnp.all((out >= 0.0) & (out <= 1.0)))
    # TODO(synk): BatchNorm running_mean/running_var buffer updates (training
    # side-effect) and eval-mode running-stat normalization are not modeled;
    # training-mode batch statistics are used, matching module defaults.
    print("KERNEL_OK")
</pallas_src>

<mosaic_0001>
module attributes {stable_mosaic.version = 11 : i64} {
  func.func @_disc_kernel(%arg0: memref<128x16xbf16, #tpu.memory_space<vmem>>, %arg1: memref<16x128xbf16, #tpu.memory_space<vmem>>, %arg2: memref<16x128x128xbf16, #tpu.memory_space<vmem>>, %arg3: memref<16x128x128xbf16, #tpu.memory_space<vmem>>, %arg4: memref<16x128x128xbf16, #tpu.memory_space<vmem>>, %arg5: memref<16x32x128xbf16, #tpu.memory_space<vmem>>, %arg6: memref<16x8x32xbf16, #tpu.memory_space<vmem>>, %arg7: memref<16x2x8xbf16, #tpu.memory_space<vmem>>, %arg8: memref<2x128xf32, #tpu.memory_space<vmem>>) attributes {dimension_semantics = [], scalar_prefetch = 0 : i64, scratch_operands = 0 : i64, tpu.core_type = #tpu.core_type<tc>} {
    %c0 = arith.constant 0 : index
    %c0_0 = arith.constant 0 : index
    %0 = vector.load %arg0[%c0, %c0_0] : memref<128x16xbf16, #tpu.memory_space<vmem>>, vector<128x16xbf16>
    %c0_1 = arith.constant 0 : index
    %c0_2 = arith.constant 0 : index
    %1 = vector.load %arg1[%c0_1, %c0_2] : memref<16x128xbf16, #tpu.memory_space<vmem>>, vector<16x128xbf16>
    %cst = arith.constant dense<0.000000e+00> : vector<128x128xf32>
    %2 = tpu.matmul %0, %1, %cst {dimension_numbers = #tpu.dot_dimension_numbers<[1], [0], [0], [1], [0, 0, 1, 1], [], []>} : vector<128x16xbf16>, vector<16x128xbf16>, vector<128x128xf32> -> vector<128x128xf32>
    %cst_3 = arith.constant 2.000000e-01 : f32
    %3 = vector.broadcast %cst_3 : f32 to vector<128x128xf32>
    %4 = arith.mulf %3, %2 : vector<128x128xf32>
    %5 = arith.maximumf %2, %4 : vector<128x128xf32>
    %6 = arith.truncf %5 : vector<128x128xf32> to vector<128x128xbf16>
    %cst_4 = arith.constant 0.000000e+00 : f32
    %7 = vector.broadcast %cst_4 : f32 to vector<32x128xf32>
    %c0_5 = arith.constant 0 : index
    %c0_6 = arith.constant 0 : index
    %c0_7 = arith.constant 0 : index
    %8 = vector.load %arg5[%c0_5, %c0_6, %c0_7] : memref<16x32x128xbf16, #tpu.memory_space<vmem>>, vector<1x32x128xbf16>
    %9 = vector.shape_cast %8 : vector<1x32x128xbf16> to vector<32x128xbf16>
    %cst_8 = arith.constant dense<0.000000e+00> : vector<32x128xf32>
    %10 = tpu.matmul %9, %6, %cst_8 {dimension_numbers = #tpu.dot_dimension_numbers<[1], [0], [0], [1], [0, 0, 1, 1], [], []>} : vector<32x128xbf16>, vector<128x128xbf16>, vector<32x128xf32> -> vector<32x128xf32>
    %11 = arith.truncf %10 : vector<32x128xf32> to vector<32x128xbf16>
    %c0_9 = arith.constant 0 : index
    %c0_10 = arith.constant 0 : index
    %c0_11 = arith.constant 0 : index
    %12 = vector.load %arg2[%c0_9, %c0_10, %c0_11] : memref<16x128x128xbf16, #tpu.memory_space<vmem>>, vector<1x128x128xbf16>
    %13 = vector.shape_cast %12 : vector<1x128x128xbf16> to vector<128x128xbf16>
    %cst_12 = arith.constant dense<0.000000e+00> : vector<32x128xf32>
    %14 = tpu.matmul %11, %13, %cst_12 {dimension_numbers = #tpu.dot_dimension_numbers<[1], [0], [0], [1], [0, 0, 1, 1], [], []>} : vector<32x128xbf16>, vector<128x128xbf16>, vector<32x128xf32> -> vector<32x128xf32>
    %15 = arith.addf %7, %14 : vector<32x128xf32>
    %c1 = arith.constant 1 : index
    %c0_13 = arith.constant 0 : index
    %c0_14 = arith.constant 0 : index
    %16 = vector.load %arg5[%c1, %c0_13, %c0_14] : memref<16x32x128xbf16, #tpu.memory_space<vmem>>, vector<1x32x128xbf16>
    %17 = vector.shape_cast %16 : vector<1x32x128xbf16> to vector<32x128xbf16>
    %cst_15 = arith.constant dense<0.000000e+00> : vector<32x128xf32>
    %18 = tpu.matmul %17, %6, %cst_15 {dimension_numbers = #tpu.dot_dimension_numbers<[1], [0], [0], [1], [0, 0, 1, 1], [], []>} : vector<32x128xbf16>, vector<128x128xbf16>, vector<32x128xf32> -> vector<32x128xf32>
    %19 = arith.truncf %18 : vector<32x128xf32> to vector<32x128xbf16>
    %c1_16 = arith.constant 1 : index
    %c0_17 = arith.constant 0 : index
    %c0_18 = arith.constant 0 : index
    %20 = vector.load %arg2[%c1_16, %c0_17, %c0_18] : memref<16x128x128xbf16, #tpu.memory_space<vmem>>, vector<1x128x128xbf16>
    %21 = vector.shape_cast %20 : vector<1x128x128xbf16> to vector<128x128xbf16>
    %cst_19 = arith.constant dense<0.000000e+00> : vector<32x128xf32>
    %22 = tpu.matmul %19, %21, %cst_19 {dimension_numbers = #tpu.dot_dimension_numbers<[1], [0], [0], [1], [0, 0, 1, 1], [], []>} : vector<32x128xbf16>, vector<128x128xbf16>, vector<32x128xf32> -> vector<32x128xf32>
    %23 = arith.addf %15, %22 : vector<32x128xf32>
    %c2 = arith.constant 2 : index
    %c0_20 = arith.constant 0 : index
    %c0_21 = arith.constant 0 : index
    %24 = vector.load %arg5[%c2, %c0_20, %c0_21] : memref<16x32x128xbf16, #tpu.memory_space<vmem>>, vector<1x32x128xbf16>
    %25 = vector.shape_cast %24 : vector<1x32x128xbf16> to vector<32x128xbf16>
    %cst_22 = arith.constant dense<0.000000e+00> : vector<32x128xf32>
    %26 = tpu.matmul %25, %6, %cst_22 {dimension_numbers = #tpu.dot_dimension_numbers<[1], [0], [0], [1], [0, 0, 1, 1], [], []>} : vector<32x128xbf16>, vector<128x128xbf16>, vector<32x128xf32> -> vector<32x128xf32>
    %27 = arith.truncf %26 : vector<32x128xf32> to vector<32x128xbf16>
    %c2_23 = arith.constant 2 : index
    %c0_24 = arith.constant 0 : index
    %c0_25 = arith.constant 0 : index
    %28 = vector.load %arg2[%c2_23, %c0_24, %c0_25] : memref<16x128x128xbf16, #tpu.memory_space<vmem>>, vector<1x128x128xbf16>
    %29 = vector.shape_cast %28 : vector<1x128x128xbf16> to vector<128x128xbf16>
    %cst_26 = arith.constant dense<0.000000e+00> : vector<32x128xf32>
    %30 = tpu.matmul %27, %29, %cst_26 {dimension_numbers = #tpu.dot_dimension_numbers<[1], [0], [0], [1], [0, 0, 1, 1], [], []>} : vector<32x128xbf16>, vector<128x128xbf16>, vector<32x128xf32> -> vector<32x128xf32>
    %31 = arith.addf %23, %30 : vector<32x128xf32>
    %c3 = arith.constant 3 : index
    %c0_27 = arith.constant 0 : index
    %c0_28 = arith.constant 0 : index
    %32 = vector.load %arg5[%c3, %c0_27, %c0_28] : memref<16x32x128xbf16, #tpu.memory_space<vmem>>, vector<1x32x128xbf16>
    %33 = vector.shape_cast %32 : vector<1x32x128xbf16> to vector<32x128xbf16>
    %cst_29 = arith.constant dense<0.000000e+00> : vector<32x128xf32>
    %34 = tpu.matmul %33, %6, %cst_29 {dimension_numbers = #tpu.dot_dimension_numbers<[1], [0], [0], [1], [0, 0, 1, 1], [], []>} : vector<32x128xbf16>, vector<128x128xbf16>, vector<32x128xf32> -> vector<32x128xf32>
    %35 = arith.truncf %34 : vector<32x128xf32> to vector<32x128xbf16>
    %c3_30 = arith.constant 3 : index
    %c0_31 = arith.constant 0 : index
    %c0_32 = arith.constant 0 : index
    %36 = vector.load %arg2[%c3_30, %c0_31, %c0_32] : memref<16x128x128xbf16, #tpu.memory_space<vmem>>, vector<1x128x128xbf16>
    %37 = vector.shape_cast %36 : vector<1x128x128xbf16> to vector<128x128xbf16>
    %cst_33 = arith.constant dense<0.000000e+00> : vector<32x128xf32>
    %38 = tpu.matmul %35, %37, %cst_33 {dimension_numbers = #tpu.dot_dimension_numbers<[1], [0], [0], [1], [0, 0, 1, 1], [], []>} : vector<32x128xbf16>, vector<128x128xbf16>, vector<32x128xf32> -> vector<32x128xf32>
    %39 = arith.addf %31, %38 : vector<32x128xf32>
    %c4 = arith.constant 4 : index
    %c0_34 = arith.constant 0 : index
    %c0_35 = arith.constant 0 : index
    %40 = vector.load %arg5[%c4, %c0_34, %c0_35] : memref<16x32x128xbf16, #tpu.memory_space<vmem>>, vector<1x32x128xbf16>
    %41 = vector.shape_cast %40 : vector<1x32x128xbf16> to vector<32x128xbf16>
    %cst_36 = arith.constant dense<0.000000e+00> : vector<32x128xf32>
    %42 = tpu.matmul %41, %6, %cst_36 {dimension_numbers = #tpu.dot_dimension_numbers<[1], [0], [0], [1], [0, 0, 1, 1], [], []>} : vector<32x128xbf16>, vector<128x128xbf16>, vector<32x128xf32> -> vector<32x128xf32>
    %43 = arith.truncf %42 : vector<32x128xf32> to vector<32x128xbf16>
    %c4_37 = arith.constant 4 : index
    %c0_38 = arith.constant 0 : index
    %c0_39 = arith.constant 0 : index
    %44 = vector.load %arg2[%c4_37, %c0_38, %c0_39] : memref<16x128x128xbf16, #tpu.memory_space<vmem>>, vector<1x128x128xbf16>
    %45 = vector.shape_cast %44 : vector<1x128x128xbf16> to vector<128x128xbf16>
    %cst_40 = arith.constant dense<0.000000e+00> : vector<32x128xf32>
    %46 = tpu.matmul %43, %45, %cst_40 {dimension_numbers = #tpu.dot_dimension_numbers<[1], [0], [0], [1], [0, 0, 1, 1], [], []>} : vector<32x128xbf16>, vector<128x128xbf16>, vector<32x128xf32> -> vector<32x128xf32>
    %47 = arith.addf %39, %46 : vector<32x128xf32>
    %c5 = arith.constant 5 : index
    %c0_41 = arith.constant 0 : index
    %c0_42 = arith.constant 0 : index
    %48 = vector.load %arg5[%c5, %c0_41, %c0_42] : memref<16x32x128xbf16, #tpu.memory_space<vmem>>, vector<1x32x128xbf16>
    %49 = vector.shape_cast %48 : vector<1x32x128xbf16> to vector<32x128xbf16>
    %cst_43 = arith.constant dense<0.000000e+00> : vector<32x128xf32>
    %50 = tpu.matmul %49, %6, %cst_43 {dimension_numbers = #tpu.dot_dimension_numbers<[1], [0], [0], [1], [0, 0, 1, 1], [], []>} : vector<32x128xbf16>, vector<128x128xbf16>, vector<32x128xf32> -> vector<32x128xf32>
    %51 = arith.truncf %50 : vector<32x128xf32> to vector<32x128xbf16>
    %c5_44 = arith.constant 5 : index
    %c0_45 = arith.constant 0 : index
    %c0_46 = arith.constant 0 : index
    %52 = vector.load %arg2[%c5_44, %c0_45, %c0_46] : memref<16x128x128xbf16, #tpu.memory_space<vmem>>, vector<1x128x128xbf16>
    %53 = vector.shape_cast %52 : vector<1x128x128xbf16> to vector<128x128xbf16>
    %cst_47 = arith.constant dense<0.000000e+00> : vector<32x128xf32>
    %54 = tpu.matmul %51, %53, %cst_47 {dimension_numbers = #tpu.dot_dimension_numbers<[1], [0], [0], [1], [0, 0, 1, 1], [], []>} : vector<32x128xbf16>, vector<128x128xbf16>, vector<32x128xf32> -> vector<32x128xf32>
    %55 = arith.addf %47, %54 : vector<32x128xf32>
    %c6 = arith.constant 6 : index
    %c0_48 = arith.constant 0 : index
    %c0_49 = arith.constant 0 : index
    %56 = vector.load %arg5[%c6, %c0_48, %c0_49] : memref<16x32x128xbf16, #tpu.memory_space<vmem>>, vector<1x32x128xbf16>
    %57 = vector.shape_cast %56 : vector<1x32x128xbf16> to vector<32x128xbf16>
    %cst_50 = arith.constant dense<0.000000e+00> : vector<32x128xf32>
    %58 = tpu.matmul %57, %6, %cst_50 {dimension_numbers = #tpu.dot_dimension_numbers<[1], [0], [0], [1], [0, 0, 1, 1], [], []>} : vector<32x128xbf16>, vector<128x128xbf16>, vector<32x128xf32> -> vector<32x128xf32>
    %59 = arith.truncf %58 : vector<32x128xf32> to vector<32x128xbf16>
    %c6_51 = arith.constant 6 : index
    %c0_52 = arith.constant 0 : index
    %c0_53 = arith.constant 0 : index
    %60 = vector.load %arg2[%c6_51, %c0_52, %c0_53] : memref<16x128x128xbf16, #tpu.memory_space<vmem>>, vector<1x128x128xbf16>
    %61 = vector.shape_cast %60 : vector<1x128x128xbf16> to vector<128x128xbf16>
    %cst_54 = arith.constant dense<0.000000e+00> : vector<32x128xf32>
    %62 = tpu.matmul %59, %61, %cst_54 {dimension_numbers = #tpu.dot_dimension_numbers<[1], [0], [0], [1], [0, 0, 1, 1], [], []>} : vector<32x128xbf16>, vector<128x128xbf16>, vector<32x128xf32> -> vector<32x128xf32>
    %63 = arith.addf %55, %62 : vector<32x128xf32>
    %c7 = arith.constant 7 : index
    %c0_55 = arith.constant 0 : index
    %c0_56 = arith.constant 0 : index
    %64 = vector.load %arg5[%c7, %c0_55, %c0_56] : memref<16x32x128xbf16, #tpu.memory_space<vmem>>, vector<1x32x128xbf16>
    %65 = vector.shape_cast %64 : vector<1x32x128xbf16> to vector<32x128xbf16>
    %cst_57 = arith.constant dense<0.000000e+00> : vector<32x128xf32>
    %66 = tpu.matmul %65, %6, %cst_57 {dimension_numbers = #tpu.dot_dimension_numbers<[1], [0], [0], [1], [0, 0, 1, 1], [], []>} : vector<32x128xbf16>, vector<128x128xbf16>, vector<32x128xf32> -> vector<32x128xf32>
    %67 = arith.truncf %66 : vector<32x128xf32> to vector<32x128xbf16>
    %c7_58 = arith.constant 7 : index
    %c0_59 = arith.constant 0 : index
    %c0_60 = arith.constant 0 : index
    %68 = vector.load %arg2[%c7_58, %c0_59, %c0_60] : memref<16x128x128xbf16, #tpu.memory_space<vmem>>, vector<1x128x128xbf16>
    %69 = vector.shape_cast %68 : vector<1x128x128xbf16> to vector<128x128xbf16>
    %cst_61 = arith.constant dense<0.000000e+00> : vector<32x128xf32>
    %70 = tpu.matmul %67, %69, %cst_61 {dimension_numbers = #tpu.dot_dimension_numbers<[1], [0], [0], [1], [0, 0, 1, 1], [], []>} : vector<32x128xbf16>, vector<128x128xbf16>, vector<32x128xf32> -> vector<32x128xf32>
    %71 = arith.addf %63, %70 : vector<32x128xf32>
    %c8 = arith.constant 8 : index
    %c0_62 = arith.constant 0 : index
    %c0_63 = arith.constant 0 : index
    %72 = vector.load %arg5[%c8, %c0_62, %c0_63] : memref<16x32x128xbf16, #tpu.memory_space<vmem>>, vector<1x32x128xbf16>
    %73 = vector.shape_cast %72 : vector<1x32x128xbf16> to vector<32x128xbf16>
    %cst_64 = arith.constant dense<0.000000e+00> : vector<32x128xf32>
    %74 = tpu.matmul %73, %6, %cst_64 {dimension_numbers = #tpu.dot_dimension_numbers<[1], [0], [0], [1], [0, 0, 1, 1], [], []>} : vector<32x128xbf16>, vector<128x128xbf16>, vector<32x128xf32> -> vector<32x128xf32>
    %75 = arith.truncf %74 : vector<32x128xf32> to vector<32x128xbf16>
    %c8_65 = arith.constant 8 : index
    %c0_66 = arith.constant 0 : index
    %c0_67 = arith.constant 0 : index
    %76 = vector.load %arg2[%c8_65, %c0_66, %c0_67] : memref<16x128x128xbf16, #tpu.memory_space<vmem>>, vector<1x128x128xbf16>
    %77 = vector.shape_cast %76 : vector<1x128x128xbf16> to vector<128x128xbf16>
    %cst_68 = arith.constant dense<0.000000e+00> : vector<32x128xf32>
    %78 = tpu.matmul %75, %77, %cst_68 {dimension_numbers = #tpu.dot_dimension_numbers<[1], [0], [0], [1], [0, 0, 1, 1], [], []>} : vector<32x128xbf16>, vector<128x128xbf16>, vector<32x128xf32> -> vector<32x128xf32>
    %79 = arith.addf %71, %78 : vector<32x128xf32>
    %c9 = arith.constant 9 : index
    %c0_69 = arith.constant 0 : index
    %c0_70 = arith.constant 0 : index
    %80 = vector.load %arg5[%c9, %c0_69, %c0_70] : memref<16x32x128xbf16, #tpu.memory_space<vmem>>, vector<1x32x128xbf16>
    %81 = vector.shape_cast %80 : vector<1x32x128xbf16> to vector<32x128xbf16>
    %cst_71 = arith.constant dense<0.000000e+00> : vector<32x128xf32>
    %82 = tpu.matmul %81, %6, %cst_71 {dimension_numbers = #tpu.dot_dimension_numbers<[1], [0], [0], [1], [0, 0, 1, 1], [], []>} : vector<32x128xbf16>, vector<128x128xbf16>, vector<32x128xf32> -> vector<32x128xf32>
    %83 = arith.truncf %82 : vector<32x128xf32> to vector<32x128xbf16>
    %c9_72 = arith.constant 9 : index
    %c0_73 = arith.constant 0 : index
    %c0_74 = arith.constant 0 : index
    %84 = vector.load %arg2[%c9_72, %c0_73, %c0_74] : memref<16x128x128xbf16, #tpu.memory_space<vmem>>, vector<1x128x128xbf16>
    %85 = vector.shape_cast %84 : vector<1x128x128xbf16> to vector<128x128xbf16>
    %cst_75 = arith.constant dense<0.000000e+00> : vector<32x128xf32>
    %86 = tpu.matmul %83, %85, %cst_75 {dimension_numbers = #tpu.dot_dimension_numbers<[1], [0], [0], [1], [0, 0, 1, 1], [], []>} : vector<32x128xbf16>, vector<128x128xbf16>, vector<32x128xf32> -> vector<32x128xf32>
    %87 = arith.addf %79, %86 : vector<32x128xf32>
    %c10 = arith.constant 10 : index
    %c0_76 = arith.constant 0 : index
    %c0_77 = arith.constant 0 : index
    %88 = vector.load %arg5[%c10, %c0_76, %c0_77] : memref<16x32x128xbf16, #tpu.memory_space<vmem>>, vector<1x32x128xbf16>
    %89 = vector.shape_cast %88 : vector<1x32x128xbf16> to vector<32x128xbf16>
    %cst_78 = arith.constant dense<0.000000e+00> : vector<32x128xf32>
    %90 = tpu.matmul %89, %6, %cst_78 {dimension_numbers = #tpu.dot_dimension_numbers<[1], [0], [0], [1], [0, 0, 1, 1], [], []>} : vector<32x128xbf16>, vector<128x128xbf16>, vector<32x128xf32> -> vector<32x128xf32>
    %91 = arith.truncf %90 : vector<32x128xf32> to vector<32x128xbf16>
    %c10_79 = arith.constant 10 : index
    %c0_80 = arith.constant 0 : index
    %c0_81 = arith.constant 0 : index
    %92 = vector.load %arg2[%c10_79, %c0_80, %c0_81] : memref<16x128x128xbf16, #tpu.memory_space<vmem>>, vector<1x128x128xbf16>
    %93 = vector.shape_cast %92 : vector<1x128x128xbf16> to vector<128x128xbf16>
    %cst_82 = arith.constant dense<0.000000e+00> : vector<32x128xf32>
    %94 = tpu.matmul %91, %93, %cst_82 {dimension_numbers = #tpu.dot_dimension_numbers<[1], [0], [0], [1], [0, 0, 1, 1], [], []>} : vector<32x128xbf16>, vector<128x128xbf16>, vector<32x128xf32> -> vector<32x128xf32>
    %95 = arith.addf %87, %94 : vector<32x128xf32>
    %c11 = arith.constant 11 : index
    %c0_83 = arith.constant 0 : index
    %c0_84 = arith.constant 0 : index
    %96 = vector.load %arg5[%c11, %c0_83, %c0_84] : memref<16x32x128xbf16, #tpu.memory_space<vmem>>, vector<1x32x128xbf16>
    %97 = vector.shape_cast %96 : vector<1x32x128xbf16> to vector<32x128xbf16>
    %cst_85 = arith.constant dense<0.000000e+00> : vector<32x128xf32>
    %98 = tpu.matmul %97, %6, %cst_85 {dimension_numbers = #tpu.dot_dimension_numbers<[1], [0], [0], [1], [0, 0, 1, 1], [], []>} : vector<32x128xbf16>, vector<128x128xbf16>, vector<32x128xf32> -> vector<32x128xf32>
    %99 = arith.truncf %98 : vector<32x128xf32> to vector<32x128xbf16>
    %c11_86 = arith.constant 11 : index
    %c0_87 = arith.constant 0 : index
    %c0_88 = arith.constant 0 : index
    %100 = vector.load %arg2[%c11_86, %c0_87, %c0_88] : memref<16x128x128xbf16, #tpu.memory_space<vmem>>, vector<1x128x128xbf16>
    %101 = vector.shape_cast %100 : vector<1x128x128xbf16> to vector<128x128xbf16>
    %cst_89 = arith.constant dense<0.000000e+00> : vector<32x128xf32>
    %102 = tpu.matmul %99, %101, %cst_89 {dimension_numbers = #tpu.dot_dimension_numbers<[1], [0], [0], [1], [0, 0, 1, 1], [], []>} : vector<32x128xbf16>, vector<128x128xbf16>, vector<32x128xf32> -> vector<32x128xf32>
    %103 = arith.addf %95, %102 : vector<32x128xf32>
    %c12 = arith.constant 12 : index
    %c0_90 = arith.constant 0 : index
    %c0_91 = arith.constant 0 : index
    %104 = vector.load %arg5[%c12, %c0_90, %c0_91] : memref<16x32x128xbf16, #tpu.memory_space<vmem>>, vector<1x32x128xbf16>
    %105 = vector.shape_cast %104 : vector<1x32x128xbf16> to vector<32x128xbf16>
    %cst_92 = arith.constant dense<0.000000e+00> : vector<32x128xf32>
    %106 = tpu.matmul %105, %6, %cst_92 {dimension_numbers = #tpu.dot_dimension_numbers<[1], [0], [0], [1], [0, 0, 1, 1], [], []>} : vector<32x128xbf16>, vector<128x128xbf16>, vector<32x128xf32> -> vector<32x128xf32>
    %107 = arith.truncf %106 : vector<32x128xf32> to vector<32x128xbf16>
    %c12_93 = arith.constant 12 : index
    %c0_94 = arith.constant 0 : index
    %c0_95 = arith.constant 0 : index
    %108 = vector.load %arg2[%c12_93, %c0_94, %c0_95] : memref<16x128x128xbf16, #tpu.memory_space<vmem>>, vector<1x128x128xbf16>
    %109 = vector.shape_cast %108 : vector<1x128x128xbf16> to vector<128x128xbf16>
    %cst_96 = arith.constant dense<0.000000e+00> : vector<32x128xf32>
    %110 = tpu.matmul %107, %109, %cst_96 {dimension_numbers = #tpu.dot_dimension_numbers<[1], [0], [0], [1], [0, 0, 1, 1], [], []>} : vector<32x128xbf16>, vector<128x128xbf16>, vector<32x128xf32> -> vector<32x128xf32>
    %111 = arith.addf %103, %110 : vector<32x128xf32>
    %c13 = arith.constant 13 : index
    %c0_97 = arith.constant 0 : index
    %c0_98 = arith.constant 0 : index
    %112 = vector.load %arg5[%c13, %c0_97, %c0_98] : memref<16x32x128xbf16, #tpu.memory_space<vmem>>, vector<1x32x128xbf16>
    %113 = vector.shape_cast %112 : vector<1x32x128xbf16> to vector<32x128xbf16>
    %cst_99 = arith.constant dense<0.000000e+00> : vector<32x128xf32>
    %114 = tpu.matmul %113, %6, %cst_99 {dimension_numbers = #tpu.dot_dimension_numbers<[1], [0], [0], [1], [0, 0, 1, 1], [], []>} : vector<32x128xbf16>, vector<128x128xbf16>, vector<32x128xf32> -> vector<32x128xf32>
    %115 = arith.truncf %114 : vector<32x128xf32> to vector<32x128xbf16>
    %c13_100 = arith.constant 13 : index
    %c0_101 = arith.constant 0 : index
    %c0_102 = arith.constant 0 : index
    %116 = vector.load %arg2[%c13_100, %c0_101, %c0_102] : memref<16x128x128xbf16, #tpu.memory_space<vmem>>, vector<1x128x128xbf16>
    %117 = vector.shape_cast %116 : vector<1x128x128xbf16> to vector<128x128xbf16>
    %cst_103 = arith.constant dense<0.000000e+00> : vector<32x128xf32>
    %118 = tpu.matmul %115, %117, %cst_103 {dimension_numbers = #tpu.dot_dimension_numbers<[1], [0], [0], [1], [0, 0, 1, 1], [], []>} : vector<32x128xbf16>, vector<128x128xbf16>, vector<32x128xf32> -> vector<32x128xf32>
    %119 = arith.addf %111, %118 : vector<32x128xf32>
    %c14 = arith.constant 14 : index
    %c0_104 = arith.constant 0 : index
    %c0_105 = arith.constant 0 : index
    %120 = vector.load %arg5[%c14, %c0_104, %c0_105] : memref<16x32x128xbf16, #tpu.memory_space<vmem>>, vector<1x32x128xbf16>
    %121 = vector.shape_cast %120 : vector<1x32x128xbf16> to vector<32x128xbf16>
    %cst_106 = arith.constant dense<0.000000e+00> : vector<32x128xf32>
    %122 = tpu.matmul %121, %6, %cst_106 {dimension_numbers = #tpu.dot_dimension_numbers<[1], [0], [0], [1], [0, 0, 1, 1], [], []>} : vector<32x128xbf16>, vector<128x128xbf16>, vector<32x128xf32> -> vector<32x128xf32>
    %123 = arith.truncf %122 : vector<32x128xf32> to vector<32x128xbf16>
    %c14_107 = arith.constant 14 : index
    %c0_108 = arith.constant 0 : index
    %c0_109 = arith.constant 0 : index
    %124 = vector.load %arg2[%c14_107, %c0_108, %c0_109] : memref<16x128x128xbf16, #tpu.memory_space<vmem>>, vector<1x128x128xbf16>
    %125 = vector.shape_cast %124 : vector<1x128x128xbf16> to vector<128x128xbf16>
    %cst_110 = arith.constant dense<0.000000e+00> : vector<32x128xf32>
    %126 = tpu.matmul %123, %125, %cst_110 {dimension_numbers = #tpu.dot_dimension_numbers<[1], [0], [0], [1], [0, 0, 1, 1], [], []>} : vector<32x128xbf16>, vector<128x128xbf16>, vector<32x128xf32> -> vector<32x128xf32>
    %127 = arith.addf %119, %126 : vector<32x128xf32>
    %c15 = arith.constant 15 : index
    %c0_111 = arith.constant 0 : index
    %c0_112 = arith.constant 0 : index
    %128 = vector.load %arg5[%c15, %c0_111, %c0_112] : memref<16x32x128xbf16, #tpu.memory_space<vmem>>, vector<1x32x128xbf16>
    %129 = vector.shape_cast %128 : vector<1x32x128xbf16> to vector<32x128xbf16>
    %cst_113 = arith.constant dense<0.000000e+00> : vector<32x128xf32>
    %130 = tpu.matmul %129, %6, %cst_113 {dimension_numbers = #tpu.dot_dimension_numbers<[1], [0], [0], [1], [0, 0, 1, 1], [], []>} : vector<32x128xbf16>, vector<128x128xbf16>, vector<32x128xf32> -> vector<32x128xf32>
    %131 = arith.truncf %130 : vector<32x128xf32> to vector<32x128xbf16>
    %c15_114 = arith.constant 15 : index
    %c0_115 = arith.constant 0 : index
    %c0_116 = arith.constant 0 : index
    %132 = vector.load %arg2[%c15_114, %c0_115, %c0_116] : memref<16x128x128xbf16, #tpu.memory_space<vmem>>, vector<1x128x128xbf16>
    %133 = vector.shape_cast %132 : vector<1x128x128xbf16> to vector<128x128xbf16>
    %cst_117 = arith.constant dense<0.000000e+00> : vector<32x128xf32>
    %134 = tpu.matmul %131, %133, %cst_117 {dimension_numbers = #tpu.dot_dimension_numbers<[1], [0], [0], [1], [0, 0, 1, 1], [], []>} : vector<32x128xbf16>, vector<128x128xbf16>, vector<32x128xf32> -> vector<32x128xf32>
    %135 = arith.addf %127, %134 : vector<32x128xf32>
    %cst_118 = arith.constant dense<0.000000e+00> : vector<128xf32>
    %136 = vector.multi_reduction <add>, %135, %cst_118 [0] : vector<32x128xf32> to vector<128xf32>
    %137 = vector.shape_cast %136 : vector<128xf32> to vector<1x128xf32>
    %cst_119 = arith.constant 3.200000e+01 : f32
    %138 = vector.broadcast %cst_119 : f32 to vector<1x128xf32>
    %139 = arith.divf %137, %138 : vector<1x128xf32>
    %140 = vector.broadcast %139 : vector<1x128xf32> to vector<32x128xf32>
    %141 = arith.subf %135, %140 : vector<32x128xf32>
    %142 = arith.mulf %141, %141 : vector<32x128xf32>
    %cst_120 = arith.constant dense<0.000000e+00> : vector<128xf32>
    %143 = vector.multi_reduction <add>, %142, %cst_120 [0] : vector<32x128xf32> to vector<128xf32>
    %144 = vector.shape_cast %143 : vector<128xf32> to vector<1x128xf32>
    %cst_121 = arith.constant 3.200000e+01 : f32
    %145 = vector.broadcast %cst_121 : f32 to vector<1x128xf32>
    %146 = arith.divf %144, %145 : vector<1x128xf32>
    %cst_122 = arith.constant 9.99999974E-6 : f32
    %147 = vector.broadcast %cst_122 : f32 to vector<1x128xf32>
    %148 = arith.addf %146, %147 : vector<1x128xf32>
    %149 = math.rsqrt %148 : vector<1x128xf32>
    %150 = vector.broadcast %149 : vector<1x128xf32> to vector<32x128xf32>
    %151 = arith.mulf %135, %150 : vector<32x128xf32>
    %152 = arith.mulf %139, %149 : vector<1x128xf32>
    %153 = vector.broadcast %152 : vector<1x128xf32> to vector<32x128xf32>
    %154 = arith.subf %151, %153 : vector<32x128xf32>
    %cst_123 = arith.constant 2.000000e-01 : f32
    %155 = vector.broadcast %cst_123 : f32 to vector<32x128xf32>
    %156 = arith.mulf %155, %154 : vector<32x128xf32>
    %157 = arith.maximumf %154, %156 : vector<32x128xf32>
    %158 = arith.truncf %157 : vector<32x128xf32> to vector<32x128xbf16>
    %cst_124 = arith.constant 0.000000e+00 : f32
    %159 = vector.broadcast %cst_124 : f32 to vector<8x128xf32>
    %c0_125 = arith.constant 0 : index
    %c0_126 = arith.constant 0 : index
    %c0_127 = arith.constant 0 : index
    %160 = vector.load %arg6[%c0_125, %c0_126, %c0_127] : memref<16x8x32xbf16, #tpu.memory_space<vmem>>, vector<1x8x32xbf16>
    %161 = vector.shape_cast %160 : vector<1x8x32xbf16> to vector<8x32xbf16>
    %cst_128 = arith.constant dense<0.000000e+00> : vector<8x128xf32>
    %162 = tpu.matmul %161, %158, %cst_128 {dimension_numbers = #tpu.dot_dimension_numbers<[1], [0], [0], [1], [0, 0, 1, 1], [], []>} : vector<8x32xbf16>, vector<32x128xbf16>, vector<8x128xf32> -> vector<8x128xf32>
    %163 = arith.truncf %162 : vector<8x128xf32> to vector<8x128xbf16>
    %c0_129 = arith.constant 0 : index
    %c0_130 = arith.constant 0 : index
    %c0_131 = arith.constant 0 : index
    %164 = vector.load %arg3[%c0_129, %c0_130, %c0_131] : memref<16x128x128xbf16, #tpu.memory_space<vmem>>, vector<1x128x128xbf16>
    %165 = vector.shape_cast %164 : vector<1x128x128xbf16> to vector<128x128xbf16>
    %cst_132 = arith.constant dense<0.000000e+00> : vector<8x128xf32>
    %166 = tpu.matmul %163, %165, %cst_132 {dimension_numbers = #tpu.dot_dimension_numbers<[1], [0], [0], [1], [0, 0, 1, 1], [], []>} : vector<8x128xbf16>, vector<128x128xbf16>, vector<8x128xf32> -> vector<8x128xf32>
    %167 = arith.addf %159, %166 : vector<8x128xf32>
    %c1_133 = arith.constant 1 : index
    %c0_134 = arith.constant 0 : index
    %c0_135 = arith.constant 0 : index
    %168 = vector.load %arg6[%c1_133, %c0_134, %c0_135] : memref<16x8x32xbf16, #tpu.memory_space<vmem>>, vector<1x8x32xbf16>
    %169 = vector.shape_cast %168 : vector<1x8x32xbf16> to vector<8x32xbf16>
    %cst_136 = arith.constant dense<0.000000e+00> : vector<8x128xf32>
    %170 = tpu.matmul %169, %158, %cst_136 {dimension_numbers = #tpu.dot_dimension_numbers<[1], [0], [0], [1], [0, 0, 1, 1], [], []>} : vector<8x32xbf16>, vector<32x128xbf16>, vector<8x128xf32> -> vector<8x128xf32>
    %171 = arith.truncf %170 : vector<8x128xf32> to vector<8x128xbf16>
    %c1_137 = arith.constant 1 : index
    %c0_138 = arith.constant 0 : index
    %c0_139 = arith.constant 0 : index
    %172 = vector.load %arg3[%c1_137, %c0_138, %c0_139] : memref<16x128x128xbf16, #tpu.memory_space<vmem>>, vector<1x128x128xbf16>
    %173 = vector.shape_cast %172 : vector<1x128x128xbf16> to vector<128x128xbf16>
    %cst_140 = arith.constant dense<0.000000e+00> : vector<8x128xf32>
    %174 = tpu.matmul %171, %173, %cst_140 {dimension_numbers = #tpu.dot_dimension_numbers<[1], [0], [0], [1], [0, 0, 1, 1], [], []>} : vector<8x128xbf16>, vector<128x128xbf16>, vector<8x128xf32> -> vector<8x128xf32>
    %175 = arith.addf %167, %174 : vector<8x128xf32>
    %c2_141 = arith.constant 2 : index
    %c0_142 = arith.constant 0 : index
    %c0_143 = arith.constant 0 : index
    %176 = vector.load %arg6[%c2_141, %c0_142, %c0_143] : memref<16x8x32xbf16, #tpu.memory_space<vmem>>, vector<1x8x32xbf16>
    %177 = vector.shape_cast %176 : vector<1x8x32xbf16> to vector<8x32xbf16>
    %cst_144 = arith.constant dense<0.000000e+00> : vector<8x128xf32>
    %178 = tpu.matmul %177, %158, %cst_144 {dimension_numbers = #tpu.dot_dimension_numbers<[1], [0], [0], [1], [0, 0, 1, 1], [], []>} : vector<8x32xbf16>, vector<32x128xbf16>, vector<8x128xf32> -> vector<8x128xf32>
    %179 = arith.truncf %178 : vector<8x128xf32> to vector<8x128xbf16>
    %c2_145 = arith.constant 2 : index
    %c0_146 = arith.constant 0 : index
    %c0_147 = arith.constant 0 : index
    %180 = vector.load %arg3[%c2_145, %c0_146, %c0_147] : memref<16x128x128xbf16, #tpu.memory_space<vmem>>, vector<1x128x128xbf16>
    %181 = vector.shape_cast %180 : vector<1x128x128xbf16> to vector<128x128xbf16>
    %cst_148 = arith.constant dense<0.000000e+00> : vector<8x128xf32>
    %182 = tpu.matmul %179, %181, %cst_148 {dimension_numbers = #tpu.dot_dimension_numbers<[1], [0], [0], [1], [0, 0, 1, 1], [], []>} : vector<8x128xbf16>, vector<128x128xbf16>, vector<8x128xf32> -> vector<8x128xf32>
    %183 = arith.addf %175, %182 : vector<8x128xf32>
    %c3_149 = arith.constant 3 : index
    %c0_150 = arith.constant 0 : index
    %c0_151 = arith.constant 0 : index
    %184 = vector.load %arg6[%c3_149, %c0_150, %c0_151] : memref<16x8x32xbf16, #tpu.memory_space<vmem>>, vector<1x8x32xbf16>
    %185 = vector.shape_cast %184 : vector<1x8x32xbf16> to vector<8x32xbf16>
    %cst_152 = arith.constant dense<0.000000e+00> : vector<8x128xf32>
    %186 = tpu.matmul %185, %158, %cst_152 {dimension_numbers = #tpu.dot_dimension_numbers<[1], [0], [0], [1], [0, 0, 1, 1], [], []>} : vector<8x32xbf16>, vector<32x128xbf16>, vector<8x128xf32> -> vector<8x128xf32>
    %187 = arith.truncf %186 : vector<8x128xf32> to vector<8x128xbf16>
    %c3_153 = arith.constant 3 : index
    %c0_154 = arith.constant 0 : index
    %c0_155 = arith.constant 0 : index
    %188 = vector.load %arg3[%c3_153, %c0_154, %c0_155] : memref<16x128x128xbf16, #tpu.memory_space<vmem>>, vector<1x128x128xbf16>
    %189 = vector.shape_cast %188 : vector<1x128x128xbf16> to vector<128x128xbf16>
    %cst_156 = arith.constant dense<0.000000e+00> : vector<8x128xf32>
    %190 = tpu.matmul %187, %189, %cst_156 {dimension_numbers = #tpu.dot_dimension_numbers<[1], [0], [0], [1], [0, 0, 1, 1], [], []>} : vector<8x128xbf16>, vector<128x128xbf16>, vector<8x128xf32> -> vector<8x128xf32>
    %191 = arith.addf %183, %190 : vector<8x128xf32>
    %c4_157 = arith.constant 4 : index
    %c0_158 = arith.constant 0 : index
    %c0_159 = arith.constant 0 : index
    %192 = vector.load %arg6[%c4_157, %c0_158, %c0_159] : memref<16x8x32xbf16, #tpu.memory_space<vmem>>, vector<1x8x32xbf16>
    %193 = vector.shape_cast %192 : vector<1x8x32xbf16> to vector<8x32xbf16>
    %cst_160 = arith.constant dense<0.000000e+00> : vector<8x128xf32>
    %194 = tpu.matmul %193, %158, %cst_160 {dimension_numbers = #tpu.dot_dimension_numbers<[1], [0], [0], [1], [0, 0, 1, 1], [], []>} : vector<8x32xbf16>, vector<32x128xbf16>, vector<8x128xf32> -> vector<8x128xf32>
    %195 = arith.truncf %194 : vector<8x128xf32> to vector<8x128xbf16>
    %c4_161 = arith.constant 4 : index
    %c0_162 = arith.constant 0 : index
    %c0_163 = arith.constant 0 : index
    %196 = vector.load %arg3[%c4_161, %c0_162, %c0_163] : memref<16x128x128xbf16, #tpu.memory_space<vmem>>, vector<1x128x128xbf16>
    %197 = vector.shape_cast %196 : vector<1x128x128xbf16> to vector<128x128xbf16>
    %cst_164 = arith.constant dense<0.000000e+00> : vector<8x128xf32>
    %198 = tpu.matmul %195, %197, %cst_164 {dimension_numbers = #tpu.dot_dimension_numbers<[1], [0], [0], [1], [0, 0, 1, 1], [], []>} : vector<8x128xbf16>, vector<128x128xbf16>, vector<8x128xf32> -> vector<8x128xf32>
    %199 = arith.addf %191, %198 : vector<8x128xf32>
    %c5_165 = arith.constant 5 : index
    %c0_166 = arith.constant 0 : index
    %c0_167 = arith.constant 0 : index
    %200 = vector.load %arg6[%c5_165, %c0_166, %c0_167] : memref<16x8x32xbf16, #tpu.memory_space<vmem>>, vector<1x8x32xbf16>
    %201 = vector.shape_cast %200 : vector<1x8x32xbf16> to vector<8x32xbf16>
    %cst_168 = arith.constant dense<0.000000e+00> : vector<8x128xf32>
    %202 = tpu.matmul %201, %158, %cst_168 {dimension_numbers = #tpu.dot_dimension_numbers<[1], [0], [0], [1], [0, 0, 1, 1], [], []>} : vector<8x32xbf16>, vector<32x128xbf16>, vector<8x128xf32> -> vector<8x128xf32>
    %203 = arith.truncf %202 : vector<8x128xf32> to vector<8x128xbf16>
    %c5_169 = arith.constant 5 : index
    %c0_170 = arith.constant 0 : index
    %c0_171 = arith.constant 0 : index
    %204 = vector.load %arg3[%c5_169, %c0_170, %c0_171] : memref<16x128x128xbf16, #tpu.memory_space<vmem>>, vector<1x128x128xbf16>
    %205 = vector.shape_cast %204 : vector<1x128x128xbf16> to vector<128x128xbf16>
    %cst_172 = arith.constant dense<0.000000e+00> : vector<8x128xf32>
    %206 = tpu.matmul %203, %205, %cst_172 {dimension_numbers = #tpu.dot_dimension_numbers<[1], [0], [0], [1], [0, 0, 1, 1], [], []>} : vector<8x128xbf16>, vector<128x128xbf16>, vector<8x128xf32> -> vector<8x128xf32>
    %207 = arith.addf %199, %206 : vector<8x128xf32>
    %c6_173 = arith.constant 6 : index
    %c0_174 = arith.constant 0 : index
    %c0_175 = arith.constant 0 : index
    %208 = vector.load %arg6[%c6_173, %c0_174, %c0_175] : memref<16x8x32xbf16, #tpu.memory_space<vmem>>, vector<1x8x32xbf16>
    %209 = vector.shape_cast %208 : vector<1x8x32xbf16> to vector<8x32xbf16>
    %cst_176 = arith.constant dense<0.000000e+00> : vector<8x128xf32>
    %210 = tpu.matmul %209, %158, %cst_176 {dimension_numbers = #tpu.dot_dimension_numbers<[1], [0], [0], [1], [0, 0, 1, 1], [], []>} : vector<8x32xbf16>, vector<32x128xbf16>, vector<8x128xf32> -> vector<8x128xf32>
    %211 = arith.truncf %210 : vector<8x128xf32> to vector<8x128xbf16>
    %c6_177 = arith.constant 6 : index
    %c0_178 = arith.constant 0 : index
    %c0_179 = arith.constant 0 : index
    %212 = vector.load %arg3[%c6_177, %c0_178, %c0_179] : memref<16x128x128xbf16, #tpu.memory_space<vmem>>, vector<1x128x128xbf16>
    %213 = vector.shape_cast %212 : vector<1x128x128xbf16> to vector<128x128xbf16>
    %cst_180 = arith.constant dense<0.000000e+00> : vector<8x128xf32>
    %214 = tpu.matmul %211, %213, %cst_180 {dimension_numbers = #tpu.dot_dimension_numbers<[1], [0], [0], [1], [0, 0, 1, 1], [], []>} : vector<8x128xbf16>, vector<128x128xbf16>, vector<8x128xf32> -> vector<8x128xf32>
    %215 = arith.addf %207, %214 : vector<8x128xf32>
    %c7_181 = arith.constant 7 : index
    %c0_182 = arith.constant 0 : index
    %c0_183 = arith.constant 0 : index
    %216 = vector.load %arg6[%c7_181, %c0_182, %c0_183] : memref<16x8x32xbf16, #tpu.memory_space<vmem>>, vector<1x8x32xbf16>
    %217 = vector.shape_cast %216 : vector<1x8x32xbf16> to vector<8x32xbf16>
    %cst_184 = arith.constant dense<0.000000e+00> : vector<8x128xf32>
    %218 = tpu.matmul %217, %158, %cst_184 {dimension_numbers = #tpu.dot_dimension_numbers<[1], [0], [0], [1], [0, 0, 1, 1], [], []>} : vector<8x32xbf16>, vector<32x128xbf16>, vector<8x128xf32> -> vector<8x128xf32>
    %219 = arith.truncf %218 : vector<8x128xf32> to vector<8x128xbf16>
    %c7_185 = arith.constant 7 : index
    %c0_186 = arith.constant 0 : index
    %c0_187 = arith.constant 0 : index
    %220 = vector.load %arg3[%c7_185, %c0_186, %c0_187] : memref<16x128x128xbf16, #tpu.memory_space<vmem>>, vector<1x128x128xbf16>
    %221 = vector.shape_cast %220 : vector<1x128x128xbf16> to vector<128x128xbf16>
    %cst_188 = arith.constant dense<0.000000e+00> : vector<8x128xf32>
    %222 = tpu.matmul %219, %221, %cst_188 {dimension_numbers = #tpu.dot_dimension_numbers<[1], [0], [0], [1], [0, 0, 1, 1], [], []>} : vector<8x128xbf16>, vector<128x128xbf16>, vector<8x128xf32> -> vector<8x128xf32>
    %223 = arith.addf %215, %222 : vector<8x128xf32>
    %c8_189 = arith.constant 8 : index
    %c0_190 = arith.constant 0 : index
    %c0_191 = arith.constant 0 : index
    %224 = vector.load %arg6[%c8_189, %c0_190, %c0_191] : memref<16x8x32xbf16, #tpu.memory_space<vmem>>, vector<1x8x32xbf16>
    %225 = vector.shape_cast %224 : vector<1x8x32xbf16> to vector<8x32xbf16>
    %cst_192 = arith.constant dense<0.000000e+00> : vector<8x128xf32>
    %226 = tpu.matmul %225, %158, %cst_192 {dimension_numbers = #tpu.dot_dimension_numbers<[1], [0], [0], [1], [0, 0, 1, 1], [], []>} : vector<8x32xbf16>, vector<32x128xbf16>, vector<8x128xf32> -> vector<8x128xf32>
    %227 = arith.truncf %226 : vector<8x128xf32> to vector<8x128xbf16>
    %c8_193 = arith.constant 8 : index
    %c0_194 = arith.constant 0 : index
    %c0_195 = arith.constant 0 : index
    %228 = vector.load %arg3[%c8_193, %c0_194, %c0_195] : memref<16x128x128xbf16, #tpu.memory_space<vmem>>, vector<1x128x128xbf16>
    %229 = vector.shape_cast %228 : vector<1x128x128xbf16> to vector<128x128xbf16>
    %cst_196 = arith.constant dense<0.000000e+00> : vector<8x128xf32>
    %230 = tpu.matmul %227, %229, %cst_196 {dimension_numbers = #tpu.dot_dimension_numbers<[1], [0], [0], [1], [0, 0, 1, 1], [], []>} : vector<8x128xbf16>, vector<128x128xbf16>, vector<8x128xf32> -> vector<8x128xf32>
    %231 = arith.addf %223, %230 : vector<8x128xf32>
    %c9_197 = arith.constant 9 : index
    %c0_198 = arith.constant 0 : index
    %c0_199 = arith.constant 0 : index
    %232 = vector.load %arg6[%c9_197, %c0_198, %c0_199] : memref<16x8x32xbf16, #tpu.memory_space<vmem>>, vector<1x8x32xbf16>
    %233 = vector.shape_cast %232 : vector<1x8x32xbf16> to vector<8x32xbf16>
    %cst_200 = arith.constant dense<0.000000e+00> : vector<8x128xf32>
    %234 = tpu.matmul %233, %158, %cst_200 {dimension_numbers = #tpu.dot_dimension_numbers<[1], [0], [0], [1], [0, 0, 1, 1], [], []>} : vector<8x32xbf16>, vector<32x128xbf16>, vector<8x128xf32> -> vector<8x128xf32>
    %235 = arith.truncf %234 : vector<8x128xf32> to vector<8x128xbf16>
    %c9_201 = arith.constant 9 : index
    %c0_202 = arith.constant 0 : index
    %c0_203 = arith.constant 0 : index
    %236 = vector.load %arg3[%c9_201, %c0_202, %c0_203] : memref<16x128x128xbf16, #tpu.memory_space<vmem>>, vector<1x128x128xbf16>
    %237 = vector.shape_cast %236 : vector<1x128x128xbf16> to vector<128x128xbf16>
    %cst_204 = arith.constant dense<0.000000e+00> : vector<8x128xf32>
    %238 = tpu.matmul %235, %237, %cst_204 {dimension_numbers = #tpu.dot_dimension_numbers<[1], [0], [0], [1], [0, 0, 1, 1], [], []>} : vector<8x128xbf16>, vector<128x128xbf16>, vector<8x128xf32> -> vector<8x128xf32>
    %239 = arith.addf %231, %238 : vector<8x128xf32>
    %c10_205 = arith.constant 10 : index
    %c0_206 = arith.constant 0 : index
    %c0_207 = arith.constant 0 : index
    %240 = vector.load %arg6[%c10_205, %c0_206, %c0_207] : memref<16x8x32xbf16, #tpu.memory_space<vmem>>, vector<1x8x32xbf16>
    %241 = vector.shape_cast %240 : vector<1x8x32xbf16> to vector<8x32xbf16>
    %cst_208 = arith.constant dense<0.000000e+00> : vector<8x128xf32>
    %242 = tpu.matmul %241, %158, %cst_208 {dimension_numbers = #tpu.dot_dimension_numbers<[1], [0], [0], [1], [0, 0, 1, 1], [], []>} : vector<8x32xbf16>, vector<32x128xbf16>, vector<8x128xf32> -> vector<8x128xf32>
    %243 = arith.truncf %242 : vector<8x128xf32> to vector<8x128xbf16>
    %c10_209 = arith.constant 10 : index
    %c0_210 = arith.constant 0 : index
    %c0_211 = arith.constant 0 : index
    %244 = vector.load %arg3[%c10_209, %c0_210, %c0_211] : memref<16x128x128xbf16, #tpu.memory_space<vmem>>, vector<1x128x128xbf16>
    %245 = vector.shape_cast %244 : vector<1x128x128xbf16> to vector<128x128xbf16>
    %cst_212 = arith.constant dense<0.000000e+00> : vector<8x128xf32>
    %246 = tpu.matmul %243, %245, %cst_212 {dimension_numbers = #tpu.dot_dimension_numbers<[1], [0], [0], [1], [0, 0, 1, 1], [], []>} : vector<8x128xbf16>, vector<128x128xbf16>, vector<8x128xf32> -> vector<8x128xf32>
    %247 = arith.addf %239, %246 : vector<8x128xf32>
    %c11_213 = arith.constant 11 : index
    %c0_214 = arith.constant 0 : index
    %c0_215 = arith.constant 0 : index
    %248 = vector.load %arg6[%c11_213, %c0_214, %c0_215] : memref<16x8x32xbf16, #tpu.memory_space<vmem>>, vector<1x8x32xbf16>
    %249 = vector.shape_cast %248 : vector<1x8x32xbf16> to vector<8x32xbf16>
    %cst_216 = arith.constant dense<0.000000e+00> : vector<8x128xf32>
    %250 = tpu.matmul %249, %158, %cst_216 {dimension_numbers = #tpu.dot_dimension_numbers<[1], [0], [0], [1], [0, 0, 1, 1], [], []>} : vector<8x32xbf16>, vector<32x128xbf16>, vector<8x128xf32> -> vector<8x128xf32>
    %251 = arith.truncf %250 : vector<8x128xf32> to vector<8x128xbf16>
    %c11_217 = arith.constant 11 : index
    %c0_218 = arith.constant 0 : index
    %c0_219 = arith.constant 0 : index
    %252 = vector.load %arg3[%c11_217, %c0_218, %c0_219] : memref<16x128x128xbf16, #tpu.memory_space<vmem>>, vector<1x128x128xbf16>
    %253 = vector.shape_cast %252 : vector<1x128x128xbf16> to vector<128x128xbf16>
    %cst_220 = arith.constant dense<0.000000e+00> : vector<8x128xf32>
    %254 = tpu.matmul %251, %253, %cst_220 {dimension_numbers = #tpu.dot_dimension_numbers<[1], [0], [0], [1], [0, 0, 1, 1], [], []>} : vector<8x128xbf16>, vector<128x128xbf16>, vector<8x128xf32> -> vector<8x128xf32>
    %255 = arith.addf %247, %254 : vector<8x128xf32>
    %c12_221 = arith.constant 12 : index
    %c0_222 = arith.constant 0 : index
    %c0_223 = arith.constant 0 : index
    %256 = vector.load %arg6[%c12_221, %c0_222, %c0_223] : memref<16x8x32xbf16, #tpu.memory_space<vmem>>, vector<1x8x32xbf16>
    %257 = vector.shape_cast %256 : vector<1x8x32xbf16> to vector<8x32xbf16>
    %cst_224 = arith.constant dense<0.000000e+00> : vector<8x128xf32>
    %258 = tpu.matmul %257, %158, %cst_224 {dimension_numbers = #tpu.dot_dimension_numbers<[1], [0], [0], [1], [0, 0, 1, 1], [], []>} : vector<8x32xbf16>, vector<32x128xbf16>, vector<8x128xf32> -> vector<8x128xf32>
    %259 = arith.truncf %258 : vector<8x128xf32> to vector<8x128xbf16>
    %c12_225 = arith.constant 12 : index
    %c0_226 = arith.constant 0 : index
    %c0_227 = arith.constant 0 : index
    %260 = vector.load %arg3[%c12_225, %c0_226, %c0_227] : memref<16x128x128xbf16, #tpu.memory_space<vmem>>, vector<1x128x128xbf16>
    %261 = vector.shape_cast %260 : vector<1x128x128xbf16> to vector<128x128xbf16>
    %cst_228 = arith.constant dense<0.000000e+00> : vector<8x128xf32>
    %262 = tpu.matmul %259, %261, %cst_228 {dimension_numbers = #tpu.dot_dimension_numbers<[1], [0], [0], [1], [0, 0, 1, 1], [], []>} : vector<8x128xbf16>, vector<128x128xbf16>, vector<8x128xf32> -> vector<8x128xf32>
    %263 = arith.addf %255, %262 : vector<8x128xf32>
    %c13_229 = arith.constant 13 : index
    %c0_230 = arith.constant 0 : index
    %c0_231 = arith.constant 0 : index
    %264 = vector.load %arg6[%c13_229, %c0_230, %c0_231] : memref<16x8x32xbf16, #tpu.memory_space<vmem>>, vector<1x8x32xbf16>
    %265 = vector.shape_cast %264 : vector<1x8x32xbf16> to vector<8x32xbf16>
    %cst_232 = arith.constant dense<0.000000e+00> : vector<8x128xf32>
    %266 = tpu.matmul %265, %158, %cst_232 {dimension_numbers = #tpu.dot_dimension_numbers<[1], [0], [0], [1], [0, 0, 1, 1], [], []>} : vector<8x32xbf16>, vector<32x128xbf16>, vector<8x128xf32> -> vector<8x128xf32>
    %267 = arith.truncf %266 : vector<8x128xf32> to vector<8x128xbf16>
    %c13_233 = arith.constant 13 : index
    %c0_234 = arith.constant 0 : index
    %c0_235 = arith.constant 0 : index
    %268 = vector.load %arg3[%c13_233, %c0_234, %c0_235] : memref<16x128x128xbf16, #tpu.memory_space<vmem>>, vector<1x128x128xbf16>
    %269 = vector.shape_cast %268 : vector<1x128x128xbf16> to vector<128x128xbf16>
    %cst_236 = arith.constant dense<0.000000e+00> : vector<8x128xf32>
    %270 = tpu.matmul %267, %269, %cst_236 {dimension_numbers = #tpu.dot_dimension_numbers<[1], [0], [0], [1], [0, 0, 1, 1], [], []>} : vector<8x128xbf16>, vector<128x128xbf16>, vector<8x128xf32> -> vector<8x128xf32>
    %271 = arith.addf %263, %270 : vector<8x128xf32>
    %c14_237 = arith.constant 14 : index
    %c0_238 = arith.constant 0 : index
    %c0_239 = arith.constant 0 : index
    %272 = vector.load %arg6[%c14_237, %c0_238, %c0_239] : memref<16x8x32xbf16, #tpu.memory_space<vmem>>, vector<1x8x32xbf16>
    %273 = vector.shape_cast %272 : vector<1x8x32xbf16> to vector<8x32xbf16>
    %cst_240 = arith.constant dense<0.000000e+00> : vector<8x128xf32>
    %274 = tpu.matmul %273, %158, %cst_240 {dimension_numbers = #tpu.dot_dimension_numbers<[1], [0], [0], [1], [0, 0, 1, 1], [], []>} : vector<8x32xbf16>, vector<32x128xbf16>, vector<8x128xf32> -> vector<8x128xf32>
    %275 = arith.truncf %274 : vector<8x128xf32> to vector<8x128xbf16>
    %c14_241 = arith.constant 14 : index
    %c0_242 = arith.constant 0 : index
    %c0_243 = arith.constant 0 : index
    %276 = vector.load %arg3[%c14_241, %c0_242, %c0_243] : memref<16x128x128xbf16, #tpu.memory_space<vmem>>, vector<1x128x128xbf16>
    %277 = vector.shape_cast %276 : vector<1x128x128xbf16> to vector<128x128xbf16>
    %cst_244 = arith.constant dense<0.000000e+00> : vector<8x128xf32>
    %278 = tpu.matmul %275, %277, %cst_244 {dimension_numbers = #tpu.dot_dimension_numbers<[1], [0], [0], [1], [0, 0, 1, 1], [], []>} : vector<8x128xbf16>, vector<128x128xbf16>, vector<8x128xf32> -> vector<8x128xf32>
    %279 = arith.addf %271, %278 : vector<8x128xf32>
    %c15_245 = arith.constant 15 : index
    %c0_246 = arith.constant 0 : index
    %c0_247 = arith.constant 0 : index
    %280 = vector.load %arg6[%c15_245, %c0_246, %c0_247] : memref<16x8x32xbf16, #tpu.memory_space<vmem>>, vector<1x8x32xbf16>
    %281 = vector.shape_cast %280 : vector<1x8x32xbf16> to vector<8x32xbf16>
    %cst_248 = arith.constant dense<0.000000e+00> : vector<8x128xf32>
    %282 = tpu.matmul %281, %158, %cst_248 {dimension_numbers = #tpu.dot_dimension_numbers<[1], [0], [0], [1], [0, 0, 1, 1], [], []>} : vector<8x32xbf16>, vector<32x128xbf16>, vector<8x128xf32> -> vector<8x128xf32>
    %283 = arith.truncf %282 : vector<8x128xf32> to vector<8x128xbf16>
    %c15_249 = arith.constant 15 : index
    %c0_250 = arith.constant 0 : index
    %c0_251 = arith.constant 0 : index
    %284 = vector.load %arg3[%c15_249, %c0_250, %c0_251] : memref<16x128x128xbf16, #tpu.memory_space<vmem>>, vector<1x128x128xbf16>
    %285 = vector.shape_cast %284 : vector<1x128x128xbf16> to vector<128x128xbf16>
    %cst_252 = arith.constant dense<0.000000e+00> : vector<8x128xf32>
    %286 = tpu.matmul %283, %285, %cst_252 {dimension_numbers = #tpu.dot_dimension_numbers<[1], [0], [0], [1], [0, 0, 1, 1], [], []>} : vector<8x128xbf16>, vector<128x128xbf16>, vector<8x128xf32> -> vector<8x128xf32>
    %287 = arith.addf %279, %286 : vector<8x128xf32>
    %cst_253 = arith.constant dense<0.000000e+00> : vector<128xf32>
    %288 = vector.multi_reduction <add>, %287, %cst_253 [0] : vector<8x128xf32> to vector<128xf32>
    %289 = vector.shape_cast %288 : vector<128xf32> to vector<1x128xf32>
    %cst_254 = arith.constant 8.000000e+00 : f32
    %290 = vector.broadcast %cst_254 : f32 to vector<1x128xf32>
    %291 = arith.divf %289, %290 : vector<1x128xf32>
    %292 = vector.broadcast %291 : vector<1x128xf32> to vector<8x128xf32>
    %293 = arith.subf %287, %292 : vector<8x128xf32>
    %294 = arith.mulf %293, %293 : vector<8x128xf32>
    %cst_255 = arith.constant dense<0.000000e+00> : vector<128xf32>
    %295 = vector.multi_reduction <add>, %294, %cst_255 [0] : vector<8x128xf32> to vector<128xf32>
    %296 = vector.shape_cast %295 : vector<128xf32> to vector<1x128xf32>
    %cst_256 = arith.constant 8.000000e+00 : f32
    %297 = vector.broadcast %cst_256 : f32 to vector<1x128xf32>
    %298 = arith.divf %296, %297 : vector<1x128xf32>
    %cst_257 = arith.constant 9.99999974E-6 : f32
    %299 = vector.broadcast %cst_257 : f32 to vector<1x128xf32>
    %300 = arith.addf %298, %299 : vector<1x128xf32>
    %301 = math.rsqrt %300 : vector<1x128xf32>
    %302 = vector.broadcast %301 : vector<1x128xf32> to vector<8x128xf32>
    %303 = arith.mulf %287, %302 : vector<8x128xf32>
    %304 = arith.mulf %291, %301 : vector<1x128xf32>
    %305 = vector.broadcast %304 : vector<1x128xf32> to vector<8x128xf32>
    %306 = arith.subf %303, %305 : vector<8x128xf32>
    %cst_258 = arith.constant 2.000000e-01 : f32
    %307 = vector.broadcast %cst_258 : f32 to vector<8x128xf32>
    %308 = arith.mulf %307, %306 : vector<8x128xf32>
    %309 = arith.maximumf %306, %308 : vector<8x128xf32>
    %310 = arith.truncf %309 : vector<8x128xf32> to vector<8x128xbf16>
    %cst_259 = arith.constant 0.000000e+00 : f32
    %311 = vector.broadcast %cst_259 : f32 to vector<2x128xf32>
    %c0_260 = arith.constant 0 : index
    %c0_261 = arith.constant 0 : index
    %c0_262 = arith.constant 0 : index
    %312 = vector.load %arg7[%c0_260, %c0_261, %c0_262] : memref<16x2x8xbf16, #tpu.memory_space<vmem>>, vector<1x2x8xbf16>
    %313 = vector.shape_cast %312 : vector<1x2x8xbf16> to vector<2x8xbf16>
    %cst_263 = arith.constant dense<0.000000e+00> : vector<2x128xf32>
    %314 = tpu.matmul %313, %310, %cst_263 {dimension_numbers = #tpu.dot_dimension_numbers<[1], [0], [0], [1], [0, 0, 1, 1], [], []>} : vector<2x8xbf16>, vector<8x128xbf16>, vector<2x128xf32> -> vector<2x128xf32>
    %315 = arith.truncf %314 : vector<2x128xf32> to vector<2x128xbf16>
    %c0_264 = arith.constant 0 : index
    %c0_265 = arith.constant 0 : index
    %c0_266 = arith.constant 0 : index
    %316 = vector.load %arg4[%c0_264, %c0_265, %c0_266] : memref<16x128x128xbf16, #tpu.memory_space<vmem>>, vector<1x128x128xbf16>
    %317 = vector.shape_cast %316 : vector<1x128x128xbf16> to vector<128x128xbf16>
    %cst_267 = arith.constant dense<0.000000e+00> : vector<2x128xf32>
    %318 = tpu.matmul %315, %317, %cst_267 {dimension_numbers = #tpu.dot_dimension_numbers<[1], [0], [0], [1], [0, 0, 1, 1], [], []>} : vector<2x128xbf16>, vector<128x128xbf16>, vector<2x128xf32> -> vector<2x128xf32>
    %319 = arith.addf %311, %318 : vector<2x128xf32>
    %c1_268 = arith.constant 1 : index
    %c0_269 = arith.constant 0 : index
    %c0_270 = arith.constant 0 : index
    %320 = vector.load %arg7[%c1_268, %c0_269, %c0_270] : memref<16x2x8xbf16, #tpu.memory_space<vmem>>, vector<1x2x8xbf16>
    %321 = vector.shape_cast %320 : vector<1x2x8xbf16> to vector<2x8xbf16>
    %cst_271 = arith.constant dense<0.000000e+00> : vector<2x128xf32>
    %322 = tpu.matmul %321, %310, %cst_271 {dimension_numbers = #tpu.dot_dimension_numbers<[1], [0], [0], [1], [0, 0, 1, 1], [], []>} : vector<2x8xbf16>, vector<8x128xbf16>, vector<2x128xf32> -> vector<2x128xf32>
    %323 = arith.truncf %322 : vector<2x128xf32> to vector<2x128xbf16>
    %c1_272 = arith.constant 1 : index
    %c0_273 = arith.constant 0 : index
    %c0_274 = arith.constant 0 : index
    %324 = vector.load %arg4[%c1_272, %c0_273, %c0_274] : memref<16x128x128xbf16, #tpu.memory_space<vmem>>, vector<1x128x128xbf16>
    %325 = vector.shape_cast %324 : vector<1x128x128xbf16> to vector<128x128xbf16>
    %cst_275 = arith.constant dense<0.000000e+00> : vector<2x128xf32>
    %326 = tpu.matmul %323, %325, %cst_275 {dimension_numbers = #tpu.dot_dimension_numbers<[1], [0], [0], [1], [0, 0, 1, 1], [], []>} : vector<2x128xbf16>, vector<128x128xbf16>, vector<2x128xf32> -> vector<2x128xf32>
    %327 = arith.addf %319, %326 : vector<2x128xf32>
    %c2_276 = arith.constant 2 : index
    %c0_277 = arith.constant 0 : index
    %c0_278 = arith.constant 0 : index
    %328 = vector.load %arg7[%c2_276, %c0_277, %c0_278] : memref<16x2x8xbf16, #tpu.memory_space<vmem>>, vector<1x2x8xbf16>
    %329 = vector.shape_cast %328 : vector<1x2x8xbf16> to vector<2x8xbf16>
    %cst_279 = arith.constant dense<0.000000e+00> : vector<2x128xf32>
    %330 = tpu.matmul %329, %310, %cst_279 {dimension_numbers = #tpu.dot_dimension_numbers<[1], [0], [0], [1], [0, 0, 1, 1], [], []>} : vector<2x8xbf16>, vector<8x128xbf16>, vector<2x128xf32> -> vector<2x128xf32>
    %331 = arith.truncf %330 : vector<2x128xf32> to vector<2x128xbf16>
    %c2_280 = arith.constant 2 : index
    %c0_281 = arith.constant 0 : index
    %c0_282 = arith.constant 0 : index
    %332 = vector.load %arg4[%c2_280, %c0_281, %c0_282] : memref<16x128x128xbf16, #tpu.memory_space<vmem>>, vector<1x128x128xbf16>
    %333 = vector.shape_cast %332 : vector<1x128x128xbf16> to vector<128x128xbf16>
    %cst_283 = arith.constant dense<0.000000e+00> : vector<2x128xf32>
    %334 = tpu.matmul %331, %333, %cst_283 {dimension_numbers = #tpu.dot_dimension_numbers<[1], [0], [0], [1], [0, 0, 1, 1], [], []>} : vector<2x128xbf16>, vector<128x128xbf16>, vector<2x128xf32> -> vector<2x128xf32>
    %335 = arith.addf %327, %334 : vector<2x128xf32>
    %c3_284 = arith.constant 3 : index
    %c0_285 = arith.constant 0 : index
    %c0_286 = arith.constant 0 : index
    %336 = vector.load %arg7[%c3_284, %c0_285, %c0_286] : memref<16x2x8xbf16, #tpu.memory_space<vmem>>, vector<1x2x8xbf16>
    %337 = vector.shape_cast %336 : vector<1x2x8xbf16> to vector<2x8xbf16>
    %cst_287 = arith.constant dense<0.000000e+00> : vector<2x128xf32>
    %338 = tpu.matmul %337, %310, %cst_287 {dimension_numbers = #tpu.dot_dimension_numbers<[1], [0], [0], [1], [0, 0, 1, 1], [], []>} : vector<2x8xbf16>, vector<8x128xbf16>, vector<2x128xf32> -> vector<2x128xf32>
    %339 = arith.truncf %338 : vector<2x128xf32> to vector<2x128xbf16>
    %c3_288 = arith.constant 3 : index
    %c0_289 = arith.constant 0 : index
    %c0_290 = arith.constant 0 : index
    %340 = vector.load %arg4[%c3_288, %c0_289, %c0_290] : memref<16x128x128xbf16, #tpu.memory_space<vmem>>, vector<1x128x128xbf16>
    %341 = vector.shape_cast %340 : vector<1x128x128xbf16> to vector<128x128xbf16>
    %cst_291 = arith.constant dense<0.000000e+00> : vector<2x128xf32>
    %342 = tpu.matmul %339, %341, %cst_291 {dimension_numbers = #tpu.dot_dimension_numbers<[1], [0], [0], [1], [0, 0, 1, 1], [], []>} : vector<2x128xbf16>, vector<128x128xbf16>, vector<2x128xf32> -> vector<2x128xf32>
    %343 = arith.addf %335, %342 : vector<2x128xf32>
    %c4_292 = arith.constant 4 : index
    %c0_293 = arith.constant 0 : index
    %c0_294 = arith.constant 0 : index
    %344 = vector.load %arg7[%c4_292, %c0_293, %c0_294] : memref<16x2x8xbf16, #tpu.memory_space<vmem>>, vector<1x2x8xbf16>
    %345 = vector.shape_cast %344 : vector<1x2x8xbf16> to vector<2x8xbf16>
    %cst_295 = arith.constant dense<0.000000e+00> : vector<2x128xf32>
    %346 = tpu.matmul %345, %310, %cst_295 {dimension_numbers = #tpu.dot_dimension_numbers<[1], [0], [0], [1], [0, 0, 1, 1], [], []>} : vector<2x8xbf16>, vector<8x128xbf16>, vector<2x128xf32> -> vector<2x128xf32>
    %347 = arith.truncf %346 : vector<2x128xf32> to vector<2x128xbf16>
    %c4_296 = arith.constant 4 : index
    %c0_297 = arith.constant 0 : index
    %c0_298 = arith.constant 0 : index
    %348 = vector.load %arg4[%c4_296, %c0_297, %c0_298] : memref<16x128x128xbf16, #tpu.memory_space<vmem>>, vector<1x128x128xbf16>
    %349 = vector.shape_cast %348 : vector<1x128x128xbf16> to vector<128x128xbf16>
    %cst_299 = arith.constant dense<0.000000e+00> : vector<2x128xf32>
    %350 = tpu.matmul %347, %349, %cst_299 {dimension_numbers = #tpu.dot_dimension_numbers<[1], [0], [0], [1], [0, 0, 1, 1], [], []>} : vector<2x128xbf16>, vector<128x128xbf16>, vector<2x128xf32> -> vector<2x128xf32>
    %351 = arith.addf %343, %350 : vector<2x128xf32>
    %c5_300 = arith.constant 5 : index
    %c0_301 = arith.constant 0 : index
    %c0_302 = arith.constant 0 : index
    %352 = vector.load %arg7[%c5_300, %c0_301, %c0_302] : memref<16x2x8xbf16, #tpu.memory_space<vmem>>, vector<1x2x8xbf16>
    %353 = vector.shape_cast %352 : vector<1x2x8xbf16> to vector<2x8xbf16>
    %cst_303 = arith.constant dense<0.000000e+00> : vector<2x128xf32>
    %354 = tpu.matmul %353, %310, %cst_303 {dimension_numbers = #tpu.dot_dimension_numbers<[1], [0], [0], [1], [0, 0, 1, 1], [], []>} : vector<2x8xbf16>, vector<8x128xbf16>, vector<2x128xf32> -> vector<2x128xf32>
    %355 = arith.truncf %354 : vector<2x128xf32> to vector<2x128xbf16>
    %c5_304 = arith.constant 5 : index
    %c0_305 = arith.constant 0 : index
    %c0_306 = arith.constant 0 : index
    %356 = vector.load %arg4[%c5_304, %c0_305, %c0_306] : memref<16x128x128xbf16, #tpu.memory_space<vmem>>, vector<1x128x128xbf16>
    %357 = vector.shape_cast %356 : vector<1x128x128xbf16> to vector<128x128xbf16>
    %cst_307 = arith.constant dense<0.000000e+00> : vector<2x128xf32>
    %358 = tpu.matmul %355, %357, %cst_307 {dimension_numbers = #tpu.dot_dimension_numbers<[1], [0], [0], [1], [0, 0, 1, 1], [], []>} : vector<2x128xbf16>, vector<128x128xbf16>, vector<2x128xf32> -> vector<2x128xf32>
    %359 = arith.addf %351, %358 : vector<2x128xf32>
    %c6_308 = arith.constant 6 : index
    %c0_309 = arith.constant 0 : index
    %c0_310 = arith.constant 0 : index
    %360 = vector.load %arg7[%c6_308, %c0_309, %c0_310] : memref<16x2x8xbf16, #tpu.memory_space<vmem>>, vector<1x2x8xbf16>
    %361 = vector.shape_cast %360 : vector<1x2x8xbf16> to vector<2x8xbf16>
    %cst_311 = arith.constant dense<0.000000e+00> : vector<2x128xf32>
    %362 = tpu.matmul %361, %310, %cst_311 {dimension_numbers = #tpu.dot_dimension_numbers<[1], [0], [0], [1], [0, 0, 1, 1], [], []>} : vector<2x8xbf16>, vector<8x128xbf16>, vector<2x128xf32> -> vector<2x128xf32>
    %363 = arith.truncf %362 : vector<2x128xf32> to vector<2x128xbf16>
    %c6_312 = arith.constant 6 : index
    %c0_313 = arith.constant 0 : index
    %c0_314 = arith.constant 0 : index
    %364 = vector.load %arg4[%c6_312, %c0_313, %c0_314] : memref<16x128x128xbf16, #tpu.memory_space<vmem>>, vector<1x128x128xbf16>
    %365 = vector.shape_cast %364 : vector<1x128x128xbf16> to vector<128x128xbf16>
    %cst_315 = arith.constant dense<0.000000e+00> : vector<2x128xf32>
    %366 = tpu.matmul %363, %365, %cst_315 {dimension_numbers = #tpu.dot_dimension_numbers<[1], [0], [0], [1], [0, 0, 1, 1], [], []>} : vector<2x128xbf16>, vector<128x128xbf16>, vector<2x128xf32> -> vector<2x128xf32>
    %367 = arith.addf %359, %366 : vector<2x128xf32>
    %c7_316 = arith.constant 7 : index
    %c0_317 = arith.constant 0 : index
    %c0_318 = arith.constant 0 : index
    %368 = vector.load %arg7[%c7_316, %c0_317, %c0_318] : memref<16x2x8xbf16, #tpu.memory_space<vmem>>, vector<1x2x8xbf16>
    %369 = vector.shape_cast %368 : vector<1x2x8xbf16> to vector<2x8xbf16>
    %cst_319 = arith.constant dense<0.000000e+00> : vector<2x128xf32>
    %370 = tpu.matmul %369, %310, %cst_319 {dimension_numbers = #tpu.dot_dimension_numbers<[1], [0], [0], [1], [0, 0, 1, 1], [], []>} : vector<2x8xbf16>, vector<8x128xbf16>, vector<2x128xf32> -> vector<2x128xf32>
    %371 = arith.truncf %370 : vector<2x128xf32> to vector<2x128xbf16>
    %c7_320 = arith.constant 7 : index
    %c0_321 = arith.constant 0 : index
    %c0_322 = arith.constant 0 : index
    %372 = vector.load %arg4[%c7_320, %c0_321, %c0_322] : memref<16x128x128xbf16, #tpu.memory_space<vmem>>, vector<1x128x128xbf16>
    %373 = vector.shape_cast %372 : vector<1x128x128xbf16> to vector<128x128xbf16>
    %cst_323 = arith.constant dense<0.000000e+00> : vector<2x128xf32>
    %374 = tpu.matmul %371, %373, %cst_323 {dimension_numbers = #tpu.dot_dimension_numbers<[1], [0], [0], [1], [0, 0, 1, 1], [], []>} : vector<2x128xbf16>, vector<128x128xbf16>, vector<2x128xf32> -> vector<2x128xf32>
    %375 = arith.addf %367, %374 : vector<2x128xf32>
    %c8_324 = arith.constant 8 : index
    %c0_325 = arith.constant 0 : index
    %c0_326 = arith.constant 0 : index
    %376 = vector.load %arg7[%c8_324, %c0_325, %c0_326] : memref<16x2x8xbf16, #tpu.memory_space<vmem>>, vector<1x2x8xbf16>
    %377 = vector.shape_cast %376 : vector<1x2x8xbf16> to vector<2x8xbf16>
    %cst_327 = arith.constant dense<0.000000e+00> : vector<2x128xf32>
    %378 = tpu.matmul %377, %310, %cst_327 {dimension_numbers = #tpu.dot_dimension_numbers<[1], [0], [0], [1], [0, 0, 1, 1], [], []>} : vector<2x8xbf16>, vector<8x128xbf16>, vector<2x128xf32> -> vector<2x128xf32>
    %379 = arith.truncf %378 : vector<2x128xf32> to vector<2x128xbf16>
    %c8_328 = arith.constant 8 : index
    %c0_329 = arith.constant 0 : index
    %c0_330 = arith.constant 0 : index
    %380 = vector.load %arg4[%c8_328, %c0_329, %c0_330] : memref<16x128x128xbf16, #tpu.memory_space<vmem>>, vector<1x128x128xbf16>
    %381 = vector.shape_cast %380 : vector<1x128x128xbf16> to vector<128x128xbf16>
    %cst_331 = arith.constant dense<0.000000e+00> : vector<2x128xf32>
    %382 = tpu.matmul %379, %381, %cst_331 {dimension_numbers = #tpu.dot_dimension_numbers<[1], [0], [0], [1], [0, 0, 1, 1], [], []>} : vector<2x128xbf16>, vector<128x128xbf16>, vector<2x128xf32> -> vector<2x128xf32>
    %383 = arith.addf %375, %382 : vector<2x128xf32>
    %c9_332 = arith.constant 9 : index
    %c0_333 = arith.constant 0 : index
    %c0_334 = arith.constant 0 : index
    %384 = vector.load %arg7[%c9_332, %c0_333, %c0_334] : memref<16x2x8xbf16, #tpu.memory_space<vmem>>, vector<1x2x8xbf16>
    %385 = vector.shape_cast %384 : vector<1x2x8xbf16> to vector<2x8xbf16>
    %cst_335 = arith.constant dense<0.000000e+00> : vector<2x128xf32>
    %386 = tpu.matmul %385, %310, %cst_335 {dimension_numbers = #tpu.dot_dimension_numbers<[1], [0], [0], [1], [0, 0, 1, 1], [], []>} : vector<2x8xbf16>, vector<8x128xbf16>, vector<2x128xf32> -> vector<2x128xf32>
    %387 = arith.truncf %386 : vector<2x128xf32> to vector<2x128xbf16>
    %c9_336 = arith.constant 9 : index
    %c0_337 = arith.constant 0 : index
    %c0_338 = arith.constant 0 : index
    %388 = vector.load %arg4[%c9_336, %c0_337, %c0_338] : memref<16x128x128xbf16, #tpu.memory_space<vmem>>, vector<1x128x128xbf16>
    %389 = vector.shape_cast %388 : vector<1x128x128xbf16> to vector<128x128xbf16>
    %cst_339 = arith.constant dense<0.000000e+00> : vector<2x128xf32>
    %390 = tpu.matmul %387, %389, %cst_339 {dimension_numbers = #tpu.dot_dimension_numbers<[1], [0], [0], [1], [0, 0, 1, 1], [], []>} : vector<2x128xbf16>, vector<128x128xbf16>, vector<2x128xf32> -> vector<2x128xf32>
    %391 = arith.addf %383, %390 : vector<2x128xf32>
    %c10_340 = arith.constant 10 : index
    %c0_341 = arith.constant 0 : index
    %c0_342 = arith.constant 0 : index
    %392 = vector.load %arg7[%c10_340, %c0_341, %c0_342] : memref<16x2x8xbf16, #tpu.memory_space<vmem>>, vector<1x2x8xbf16>
    %393 = vector.shape_cast %392 : vector<1x2x8xbf16> to vector<2x8xbf16>
    %cst_343 = arith.constant dense<0.000000e+00> : vector<2x128xf32>
    %394 = tpu.matmul %393, %310, %cst_343 {dimension_numbers = #tpu.dot_dimension_numbers<[1], [0], [0], [1], [0, 0, 1, 1], [], []>} : vector<2x8xbf16>, vector<8x128xbf16>, vector<2x128xf32> -> vector<2x128xf32>
    %395 = arith.truncf %394 : vector<2x128xf32> to vector<2x128xbf16>
    %c10_344 = arith.constant 10 : index
    %c0_345 = arith.constant 0 : index
    %c0_346 = arith.constant 0 : index
    %396 = vector.load %arg4[%c10_344, %c0_345, %c0_346] : memref<16x128x128xbf16, #tpu.memory_space<vmem>>, vector<1x128x128xbf16>
    %397 = vector.shape_cast %396 : vector<1x128x128xbf16> to vector<128x128xbf16>
    %cst_347 = arith.constant dense<0.000000e+00> : vector<2x128xf32>
    %398 = tpu.matmul %395, %397, %cst_347 {dimension_numbers = #tpu.dot_dimension_numbers<[1], [0], [0], [1], [0, 0, 1, 1], [], []>} : vector<2x128xbf16>, vector<128x128xbf16>, vector<2x128xf32> -> vector<2x128xf32>
    %399 = arith.addf %391, %398 : vector<2x128xf32>
    %c11_348 = arith.constant 11 : index
    %c0_349 = arith.constant 0 : index
    %c0_350 = arith.constant 0 : index
    %400 = vector.load %arg7[%c11_348, %c0_349, %c0_350] : memref<16x2x8xbf16, #tpu.memory_space<vmem>>, vector<1x2x8xbf16>
    %401 = vector.shape_cast %400 : vector<1x2x8xbf16> to vector<2x8xbf16>
    %cst_351 = arith.constant dense<0.000000e+00> : vector<2x128xf32>
    %402 = tpu.matmul %401, %310, %cst_351 {dimension_numbers = #tpu.dot_dimension_numbers<[1], [0], [0], [1], [0, 0, 1, 1], [], []>} : vector<2x8xbf16>, vector<8x128xbf16>, vector<2x128xf32> -> vector<2x128xf32>
    %403 = arith.truncf %402 : vector<2x128xf32> to vector<2x128xbf16>
    %c11_352 = arith.constant 11 : index
    %c0_353 = arith.constant 0 : index
    %c0_354 = arith.constant 0 : index
    %404 = vector.load %arg4[%c11_352, %c0_353, %c0_354] : memref<16x128x128xbf16, #tpu.memory_space<vmem>>, vector<1x128x128xbf16>
    %405 = vector.shape_cast %404 : vector<1x128x128xbf16> to vector<128x128xbf16>
    %cst_355 = arith.constant dense<0.000000e+00> : vector<2x128xf32>
    %406 = tpu.matmul %403, %405, %cst_355 {dimension_numbers = #tpu.dot_dimension_numbers<[1], [0], [0], [1], [0, 0, 1, 1], [], []>} : vector<2x128xbf16>, vector<128x128xbf16>, vector<2x128xf32> -> vector<2x128xf32>
    %407 = arith.addf %399, %406 : vector<2x128xf32>
    %c12_356 = arith.constant 12 : index
    %c0_357 = arith.constant 0 : index
    %c0_358 = arith.constant 0 : index
    %408 = vector.load %arg7[%c12_356, %c0_357, %c0_358] : memref<16x2x8xbf16, #tpu.memory_space<vmem>>, vector<1x2x8xbf16>
    %409 = vector.shape_cast %408 : vector<1x2x8xbf16> to vector<2x8xbf16>
    %cst_359 = arith.constant dense<0.000000e+00> : vector<2x128xf32>
    %410 = tpu.matmul %409, %310, %cst_359 {dimension_numbers = #tpu.dot_dimension_numbers<[1], [0], [0], [1], [0, 0, 1, 1], [], []>} : vector<2x8xbf16>, vector<8x128xbf16>, vector<2x128xf32> -> vector<2x128xf32>
    %411 = arith.truncf %410 : vector<2x128xf32> to vector<2x128xbf16>
    %c12_360 = arith.constant 12 : index
    %c0_361 = arith.constant 0 : index
    %c0_362 = arith.constant 0 : index
    %412 = vector.load %arg4[%c12_360, %c0_361, %c0_362] : memref<16x128x128xbf16, #tpu.memory_space<vmem>>, vector<1x128x128xbf16>
    %413 = vector.shape_cast %412 : vector<1x128x128xbf16> to vector<128x128xbf16>
    %cst_363 = arith.constant dense<0.000000e+00> : vector<2x128xf32>
    %414 = tpu.matmul %411, %413, %cst_363 {dimension_numbers = #tpu.dot_dimension_numbers<[1], [0], [0], [1], [0, 0, 1, 1], [], []>} : vector<2x128xbf16>, vector<128x128xbf16>, vector<2x128xf32> -> vector<2x128xf32>
    %415 = arith.addf %407, %414 : vector<2x128xf32>
    %c13_364 = arith.constant 13 : index
    %c0_365 = arith.constant 0 : index
    %c0_366 = arith.constant 0 : index
    %416 = vector.load %arg7[%c13_364, %c0_365, %c0_366] : memref<16x2x8xbf16, #tpu.memory_space<vmem>>, vector<1x2x8xbf16>
    %417 = vector.shape_cast %416 : vector<1x2x8xbf16> to vector<2x8xbf16>
    %cst_367 = arith.constant dense<0.000000e+00> : vector<2x128xf32>
    %418 = tpu.matmul %417, %310, %cst_367 {dimension_numbers = #tpu.dot_dimension_numbers<[1], [0], [0], [1], [0, 0, 1, 1], [], []>} : vector<2x8xbf16>, vector<8x128xbf16>, vector<2x128xf32> -> vector<2x128xf32>
    %419 = arith.truncf %418 : vector<2x128xf32> to vector<2x128xbf16>
    %c13_368 = arith.constant 13 : index
    %c0_369 = arith.constant 0 : index
    %c0_370 = arith.constant 0 : index
    %420 = vector.load %arg4[%c13_368, %c0_369, %c0_370] : memref<16x128x128xbf16, #tpu.memory_space<vmem>>, vector<1x128x128xbf16>
    %421 = vector.shape_cast %420 : vector<1x128x128xbf16> to vector<128x128xbf16>
    %cst_371 = arith.constant dense<0.000000e+00> : vector<2x128xf32>
    %422 = tpu.matmul %419, %421, %cst_371 {dimension_numbers = #tpu.dot_dimension_numbers<[1], [0], [0], [1], [0, 0, 1, 1], [], []>} : vector<2x128xbf16>, vector<128x128xbf16>, vector<2x128xf32> -> vector<2x128xf32>
    %423 = arith.addf %415, %422 : vector<2x128xf32>
    %c14_372 = arith.constant 14 : index
    %c0_373 = arith.constant 0 : index
    %c0_374 = arith.constant 0 : index
    %424 = vector.load %arg7[%c14_372, %c0_373, %c0_374] : memref<16x2x8xbf16, #tpu.memory_space<vmem>>, vector<1x2x8xbf16>
    %425 = vector.shape_cast %424 : vector<1x2x8xbf16> to vector<2x8xbf16>
    %cst_375 = arith.constant dense<0.000000e+00> : vector<2x128xf32>
    %426 = tpu.matmul %425, %310, %cst_375 {dimension_numbers = #tpu.dot_dimension_numbers<[1], [0], [0], [1], [0, 0, 1, 1], [], []>} : vector<2x8xbf16>, vector<8x128xbf16>, vector<2x128xf32> -> vector<2x128xf32>
    %427 = arith.truncf %426 : vector<2x128xf32> to vector<2x128xbf16>
    %c14_376 = arith.constant 14 : index
    %c0_377 = arith.constant 0 : index
    %c0_378 = arith.constant 0 : index
    %428 = vector.load %arg4[%c14_376, %c0_377, %c0_378] : memref<16x128x128xbf16, #tpu.memory_space<vmem>>, vector<1x128x128xbf16>
    %429 = vector.shape_cast %428 : vector<1x128x128xbf16> to vector<128x128xbf16>
    %cst_379 = arith.constant dense<0.000000e+00> : vector<2x128xf32>
    %430 = tpu.matmul %427, %429, %cst_379 {dimension_numbers = #tpu.dot_dimension_numbers<[1], [0], [0], [1], [0, 0, 1, 1], [], []>} : vector<2x128xbf16>, vector<128x128xbf16>, vector<2x128xf32> -> vector<2x128xf32>
    %431 = arith.addf %423, %430 : vector<2x128xf32>
    %c15_380 = arith.constant 15 : index
    %c0_381 = arith.constant 0 : index
    %c0_382 = arith.constant 0 : index
    %432 = vector.load %arg7[%c15_380, %c0_381, %c0_382] : memref<16x2x8xbf16, #tpu.memory_space<vmem>>, vector<1x2x8xbf16>
    %433 = vector.shape_cast %432 : vector<1x2x8xbf16> to vector<2x8xbf16>
    %cst_383 = arith.constant dense<0.000000e+00> : vector<2x128xf32>
    %434 = tpu.matmul %433, %310, %cst_383 {dimension_numbers = #tpu.dot_dimension_numbers<[1], [0], [0], [1], [0, 0, 1, 1], [], []>} : vector<2x8xbf16>, vector<8x128xbf16>, vector<2x128xf32> -> vector<2x128xf32>
    %435 = arith.truncf %434 : vector<2x128xf32> to vector<2x128xbf16>
    %c15_384 = arith.constant 15 : index
    %c0_385 = arith.constant 0 : index
    %c0_386 = arith.constant 0 : index
    %436 = vector.load %arg4[%c15_384, %c0_385, %c0_386] : memref<16x128x128xbf16, #tpu.memory_space<vmem>>, vector<1x128x128xbf16>
    %437 = vector.shape_cast %436 : vector<1x128x128xbf16> to vector<128x128xbf16>
    %cst_387 = arith.constant dense<0.000000e+00> : vector<2x128xf32>
    %438 = tpu.matmul %435, %437, %cst_387 {dimension_numbers = #tpu.dot_dimension_numbers<[1], [0], [0], [1], [0, 0, 1, 1], [], []>} : vector<2x128xbf16>, vector<128x128xbf16>, vector<2x128xf32> -> vector<2x128xf32>
    %439 = arith.addf %431, %438 : vector<2x128xf32>
    %cst_388 = arith.constant 0.000000e+00 : f32
    %440 = vector.broadcast %cst_388 : f32 to vector<2x128xf32>
    %441 = arith.subf %440, %439 : vector<2x128xf32>
    %442 = math.exp %441 : vector<2x128xf32>
    %cst_389 = arith.constant 1.000000e+00 : f32
    %443 = vector.broadcast %cst_389 : f32 to vector<2x128xf32>
    %444 = arith.addf %443, %442 : vector<2x128xf32>
    %445 = tpu.reciprocal %444 {approx = true} : vector<2x128xf32> -> vector<2x128xf32>
    %c0_390 = arith.constant 0 : index
    %c0_391 = arith.constant 0 : index
    %446 = vector.load %arg8[%c0_390, %c0_391] : memref<2x128xf32, #tpu.memory_space<vmem>>, vector<2x128xf32>
    tpu.vector_store %arg8[%c0_390, %c0_391], %445 {strides = array<i32>} : memref<2x128xf32, #tpu.memory_space<vmem>>, vector<2x128xf32>,
    return
  }
}

</mosaic_0001>

<bundles_post_ra>
// kernel: discriminator_forward.1
= control target key start
LH: loop header
LB: loop body
LE: loop exit
PB: predicated region body
PF: predicated region fallthrough
CT: control target
= control target key end

     0   :  { %vm94_vm0 = vcmask 130048   ;;  %vm12279_vm1 = vmmov 0   ;;  %vm3273_vm2 = vcmask 261120   ;;  %vm5731_vm3 = vcmask 1043456   ;;  %s14593_s1 = inlined_call_operand.vmem [shape: bf16[16,128], index: 1, kind: input, shape index: {}]   ;;  %s14594_s0 = inlined_call_operand.vmem [shape: bf16[128,16], index: 0, kind: input, shape index: {}]   ;;  %s14595_s5 = inlined_call_operand.vmem [shape: bf16[16,32,128], index: 5, kind: input, shape index: {}]   ;;  %s14596_s2 = inlined_call_operand.vmem [shape: bf16[16,128,128], index: 2, kind: input, shape index: {}]   ;;  %s14597_s3 = inlined_call_operand.vmem [shape: bf16[16,128,128], index: 3, kind: input, shape index: {}]   ;;  %s14598_s6 = inlined_call_operand.vmem [shape: bf16[16,8,32], index: 6, kind: input, shape index: {}]   ;;  %s14599_s4 = inlined_call_operand.vmem [shape: bf16[16,128,128], index: 4, kind: input, shape index: {}]   ;;  %s14600_s7 = inlined_call_operand.vmem [shape: bf16[16,2,8], index: 7, kind: input, shape index: {}]   ;;  %s14601_s8 = inlined_call_operand.vmem [shape: f32[2,128], index: 8, kind: output, shape index: {}]  }
   0x1   :  { %v11845_v0 = vld [vmem:[%s14593_s1] sm:$0xff]   ;;  %v11847_v2 = vld [vmem:[%s14594_s0 + $0x8] sm:$0xff]   ;;  %v11848_v3 = vld [vmem:[%s14594_s0 + $0x10] sm:$0xff]   ;;  %vm5727_vm4 = vcmask 64512  }
   0x2   :  { %v11846_v1 = vld [vmem:[%s14594_s0] sm:$0xff]   ;;  %10141 = vmatprep.subr.bf16.mxu0 %v11845_v0  ;;  %v11849_v4 = vld [vmem:[%s14594_s0 + $0x18] sm:$0xff]   ;;  %v11851_v6 = vld [vmem:[%s14594_s0 + $0x28] sm:$0xff]  }
   0x3   :  { %10142 = vmatpush3.bf16.msra.mxu0 %v11845_v0  ;;  %10143 = vmatprep.mubr.msk.bf16.mxu0 %vm94_vm0, %v11846_v1  ;;  %v11850_v5 = vld [vmem:[%s14594_s0 + $0x20] sm:$0xff]   ;;  %v11852_v7 = vld [vmem:[%s14594_s0 + $0x30] sm:$0xff]   ;;  %v11853_v8 = vld [vmem:[%s14594_s0 + $0x38] sm:$0xff]  }
   0x4   :  { %v11854_v9 = vld [vmem:[%s14595_s5] sm:$0xff]  }
   0x6   :  { %10144 = vmatmul.mubr.msk.bf16.vlgmr.msra.gmra.mrb[0].mxu0 %vm94_vm0, %v11847_v2  ;;  %v11855_v2 = vld [vmem:[%s14595_s5 + $0x8] sm:$0xff]  }
   0x7   :  { %10147 = vmatprep.mubr.msk.bf16.mxu0 %vm94_vm0, %v11848_v3  ;;  %v11856_v3 = vld [vmem:[%s14595_s5 + $0x10] sm:$0xff]  }
   0xe   :  { %10148 = vmatmul.mubr.msk.bf16.gmra.mrb[4].mxu0 %vm94_vm0, %v11849_v4  ;;  %v11857_v4 = vld [vmem:[%s14595_s5 + $0x18] sm:$0xff]  }
   0xf   :  { %10151 = vmatprep.mubr.msk.bf16.mxu0 %vm94_vm0, %v11850_v5  ;;  %v11858_v5 = vld [vmem:[%s14596_s2 + $0x40] sm:$0xff]  }
  0x16   :  { %10152 = vmatmul.mubr.msk.bf16.gmra.mrb[8].mxu0 %vm94_vm0, %v11851_v6  ;;  %v11859_v6 = vld [vmem:[%s14596_s2 + $0x48] sm:$0xff]  }
  0x17   :  { %10155 = vmatprep.mubr.msk.bf16.mxu0 %vm94_vm0, %v11852_v7  ;;  %v11860_v7 = vld [vmem:[%s14596_s2 + $0x50] sm:$0xff]  }
  0x1e   :  { %10156 = vmatmul.mubr.msk.bf16.gmra.mrb[12].mxu0 %vm94_vm0, %v11853_v8  ;;  %v11861_v8 = vld [vmem:[%s14596_s2 + $0x58] sm:$0xff]  }
  0x1f   :  { %10175 = vmatprep.mubr.bf16.mxu0 %v11854_v9  ;;  %v11862_v9 = vld [vmem:[%s14596_s2 + $0x60] sm:$0xff]  }
  0xd9   :  { %v10145_v10 = vpop.f32.mrb[0].mxu0 }
  0xda   :  { %v218_v11 = vmul.f32 0.2, %v10145_v10  ;;  %v153_v12 = vpop.f32.mrb[1].mxu0 }
  0xdb   :  { %v216_v13 = vmul.f32 0.2, %v153_v12  ;;  %v10146_v14 = vpop.f32.mrb[2].mxu0 }
  0xdc   :  { %v219_v15 = vmul.f32 0.2, %v10146_v14  ;;  %v156_v16 = vpop.f32.mrb[3].mxu0  ;;  %v234_v18 = vmax.f32 %v10145_v10, %v218_v11  ;;  %v11863_v10 = vld [vmem:[%s14596_s2 + $0x68] sm:$0xff]   ;;  %v11864_v11 = vld [vmem:[%s14596_s2 + $0x70] sm:$0xff]  }
  0xdd   :  { %v217_v17 = vmul.f32 0.2, %v156_v16  ;;  %v232_v20 = vmax.f32 %v153_v12, %v216_v13  ;;  %v11865_v12 = vld [vmem:[%s14596_s2 + $0x78] sm:$0xff]   ;;  %v11866_v13 = vld [vmem:[%s14596_s2] sm:$0xff]  }
  0xde   :  { %v235_v19 = vmax.f32 %v10146_v14, %v219_v15 }
  0xdf   :  { %v233_v21 = vmax.f32 %v156_v16, %v217_v17 }
  0xe0   :  { %v12363_v22 = vpack.c.bf16 %v235_v19, %v234_v18 }
  0xe1   :  { %v12365_v23 = vpack.c.bf16 %v233_v21, %v232_v20  ;;  %v10149_v24 = vpop.f32.mrb[4].mxu0 }
  0xe2   :  { %v222_v25 = vmul.f32 0.2, %v10149_v24  ;;  %v169_v26 = vpop.f32.mrb[5].mxu0 }
  0xe3   :  { %v220_v27 = vmul.f32 0.2, %v169_v26  ;;  %v10150_v28 = vpop.f32.mrb[6].mxu0  ;;  %10159 = vmatprep.subr.bf16.mxu0 %v12365_v23 }
  0xe4   :  { %v223_v29 = vmul.f32 0.2, %v10150_v28  ;;  %v172_v30 = vpop.f32.mrb[7].mxu0  ;;  %10160 = vmatpush3.bf16.msra.mxu0 %v12365_v23  ;;  %v238_v32 = vmax.f32 %v10149_v24, %v222_v25 }
  0xe5   :  { %v221_v31 = vmul.f32 0.2, %v172_v30  ;;  %10161 = vmatprep.subr.bf16.mxu0 %v12363_v22  ;;  %v236_v34 = vmax.f32 %v169_v26, %v220_v27 }
  0xe6   :  { %v239_v33 = vmax.f32 %v10150_v28, %v223_v29  ;;  %v11867_v28 = vld [vmem:[%s14596_s2 + $0x8] sm:$0xff]   ;;  %v11868_v29 = vld [vmem:[%s14596_s2 + $0x10] sm:$0xff]  }
  0xe7   :  { %v237_v35 = vmax.f32 %v172_v30, %v221_v31  ;;  %v11869_v30 = vld [vmem:[%s14596_s2 + $0x18] sm:$0xff]   ;;  %v11870_v31 = vld [vmem:[%s14596_s2 + $0x20] sm:$0xff]  }
  0xe8   :  { %v12370_v36 = vpack.c.bf16 %v239_v33, %v238_v32  ;;  %10162 = vmatpush3.bf16.msra.mxu0 %v12363_v22  ;;  %v11871_v32 = vld [vmem:[%s14596_s2 + $0x28] sm:$0xff]   ;;  %v11872_v33 = vld [vmem:[%s14596_s2 + $0x30] sm:$0xff]  }
  0xe9   :  { %v12373_v37 = vpack.c.bf16 %v237_v35, %v236_v34  ;;  %v10153_v38 = vpop.f32.mrb[8].mxu0  ;;  %v11873_v34 = vld [vmem:[%s14596_s2 + $0x38] sm:$0xff]   ;;  %v11874_v35 = vld [vmem:[%s14595_s5 + $0x20] sm:$0xff]  }
  0xea   :  { %v226_v39 = vmul.f32 0.2, %v10153_v38  ;;  %v185_v40 = vpop.f32.mrb[9].mxu0 }
  0xeb   :  { %v224_v41 = vmul.f32 0.2, %v185_v40  ;;  %v10154_v42 = vpop.f32.mrb[10].mxu0  ;;  %10163 = vmatprep.subr.bf16.mxu0 %v12373_v37 }
  0xec   :  { %v227_v43 = vmul.f32 0.2, %v10154_v42  ;;  %v188_v44 = vpop.f32.mrb[11].mxu0  ;;  %10164 = vmatpush3.bf16.msra.mxu0 %v12373_v37  ;;  %v242_v46 = vmax.f32 %v10153_v38, %v226_v39  ;;  %v11875_v38 = vld [vmem:[%s14595_s5 + $0x28] sm:$0xff]   ;;  %v11876_v39 = vld [vmem:[%s14595_s5 + $0x30] sm:$0xff]  }
  0xed   :  { %v225_v45 = vmul.f32 0.2, %v188_v44  ;;  %10165 = vmatprep.subr.bf16.mxu0 %v12370_v36  ;;  %v240_v48 = vmax.f32 %v185_v40, %v224_v41  ;;  %v11877_v40 = vld [vmem:[%s14595_s5 + $0x38] sm:$0xff]   ;;  %v11878_v41 = vld [vmem:[%s14595_s5 + $0x40] sm:$0xff]  }
  0xee   :  { %v243_v47 = vmax.f32 %v10154_v42, %v227_v43  ;;  %v11886_v42 = vld [vmem:[%s14596_s2 + $0x80] sm:$0xff]   ;;  %v11879_v43 = vld [vmem:[%s14595_s5 + $0x48] sm:$0xff]  }
  0xef   :  { %v241_v49 = vmax.f32 %v188_v44, %v225_v45  ;;  %10259 = vmatprep.subr.bf16.mxu1 %v11886_v42  ;;  %v11887_v44 = vld [vmem:[%s14596_s2 + $0x88] sm:$0xff]   ;;  %v11880_v45 = vld [vmem:[%s14595_s5 + $0x50] sm:$0xff]  }
  0xf0   :  { %v12378_v50 = vpack.c.bf16 %v243_v47, %v242_v46  ;;  %10166 = vmatpush3.bf16.msra.mxu0 %v12370_v36  ;;  %10260 = vmatpush3.bf16.msra.mxu1 %v11886_v42  ;;  %v11890_v46 = vld [vmem:[%s14596_s2 + $0x90] sm:$0xff]   ;;  %v11891_v47 = vld [vmem:[%s14596_s2 + $0x98] sm:$0xff]   ;;  %v11916_v42 = vld [vmem:[%s14596_s2 + $0x140] sm:$0xff]  }
  0xf1   :  { %v12381_v51 = vpack.c.bf16 %v241_v49, %v240_v48  ;;  %v10157_v52 = vpop.f32.mrb[12].mxu0  ;;  %10261 = vmatprep.subr.bf16.mxu1 %v11887_v44  ;;  %v11892_v48 = vld [vmem:[%s14596_s2 + $0xa0] sm:$0xff]   ;;  %v11893_v49 = vld [vmem:[%s14596_s2 + $0xa8] sm:$0xff]  }
  0xf2   :  { %v230_v53 = vmul.f32 0.2, %v10157_v52  ;;  %v201_v54 = vpop.f32.mrb[13].mxu0 }
  0xf3   :  { %v228_v55 = vmul.f32 0.2, %v201_v54  ;;  %v10158_v56 = vpop.f32.mrb[14].mxu0  ;;  %10167 = vmatprep.subr.bf16.mxu0 %v12381_v51 }
  0xf4   :  { %v231_v57 = vmul.f32 0.2, %v10158_v56  ;;  %v204_v58 = vpop.f32.mrb[15].mxu0  ;;  %10168 = vmatpush3.bf16.msra.mxu0 %v12381_v51  ;;  %v246_v60 = vmax.f32 %v10157_v52, %v230_v53  ;;  %10262 = vmatpush3.bf16.msra.mxu1 %v11887_v44  ;;  %v11894_v52 = vld [vmem:[%s14596_s2 + $0xb0] sm:$0xff]   ;;  %v11895_v53 = vld [vmem:[%s14596_s2 + $0xb8] sm:$0xff]  }
  0xf5   :  { %v229_v59 = vmul.f32 0.2, %v204_v58  ;;  %10169 = vmatprep.subr.bf16.mxu0 %v12378_v50  ;;  %v244_v62 = vmax.f32 %v201_v54, %v228_v55  ;;  %10263 = vmatprep.subr.bf16.mxu1 %v11890_v46  ;;  %v12577_v54 = vld [vmem:[%s14596_s2 + $0xc0] sm:$0xff]   ;;  %v11881_v55 = vld [vmem:[%s14595_s5 + $0x58] sm:$0xff]  }
  0xf6   :  { %v247_v61 = vmax.f32 %v10158_v56, %v231_v57  ;;  %v11882_v56 = vld [vmem:[%s14595_s5 + $0x60] sm:$0xff]   ;;  %v11883_v57 = vld [vmem:[%s14595_s5 + $0x68] sm:$0xff]  }
  0xf7   :  { %v245_v63 = vmax.f32 %v204_v58, %v229_v59  ;;  %v11884_v58 = vld [vmem:[%s14595_s5 + $0x70] sm:$0xff]   ;;  %v11885_v59 = vld [vmem:[%s14595_s5 + $0x78] sm:$0xff]  }
  0xf8   :  { %v12386_v0 = vpack.c.bf16 %v247_v61, %v246_v60  ;;  %10170 = vmatpush3.bf16.msra.mxu0 %v12378_v50  ;;  %10264 = vmatpush3.bf16.msra.mxu1 %v11890_v46  ;;  %v11888_v60 = vld [vmem:[%s14595_s5 + $0x80] sm:$0xff]  }
  0xf9   :  { %v12389_v1 = vpack.c.bf16 %v245_v63, %v244_v62  ;;  %10265 = vmatprep.subr.bf16.mxu1 %v11891_v47 }
  0xfb   :  { %10171 = vmatprep.subr.bf16.mxu0 %v12389_v1 }
  0xfc   :  { %10172 = vmatpush3.bf16.msra.mxu0 %v12389_v1  ;;  %10266 = vmatpush3.bf16.msra.mxu1 %v11891_v47  ;;  %v11917_v47 = vld [vmem:[%s14596_s2 + $0x148] sm:$0xff]  }
  0xfd   :  { %10173 = vmatprep.subr.bf16.mxu0 %v12386_v0  ;;  %10267 = vmatprep.subr.bf16.mxu1 %v11892_v48 }
 0x100   :  { %10174 = vmatpush3.bf16.msra.mxu0 %v12386_v0  ;;  %10268 = vmatpush3.bf16.msra.mxu1 %v11892_v48  ;;  %v11919_v48 = vld [vmem:[%s14595_s5 + $0xb8] sm:$0xff]  }
 0x101   :  { %10179 = vmatprep.subr.bf16.mxu0 %v12365_v23  ;;  %10269 = vmatprep.subr.bf16.mxu1 %v11893_v49 }
 0x103   :  { %10176 = vmatmul.mubr.bf16.vlgmr.msra.gmra.mrb[16].mxu0 %v11855_v2 }
 0x104   :  { %10180 = vmatpush3.bf16.msra.mxu0 %v12365_v23  ;;  %10195 = vmatprep.mubr.bf16.mxu0 %v11856_v3  ;;  %v11889_v3 = vld [vmem:[%s14595_s5 + $0x88] sm:$0xff]  }
 0x105   :  { %10181 = vmatprep.subr.bf16.mxu0 %v12363_v22  ;;  %10270 = vmatpush3.bf16.msra.mxu1 %v11893_v49  ;;  %v11920_v49 = vld [vmem:[%s14596_s2 + $0x150] sm:$0xff]  }
 0x106   :  { %10271 = vmatprep.subr.bf16.mxu1 %v11894_v52 }
 0x108   :  { %10182 = vmatpush3.bf16.msra.mxu0 %v12363_v22 }
 0x109   :  { %10183 = vmatprep.subr.bf16.mxu0 %v12373_v37  ;;  %10272 = vmatpush3.bf16.msra.mxu1 %v11894_v52  ;;  %v11928_v52 = vld [vmem:[%s14595_s5 + $0xc0] sm:$0xff]  }
 0x10a   :  { %10273 = vmatprep.subr.bf16.mxu1 %v11895_v53 }
 0x10c   :  { %10184 = vmatpush3.bf16.msra.mxu0 %v12373_v37 }
 0x10d   :  { %10185 = vmatprep.subr.bf16.mxu0 %v12370_v36  ;;  %10274 = vmatpush3.bf16.msra.mxu1 %v11895_v53  ;;  %v11921_v53 = vld [vmem:[%s14596_s2 + $0x158] sm:$0xff]  }
 0x10e   :  { %10299 = vmatprep.subr.bf16.mxu1 %v12577_v54 }
 0x110   :  { %10186 = vmatpush3.bf16.msra.mxu0 %v12370_v36 }
 0x111   :  { %10187 = vmatprep.subr.bf16.mxu0 %v12381_v51 }
 0x114   :  { %10188 = vmatpush3.bf16.msra.mxu0 %v12381_v51 }
 0x115   :  { %10189 = vmatprep.subr.bf16.mxu0 %v12378_v50 }
 0x118   :  { %10190 = vmatpush3.bf16.msra.mxu0 %v12378_v50 }
 0x119   :  { %10191 = vmatprep.subr.bf16.mxu0 %v12389_v1 }
 0x11c   :  { %10192 = vmatpush3.bf16.msra.mxu0 %v12389_v1 }
 0x11d   :  { %10193 = vmatprep.subr.bf16.mxu0 %v12386_v0 }
 0x120   :  { %10194 = vmatpush3.bf16.msra.mxu0 %v12386_v0 }
 0x121   :  { %10199 = vmatprep.subr.bf16.mxu0 %v11858_v5 }
 0x123   :  { %10196 = vmatmul.mubr.bf16.vlgmr.msra.gmra.mrb[20].mxu0 %v11857_v4  ;;  %v11898_v4 = vld [vmem:[%s14595_s5 + $0x90] sm:$0xff]  }
 0x124   :  { %10200 = vmatpush3.bf16.msra.mxu0 %v11858_v5 }
 0x125   :  { %10201 = vmatprep.subr.bf16.mxu0 %v11859_v6 }
 0x128   :  { %10202 = vmatpush3.bf16.msra.mxu0 %v11859_v6 }
 0x129   :  { %10203 = vmatprep.subr.bf16.mxu0 %v11860_v7 }
 0x12c   :  { %10204 = vmatpush3.bf16.msra.mxu0 %v11860_v7 }
 0x12d   :  { %10205 = vmatprep.subr.bf16.mxu0 %v11861_v8 }
 0x130   :  { %10206 = vmatpush3.bf16.msra.mxu0 %v11861_v8 }
 0x131   :  { %10207 = vmatprep.subr.bf16.mxu0 %v11862_v9 }
 0x134   :  { %10208 = vmatpush3.bf16.msra.mxu0 %v11862_v9 }
 0x135   :  { %10209 = vmatprep.subr.bf16.mxu0 %v11863_v10 }
 0x138   :  { %10210 = vmatpush3.bf16.msra.mxu0 %v11863_v10 }
 0x139   :  { %10211 = vmatprep.subr.bf16.mxu0 %v11864_v11 }
 0x13c   :  { %10212 = vmatpush3.bf16.msra.mxu0 %v11864_v11  ;;  %v11897_v11 = vld [vmem:[%s14596_s2 + $0xc8] sm:$0xff]  }
 0x13d   :  { %10213 = vmatprep.subr.bf16.mxu0 %v11865_v12 }
 0x140   :  { %10214 = vmatpush3.bf16.msra.mxu0 %v11865_v12  ;;  %v11899_v12 = vld [vmem:[%s14595_s5 + $0x98] sm:$0xff]  }
 0x141   :  { %10219 = vmatprep.subr.bf16.mxu0 %v11866_v13 }
 0x1d6   :  { %v10177_v14 = vpop.f32.mrb[16].mxu0 }
 0x1d7   :  { %v306_v15 = vpop.f32.mrb[17].mxu0 }
 0x1d8   :  { %v10178_v16 = vpop.f32.mrb[18].mxu0 }
 0x1d9   :  { %v322_v17 = vpack.c.bf16 %v10178_v16, %v10177_v14  ;;  %v309_v18 = vpop.f32.mrb[19].mxu0  ;;  %v11908_v14 = vld [vmem:[%s14595_s5 + $0xa0] sm:$0xff]  }
 0x1da   :  { %v321_v19 = vpack.c.bf16 %v309_v18, %v306_v15  ;;  %v11901_v15 = vld [vmem:[%s14596_s2 + $0xd8] sm:$0xff]   ;;  %v11902_v16 = vld [vmem:[%s14596_s2 + $0xe0] sm:$0xff]   ;;  %v11904_v18 = vld [vmem:[%s14596_s2 + $0xf0] sm:$0xff]  }
 0x1f6   :  { %v10197_v20 = vpop.f32.mrb[20].mxu0 }
 0x1f7   :  { %v390_v21 = vpop.f32.mrb[21].mxu0 }
 0x1f8   :  { %v10198_v24 = vpop.f32.mrb[22].mxu0 }
 0x1f9   :  { %v406_v25 = vpack.c.bf16 %v10198_v24, %v10197_v20  ;;  %v393_v26 = vpop.f32.mrb[23].mxu0  ;;  %v11906_v24 = vld [vmem:[%s14596_s2 + $0x100] sm:$0xff]  }
 0x1fa   :  { %v405_v27 = vpack.c.bf16 %v393_v26, %v390_v21 }
 0x1fc   :  { %10215 = vmatprep.mubr.bf16.mxu0 %v405_v27 }
 0x1fd   :  { %10216 = vmatmul.mubr.bf16.vlgmr.msra.gmra.mrb[24].mxu0 %v406_v25 }
 0x1fe   :  { %10220 = vmatpush3.bf16.msra.mxu0 %v11866_v13  ;;  %10235 = vmatprep.mubr.bf16.mxu0 %v321_v19  ;;  %v11900_v13 = vld [vmem:[%s14596_s2 + $0xd0] sm:$0xff]   ;;  %v11905_v19 = vld [vmem:[%s14596_s2 + $0xf8] sm:$0xff]  }
 0x1ff   :  { %10221 = vmatprep.subr.bf16.mxu0 %v11867_v28 }
 0x202   :  { %10222 = vmatpush3.bf16.msra.mxu0 %v11867_v28 }
 0x203   :  { %10223 = vmatprep.subr.bf16.mxu0 %v11868_v29 }
 0x206   :  { %10224 = vmatpush3.bf16.msra.mxu0 %v11868_v29  ;;  %v11907_v29 = vld [vmem:[%s14596_s2 + $0x108] sm:$0xff]  }
 0x207   :  { %10225 = vmatprep.subr.bf16.mxu0 %v11869_v30 }
 0x20a   :  { %10226 = vmatpush3.bf16.msra.mxu0 %v11869_v30  ;;  %v11909_v30 = vld [vmem:[%s14595_s5 + $0xa8] sm:$0xff]  }
 0x20b   :  { %10227 = vmatprep.subr.bf16.mxu0 %v11870_v31 }
 0x20e   :  { %10228 = vmatpush3.bf16.msra.mxu0 %v11870_v31  ;;  %v11910_v31 = vld [vmem:[%s14596_s2 + $0x110] sm:$0xff]  }
 0x20f   :  { %10229 = vmatprep.subr.bf16.mxu0 %v11871_v32 }
 0x212   :  { %10230 = vmatpush3.bf16.msra.mxu0 %v11871_v32  ;;  %v11918_v32 = vld [vmem:[%s14595_s5 + $0xb0] sm:$0xff]  }
 0x213   :  { %10231 = vmatprep.subr.bf16.mxu0 %v11872_v33 }
 0x216   :  { %10232 = vmatpush3.bf16.msra.mxu0 %v11872_v33  ;;  %v11911_v33 = vld [vmem:[%s14596_s2 + $0x118] sm:$0xff]  }
 0x217   :  { %10233 = vmatprep.subr.bf16.mxu0 %v11873_v34 }
 0x21a   :  { %10234 = vmatpush3.bf16.msra.mxu0 %v11873_v34  ;;  %v11912_v34 = vld [vmem:[%s14596_s2 + $0x120] sm:$0xff]  }
 0x21b   :  { %10239 = vmatprep.subr.bf16.mxu0 %v12365_v23 }
 0x21d   :  { %10236 = vmatmul.mubr.bf16.vlgmr.msra.gmra.mrb[24].mxu0 %v322_v17  ;;  %v11903_v17 = vld [vmem:[%s14596_s2 + $0xe8] sm:$0xff]  }
 0x21e   :  { %10240 = vmatpush3.bf16.msra.mxu0 %v12365_v23  ;;  %10255 = vmatprep.mubr.bf16.mxu0 %v11874_v35  ;;  %v11913_v35 = vld [vmem:[%s14596_s2 + $0x128] sm:$0xff]  }
 0x21f   :  { %10241 = vmatprep.subr.bf16.mxu0 %v12363_v22 }
 0x222   :  { %10242 = vmatpush3.bf16.msra.mxu0 %v12363_v22 }
 0x223   :  { %10243 = vmatprep.subr.bf16.mxu0 %v12373_v37 }
 0x226   :  { %10244 = vmatpush3.bf16.msra.mxu0 %v12373_v37 }
 0x227   :  { %10245 = vmatprep.subr.bf16.mxu0 %v12370_v36 }
 0x22a   :  { %10246 = vmatpush3.bf16.msra.mxu0 %v12370_v36 }
 0x22b   :  { %10247 = vmatprep.subr.bf16.mxu0 %v12381_v51 }
 0x22e   :  { %10248 = vmatpush3.bf16.msra.mxu0 %v12381_v51 }
 0x22f   :  { %10249 = vmatprep.subr.bf16.mxu0 %v12378_v50 }
 0x232   :  { %10250 = vmatpush3.bf16.msra.mxu0 %v12378_v50 }
 0x233   :  { %10251 = vmatprep.subr.bf16.mxu0 %v12389_v1 }
 0x236   :  { %10252 = vmatpush3.bf16.msra.mxu0 %v12389_v1 }
 0x237   :  { %10253 = vmatprep.subr.bf16.mxu0 %v12386_v0 }
 0x23a   :  { %10254 = vmatpush3.bf16.msra.mxu0 %v12386_v0 }
 0x23b   :  { %10279 = vmatprep.subr.bf16.mxu0 %v12365_v23 }
 0x23d   :  { %10256 = vmatmul.mubr.bf16.vlgmr.msra.gmra.mrb[28].mxu0 %v11875_v38  ;;  %v11914_v38 = vld [vmem:[%s14596_s2 + $0x130] sm:$0xff]  }
 0x23e   :  { %10280 = vmatpush3.bf16.msra.mxu0 %v12365_v23  ;;  %10295 = vmatprep.mubr.bf16.mxu0 %v11876_v39  ;;  %v11915_v39 = vld [vmem:[%s14596_s2 + $0x138] sm:$0xff]  }
 0x23f   :  { %10281 = vmatprep.subr.bf16.mxu0 %v12363_v22 }
 0x242   :  { %10282 = vmatpush3.bf16.msra.mxu0 %v12363_v22 }
 0x243   :  { %10283 = vmatprep.subr.bf16.mxu0 %v12373_v37 }
 0x246   :  { %10284 = vmatpush3.bf16.msra.mxu0 %v12373_v37 }
 0x247   :  { %10285 = vmatprep.subr.bf16.mxu0 %v12370_v36 }
 0x24a   :  { %10286 = vmatpush3.bf16.msra.mxu0 %v12370_v36 }
 0x24b   :  { %10287 = vmatprep.subr.bf16.mxu0 %v12381_v51 }
 0x24e   :  { %10288 = vmatpush3.bf16.msra.mxu0 %v12381_v51 }
 0x24f   :  { %10289 = vmatprep.subr.bf16.mxu0 %v12378_v50 }
 0x252   :  { %10290 = vmatpush3.bf16.msra.mxu0 %v12378_v50 }
 0x253   :  { %10291 = vmatprep.subr.bf16.mxu0 %v12389_v1 }
 0x256   :  { %10292 = vmatpush3.bf16.msra.mxu0 %v12389_v1 }
 0x257   :  { %10293 = vmatprep.subr.bf16.mxu0 %v12386_v0 }
 0x25a   :  { %10294 = vmatpush3.bf16.msra.mxu0 %v12386_v0 }
 0x25b   :  { %10319 = vmatprep.subr.bf16.mxu0 %v12365_v23 }
 0x25d   :  { %10296 = vmatmul.mubr.bf16.vlgmr.msra.gmra.mrb[32].mxu0 %v11877_v40 }
 0x25e   :  { %10320 = vmatpush3.bf16.msra.mxu0 %v12365_v23  ;;  %10335 = vmatprep.mubr.bf16.mxu0 %v11878_v41 }
 0x25f   :  { %10321 = vmatprep.subr.bf16.mxu0 %v12363_v22 }
 0x262   :  { %10322 = vmatpush3.bf16.msra.mxu0 %v12363_v22 }
 0x263   :  { %10323 = vmatprep.subr.bf16.mxu0 %v12373_v37 }
 0x266   :  { %10324 = vmatpush3.bf16.msra.mxu0 %v12373_v37 }
 0x267   :  { %10325 = vmatprep.subr.bf16.mxu0 %v12370_v36 }
 0x26a   :  { %10326 = vmatpush3.bf16.msra.mxu0 %v12370_v36 }
 0x26b   :  { %10327 = vmatprep.subr.bf16.mxu0 %v12381_v51 }
 0x26e   :  { %10328 = vmatpush3.bf16.msra.mxu0 %v12381_v51 }
 0x26f   :  { %10329 = vmatprep.subr.bf16.mxu0 %v12378_v50 }
 0x272   :  { %10330 = vmatpush3.bf16.msra.mxu0 %v12378_v50 }
 0x273   :  { %10331 = vmatprep.subr.bf16.mxu0 %v12389_v1 }
 0x276   :  { %10332 = vmatpush3.bf16.msra.mxu0 %v12389_v1 }
 0x277   :  { %10333 = vmatprep.subr.bf16.mxu0 %v12386_v0 }
 0x27a   :  { %10334 = vmatpush3.bf16.msra.mxu0 %v12386_v0 }
 0x27b   :  { %10359 = vmatprep.subr.bf16.mxu0 %v12365_v23 }
 0x27d   :  { %10336 = vmatmul.mubr.bf16.vlgmr.msra.gmra.mrb[36].mxu0 %v11879_v43 }
 0x27e   :  { %10360 = vmatpush3.bf16.msra.mxu0 %v12365_v23  ;;  %10375 = vmatprep.mubr.bf16.mxu0 %v11880_v45 }
 0x27f   :  { %10361 = vmatprep.subr.bf16.mxu0 %v12363_v22 }
 0x282   :  { %10362 = vmatpush3.bf16.msra.mxu0 %v12363_v22 }
 0x283   :  { %10363 = vmatprep.subr.bf16.mxu0 %v12373_v37 }
 0x286   :  { %10364 = vmatpush3.bf16.msra.mxu0 %v12373_v37 }
 0x287   :  { %10365 = vmatprep.subr.bf16.mxu0 %v12370_v36 }
 0x28a   :  { %10366 = vmatpush3.bf16.msra.mxu0 %v12370_v36 }
 0x28b   :  { %10367 = vmatprep.subr.bf16.mxu0 %v12381_v51 }
 0x28e   :  { %10368 = vmatpush3.bf16.msra.mxu0 %v12381_v51 }
 0x28f   :  { %10369 = vmatprep.subr.bf16.mxu0 %v12378_v50 }
 0x292   :  { %10370 = vmatpush3.bf16.msra.mxu0 %v12378_v50 }
 0x293   :  { %10371 = vmatprep.subr.bf16.mxu0 %v12389_v1 }
 0x296   :  { %10372 = vmatpush3.bf16.msra.mxu0 %v12389_v1 }
 0x297   :  { %10373 = vmatprep.subr.bf16.mxu0 %v12386_v0 }
 0x29a   :  { %10374 = vmatpush3.bf16.msra.mxu0 %v12386_v0 }
 0x29b   :  { %10399 = vmatprep.subr.bf16.mxu0 %v12365_v23 }
 0x29d   :  { %10376 = vmatmul.mubr.bf16.vlgmr.msra.gmra.mrb[40].mxu0 %v11881_v55  ;;  %v11923_v55 = vld [vmem:[%s14596_s2 + $0x168] sm:$0xff]  }
 0x29e   :  { %10400 = vmatpush3.bf16.msra.mxu0 %v12365_v23  ;;  %10415 = vmatprep.mubr.bf16.mxu0 %v11882_v56  ;;  %v11924_v56 = vld [vmem:[%s14596_s2 + $0x170] sm:$0xff]  }
 0x29f   :  { %10401 = vmatprep.subr.bf16.mxu0 %v12363_v22 }
 0x2a2   :  { %10402 = vmatpush3.bf16.msra.mxu0 %v12363_v22 }
 0x2a3   :  { %10403 = vmatprep.subr.bf16.mxu0 %v12373_v37 }
 0x2a6   :  { %10404 = vmatpush3.bf16.msra.mxu0 %v12373_v37 }
 0x2a7   :  { %10405 = vmatprep.subr.bf16.mxu0 %v12370_v36 }
 0x2aa   :  { %10406 = vmatpush3.bf16.msra.mxu0 %v12370_v36 }
 0x2ab   :  { %10407 = vmatprep.subr.bf16.mxu0 %v12381_v51 }
 0x2ae   :  { %10408 = vmatpush3.bf16.msra.mxu0 %v12381_v51 }
 0x2af   :  { %10409 = vmatprep.subr.bf16.mxu0 %v12378_v50 }
 0x2b2   :  { %10410 = vmatpush3.bf16.msra.mxu0 %v12378_v50 }
 0x2b3   :  { %10411 = vmatprep.subr.bf16.mxu0 %v12389_v1 }
 0x2b6   :  { %10412 = vmatpush3.bf16.msra.mxu0 %v12389_v1 }
 0x2b7   :  { %10413 = vmatprep.subr.bf16.mxu0 %v12386_v0 }
 0x2ba   :  { %10414 = vmatpush3.bf16.msra.mxu0 %v12386_v0 }
 0x2bb   :  { %10439 = vmatprep.subr.bf16.mxu0 %v12365_v23 }
 0x2bd   :  { %10416 = vmatmul.mubr.bf16.vlgmr.msra.gmra.mrb[44].mxu0 %v11883_v57  ;;  %v11925_v57 = vld [vmem:[%s14596_s2 + $0x178] sm:$0xff]  }
 0x2be   :  { %10440 = vmatpush3.bf16.msra.mxu0 %v12365_v23  ;;  %10455 = vmatprep.mubr.bf16.mxu0 %v11884_v58 }
 0x2bf   :  { %10441 = vmatprep.subr.bf16.mxu0 %v12363_v22 }
 0x2c2   :  { %10442 = vmatpush3.bf16.msra.mxu0 %v12363_v22 }
 0x2c3   :  { %10443 = vmatprep.subr.bf16.mxu0 %v12373_v37 }
 0x2c6   :  { %10444 = vmatpush3.bf16.msra.mxu0 %v12373_v37 }
 0x2c7   :  { %10445 = vmatprep.subr.bf16.mxu0 %v12370_v36 }
 0x2ca   :  { %10446 = vmatpush3.bf16.msra.mxu0 %v12370_v36 }
 0x2cb   :  { %10447 = vmatprep.subr.bf16.mxu0 %v12381_v51 }
 0x2ce   :  { %10448 = vmatpush3.bf16.msra.mxu0 %v12381_v51 }
 0x2cf   :  { %10449 = vmatprep.subr.bf16.mxu0 %v12378_v50 }
 0x2d2   :  { %10450 = vmatpush3.bf16.msra.mxu0 %v12378_v50 }
 0x2d3   :  { %10451 = vmatprep.subr.bf16.mxu0 %v12389_v1 }
 0x2d6   :  { %10452 = vmatpush3.bf16.msra.mxu0 %v12389_v1 }
 0x2d7   :  { %10453 = vmatprep.subr.bf16.mxu0 %v12386_v0 }
 0x2da   :  { %10454 = vmatpush3.bf16.msra.mxu0 %v12386_v0 }
 0x2db   :  { %10479 = vmatprep.subr.bf16.mxu0 %v12365_v23 }
 0x2dd   :  { %10456 = vmatmul.mubr.bf16.vlgmr.msra.gmra.mrb[48].mxu0 %v11885_v59 }
 0x2de   :  { %10480 = vmatpush3.bf16.msra.mxu0 %v12365_v23  ;;  %10495 = vmatprep.mubr.bf16.mxu0 %v11888_v60  ;;  %v11926_v60 = vld [vmem:[%s14596_s2 + $0x180] sm:$0xff]  }
 0x2df   :  { %10481 = vmatprep.subr.bf16.mxu0 %v12363_v22 }
 0x2e2   :  { %10482 = vmatpush3.bf16.msra.mxu0 %v12363_v22 }
 0x2e3   :  { %10483 = vmatprep.subr.bf16.mxu0 %v12373_v37 }
 0x2e6   :  { %10484 = vmatpush3.bf16.msra.mxu0 %v12373_v37 }
 0x2e7   :  { %10485 = vmatprep.subr.bf16.mxu0 %v12370_v36 }
 0x2ea   :  { %10486 = vmatpush3.bf16.msra.mxu0 %v12370_v36 }
 0x2eb   :  { %10487 = vmatprep.subr.bf16.mxu0 %v12381_v51 }
 0x2ee   :  { %10488 = vmatpush3.bf16.msra.mxu0 %v12381_v51 }
 0x2ef   :  { %10489 = vmatprep.subr.bf16.mxu0 %v12378_v50 }
 0x2f0   :  { %v12644_v61 = vpop.f32.mrb[24].mxu0 }
 0x2f1   :  { %v12646_v62 = vpop.f32.mrb[25].mxu0 }
 0x2f2   :  { %v12648_v63 = vpop.f32.mrb[26].mxu0  ;;  %10490 = vmatpush3.bf16.msra.mxu0 %v12378_v50 }
 0x2f3   :  { %v12651_v2 = vpop.f32.mrb[27].mxu0  ;;  %10491 = vmatprep.subr.bf16.mxu0 %v12389_v1 }
 0x2f6   :  { %10492 = vmatpush3.bf16.msra.mxu0 %v12389_v1 }
 0x2f7   :  { %10493 = vmatprep.subr.bf16.mxu0 %v12386_v0 }
 0x2fa   :  { %10494 = vmatpush3.bf16.msra.mxu0 %v12386_v0 }
 0x2fb   :  { %10519 = vmatprep.subr.bf16.mxu0 %v12365_v23 }
 0x2fd   :  { %10496 = vmatmul.mubr.bf16.vlgmr.msra.gmra.mrb[52].mxu0 %v11889_v3 }
 0x2fe   :  { %10520 = vmatpush3.bf16.msra.mxu0 %v12365_v23  ;;  %10535 = vmatprep.mubr.bf16.mxu0 %v11898_v4 }
 0x2ff   :  { %10521 = vmatprep.subr.bf16.mxu0 %v12363_v22 }
 0x302   :  { %10522 = vmatpush3.bf16.msra.mxu0 %v12363_v22 }
 0x303   :  { %10523 = vmatprep.subr.bf16.mxu0 %v12373_v37 }
 0x306   :  { %10524 = vmatpush3.bf16.msra.mxu0 %v12373_v37 }
 0x307   :  { %10525 = vmatprep.subr.bf16.mxu0 %v12370_v36 }
 0x30a   :  { %10526 = vmatpush3.bf16.msra.mxu0 %v12370_v36 }
 0x30b   :  { %10527 = vmatprep.subr.bf16.mxu0 %v12381_v51 }
 0x30e   :  { %10528 = vmatpush3.bf16.msra.mxu0 %v12381_v51 }
 0x30f   :  { %10529 = vmatprep.subr.bf16.mxu0 %v12378_v50 }
 0x310   :  { %v10257_v5 = vpop.f32.mrb[28].mxu0 }
 0x311   :  { %v669_v6 = vpop.f32.mrb[29].mxu0 }
 0x312   :  { %v10258_v7 = vpop.f32.mrb[30].mxu0  ;;  %10530 = vmatpush3.bf16.msra.mxu0 %v12378_v50 }
 0x313   :  { %v685_v8 = vpack.c.bf16 %v10258_v7, %v10257_v5  ;;  %v672_v9 = vpop.f32.mrb[31].mxu0  ;;  %10531 = vmatprep.subr.bf16.mxu0 %v12389_v1  ;;  %v11927_v7 = vld [vmem:[%s14596_s2 + $0x188] sm:$0xff]  }
 0x314   :  { %v684_v10 = vpack.c.bf16 %v672_v9, %v669_v6  ;;  %v11930_v9 = vld [vmem:[%s14596_s2 + $0x190] sm:$0xff]  }
 0x316   :  { %10275 = vmatprep.mubr.bf16.mxu1 %v684_v10  ;;  %10532 = vmatpush3.bf16.msra.mxu0 %v12389_v1  ;;  %v11938_v10 = vld [vmem:[%s14595_s5 + $0xd0] sm:$0xff]  }
 0x317   :  { %10276 = vmatmul.mubr.bf16.vlgmr.msra.gmra.mrb[0].mxu1 %v685_v8  ;;  %10533 = vmatprep.subr.bf16.mxu0 %v12386_v0  ;;  %v11929_v8 = vld [vmem:[%s14595_s5 + $0xc8] sm:$0xff]  }
 0x318   :  { %10300 = vmatpush3.bf16.msra.mxu1 %v12577_v54  ;;  %v11922_v54 = vld [vmem:[%s14596_s2 + $0x160] sm:$0xff]  }
 0x319   :  { %10301 = vmatprep.subr.bf16.mxu1 %v11897_v11 }
 0x31a   :  { %10534 = vmatpush3.bf16.msra.mxu0 %v12386_v0 }
 0x31b   :  { %10559 = vmatprep.subr.bf16.mxu0 %v12365_v23 }
 0x31c   :  { %10302 = vmatpush3.bf16.msra.mxu1 %v11897_v11  ;;  %v11931_v11 = vld [vmem:[%s14596_s2 + $0x198] sm:$0xff]  }
 0x31d   :  { %10536 = vmatmul.mubr.bf16.vlgmr.msra.gmra.mrb[56].mxu0 %v11899_v12  ;;  %10303 = vmatprep.subr.bf16.mxu1 %v11900_v13  ;;  %v11932_v12 = vld [vmem:[%s14596_s2 + $0x1a0] sm:$0xff]  }
 0x31e   :  { %10560 = vmatpush3.bf16.msra.mxu0 %v12365_v23  ;;  %10575 = vmatprep.mubr.bf16.mxu0 %v11908_v14  ;;  %v11934_v14 = vld [vmem:[%s14596_s2 + $0x1b0] sm:$0xff]  }
 0x31f   :  { %10561 = vmatprep.subr.bf16.mxu0 %v12363_v22 }
 0x320   :  { %10304 = vmatpush3.bf16.msra.mxu1 %v11900_v13  ;;  %v11933_v13 = vld [vmem:[%s14596_s2 + $0x1a8] sm:$0xff]  }
 0x321   :  { %10305 = vmatprep.subr.bf16.mxu1 %v11901_v15 }
 0x322   :  { %10562 = vmatpush3.bf16.msra.mxu0 %v12363_v22 }
 0x323   :  { %10563 = vmatprep.subr.bf16.mxu0 %v12373_v37 }
 0x324   :  { %10306 = vmatpush3.bf16.msra.mxu1 %v11901_v15  ;;  %v11935_v15 = vld [vmem:[%s14596_s2 + $0x1b8] sm:$0xff]  }
 0x325   :  { %10307 = vmatprep.subr.bf16.mxu1 %v11902_v16 }
 0x326   :  { %10564 = vmatpush3.bf16.msra.mxu0 %v12373_v37 }
 0x327   :  { %10565 = vmatprep.subr.bf16.mxu0 %v12370_v36 }
 0x328   :  { %10308 = vmatpush3.bf16.msra.mxu1 %v11902_v16 }
 0x329   :  { %10309 = vmatprep.subr.bf16.mxu1 %v11903_v17 }
 0x32a   :  { %10566 = vmatpush3.bf16.msra.mxu0 %v12370_v36 }
 0x32b   :  { %10567 = vmatprep.subr.bf16.mxu0 %v12381_v51 }
 0x32c   :  { %10310 = vmatpush3.bf16.msra.mxu1 %v11903_v17 }
 0x32d   :  { %10311 = vmatprep.subr.bf16.mxu1 %v11904_v18 }
 0x32e   :  { %10568 = vmatpush3.bf16.msra.mxu0 %v12381_v51 }
 0x32f   :  { %10569 = vmatprep.subr.bf16.mxu0 %v12378_v50 }
 0x330   :  { %v10297_v20 = vpop.f32.mrb[32].mxu0  ;;  %10312 = vmatpush3.bf16.msra.mxu1 %v11904_v18  ;;  %v11936_v18 = vld [vmem:[%s14596_s2 + $0x1c0] sm:$0xff]  }
 0x331   :  { %v855_v21 = vpop.f32.mrb[33].mxu0  ;;  %10313 = vmatprep.subr.bf16.mxu1 %v11905_v19 }
 0x332   :  { %v10298_v25 = vpop.f32.mrb[34].mxu0  ;;  %10570 = vmatpush3.bf16.msra.mxu0 %v12378_v50 }
 0x333   :  { %v871_v26 = vpack.c.bf16 %v10298_v25, %v10297_v20  ;;  %v858_v27 = vpop.f32.mrb[35].mxu0  ;;  %10571 = vmatprep.subr.bf16.mxu0 %v12389_v1  ;;  %v11937_v25 = vld [vmem:[%s14596_s2 + $0x1c8] sm:$0xff]  }
 0x334   :  { %v870_v28 = vpack.c.bf16 %v858_v27, %v855_v21  ;;  %10314 = vmatpush3.bf16.msra.mxu1 %v11905_v19  ;;  %v11940_v27 = vld [vmem:[%s14596_s2 + $0x1d0] sm:$0xff]  }
 0x335   :  { %10339 = vmatprep.subr.bf16.mxu1 %v11906_v24 }
 0x336   :  { %10315 = vmatprep.mubr.bf16.mxu1 %v870_v28  ;;  %10572 = vmatpush3.bf16.msra.mxu0 %v12389_v1  ;;  %v11948_v28 = vld [vmem:[%s14595_s5 + $0xe0] sm:$0xff]  }
 0x337   :  { %10316 = vmatmul.mubr.bf16.vlgmr.msra.gmra.mrb[0].mxu1 %v871_v26  ;;  %10573 = vmatprep.subr.bf16.mxu0 %v12386_v0  ;;  %v11939_v26 = vld [vmem:[%s14595_s5 + $0xd8] sm:$0xff]  }
 0x338   :  { %10340 = vmatpush3.bf16.msra.mxu1 %v11906_v24 }
 0x339   :  { %10341 = vmatprep.subr.bf16.mxu1 %v11907_v29 }
 0x33a   :  { %10574 = vmatpush3.bf16.msra.mxu0 %v12386_v0 }
 0x33b   :  { %10599 = vmatprep.subr.bf16.mxu0 %v12365_v23 }
 0x33c   :  { %10342 = vmatpush3.bf16.msra.mxu1 %v11907_v29  ;;  %v11941_v29 = vld [vmem:[%s14596_s2 + $0x1d8] sm:$0xff]  }
 0x33d   :  { %10576 = vmatmul.mubr.bf16.vlgmr.msra.gmra.mrb[60].mxu0 %v11909_v30  ;;  %10343 = vmatprep.subr.bf16.mxu1 %v11910_v31  ;;  %v11942_v30 = vld [vmem:[%s14596_s2 + $0x1e0] sm:$0xff]  }
 0x33e   :  { %10600 = vmatpush3.bf16.msra.mxu0 %v12365_v23  ;;  %10615 = vmatprep.mubr.bf16.mxu0 %v11918_v32  ;;  %v11944_v32 = vld [vmem:[%s14596_s2 + $0x1f0] sm:$0xff]  }
 0x33f   :  { %10601 = vmatprep.subr.bf16.mxu0 %v12363_v22 }
 0x340   :  { %10344 = vmatpush3.bf16.msra.mxu1 %v11910_v31  ;;  %v11943_v31 = vld [vmem:[%s14596_s2 + $0x1e8] sm:$0xff]  }
 0x341   :  { %10345 = vmatprep.subr.bf16.mxu1 %v11911_v33 }
 0x342   :  { %10602 = vmatpush3.bf16.msra.mxu0 %v12363_v22 }
 0x343   :  { %10603 = vmatprep.subr.bf16.mxu0 %v12373_v37 }
 0x344   :  { %10346 = vmatpush3.bf16.msra.mxu1 %v11911_v33  ;;  %v11945_v33 = vld [vmem:[%s14596_s2 + $0x1f8] sm:$0xff]  }
 0x345   :  { %10347 = vmatprep.subr.bf16.mxu1 %v11912_v34 }
 0x346   :  { %10604 = vmatpush3.bf16.msra.mxu0 %v12373_v37 }
 0x347   :  { %10605 = vmatprep.subr.bf16.mxu0 %v12370_v36 }
 0x348   :  { %10348 = vmatpush3.bf16.msra.mxu1 %v11912_v34 }
 0x349   :  { %10349 = vmatprep.subr.bf16.mxu1 %v11913_v35 }
 0x34a   :  { %10606 = vmatpush3.bf16.msra.mxu0 %v12370_v36 }
 0x34b   :  { %10607 = vmatprep.subr.bf16.mxu0 %v12381_v51 }
 0x34c   :  { %10350 = vmatpush3.bf16.msra.mxu1 %v11913_v35 }
 0x34d   :  { %10351 = vmatprep.subr.bf16.mxu1 %v11914_v38 }
 0x34e   :  { %10608 = vmatpush3.bf16.msra.mxu0 %v12381_v51 }
 0x34f   :  { %10609 = vmatprep.subr.bf16.mxu0 %v12378_v50 }
 0x350   :  { %v10337_v40 = vpop.f32.mrb[36].mxu0  ;;  %10352 = vmatpush3.bf16.msra.mxu1 %v11914_v38  ;;  %v11946_v38 = vld [vmem:[%s14596_s2 + $0x200] sm:$0xff]  }
 0x351   :  { %v1041_v41 = vpop.f32.mrb[37].mxu0  ;;  %10353 = vmatprep.subr.bf16.mxu1 %v11915_v39 }
 0x352   :  { %v10338_v43 = vpop.f32.mrb[38].mxu0  ;;  %10610 = vmatpush3.bf16.msra.mxu0 %v12378_v50 }
 0x353   :  { %v1057_v44 = vpack.c.bf16 %v10338_v43, %v10337_v40  ;;  %v1044_v45 = vpop.f32.mrb[39].mxu0  ;;  %10611 = vmatprep.subr.bf16.mxu0 %v12389_v1  ;;  %v11947_v43 = vld [vmem:[%s14596_s2 + $0x208] sm:$0xff]  }
 0x354   :  { %v1056_v46 = vpack.c.bf16 %v1044_v45, %v1041_v41  ;;  %10354 = vmatpush3.bf16.msra.mxu1 %v11915_v39  ;;  %v11950_v45 = vld [vmem:[%s14596_s2 + $0x210] sm:$0xff]  }
 0x355   :  { %10379 = vmatprep.subr.bf16.mxu1 %v11916_v42 }
 0x356   :  { %10355 = vmatprep.mubr.bf16.mxu1 %v1056_v46  ;;  %10612 = vmatpush3.bf16.msra.mxu0 %v12389_v1  ;;  %v11958_v46 = vld [vmem:[%s14595_s5 + $0xf0] sm:$0xff]  }
 0x357   :  { %10356 = vmatmul.mubr.bf16.vlgmr.msra.gmra.mrb[0].mxu1 %v1057_v44  ;;  %10613 = vmatprep.subr.bf16.mxu0 %v12386_v0  ;;  %v11949_v44 = vld [vmem:[%s14595_s5 + $0xe8] sm:$0xff]  }
 0x358   :  { %10380 = vmatpush3.bf16.msra.mxu1 %v11916_v42 }
 0x359   :  { %10381 = vmatprep.subr.bf16.mxu1 %v11917_v47 }
 0x35a   :  { %10614 = vmatpush3.bf16.msra.mxu0 %v12386_v0 }
 0x35b   :  { %10639 = vmatprep.subr.bf16.mxu0 %v12365_v23 }
 0x35c   :  { %10382 = vmatpush3.bf16.msra.mxu1 %v11917_v47  ;;  %v11951_v47 = vld [vmem:[%s14596_s2 + $0x218] sm:$0xff]  }
 0x35d   :  { %10616 = vmatmul.mubr.bf16.vlgmr.msra.gmra.mrb[64].mxu0 %v11919_v48  ;;  %10383 = vmatprep.subr.bf16.mxu1 %v11920_v49  ;;  %v11952_v48 = vld [vmem:[%s14596_s2 + $0x220] sm:$0xff]  }
 0x35e   :  { %10640 = vmatpush3.bf16.msra.mxu0 %v12365_v23  ;;  %10655 = vmatprep.mubr.bf16.mxu0 %v11928_v52 }
 0x35f   :  { %10641 = vmatprep.subr.bf16.mxu0 %v12363_v22 }
 0x360   :  { %10384 = vmatpush3.bf16.msra.mxu1 %v11920_v49  ;;  %v11953_v49 = vld [vmem:[%s14596_s2 + $0x228] sm:$0xff]  }
 0x361   :  { %10385 = vmatprep.subr.bf16.mxu1 %v11921_v53 }
 0x362   :  { %10642 = vmatpush3.bf16.msra.mxu0 %v12363_v22 }
 0x363   :  { %10643 = vmatprep.subr.bf16.mxu0 %v12373_v37 }
 0x364   :  { %10386 = vmatpush3.bf16.msra.mxu1 %v11921_v53 }
 0x365   :  { %10387 = vmatprep.subr.bf16.mxu1 %v11922_v54 }
 0x366   :  { %10644 = vmatpush3.bf16.msra.mxu0 %v12373_v37 }
 0x367   :  { %10645 = vmatprep.subr.bf16.mxu0 %v12370_v36 }
 0x368   :  { %10388 = vmatpush3.bf16.msra.mxu1 %v11922_v54 }
 0x369   :  { %10389 = vmatprep.subr.bf16.mxu1 %v11923_v55 }
 0x36a   :  { %10646 = vmatpush3.bf16.msra.mxu0 %v12370_v36 }
 0x36b   :  { %10647 = vmatprep.subr.bf16.mxu0 %v12381_v51 }
 0x36c   :  { %10390 = vmatpush3.bf16.msra.mxu1 %v11923_v55 }
 0x36d   :  { %10391 = vmatprep.subr.bf16.mxu1 %v11924_v56 }
 0x36e   :  { %10648 = vmatpush3.bf16.msra.mxu0 %v12381_v51 }
 0x36f   :  { %10649 = vmatprep.subr.bf16.mxu0 %v12378_v50 }
 0x370   :  { %v10377_v58 = vpop.f32.mrb[40].mxu0  ;;  %10392 = vmatpush3.bf16.msra.mxu1 %v11924_v56 }
 0x371   :  { %v1227_v59 = vpop.f32.mrb[41].mxu0  ;;  %10393 = vmatprep.subr.bf16.mxu1 %v11925_v57 }
 0x372   :  { %v10378_v3 = vpop.f32.mrb[42].mxu0  ;;  %10650 = vmatpush3.bf16.msra.mxu0 %v12378_v50 }
 0x373   :  { %v1243_v4 = vpack.c.bf16 %v10378_v3, %v10377_v58  ;;  %v1230_v5 = vpop.f32.mrb[43].mxu0  ;;  %10651 = vmatprep.subr.bf16.mxu0 %v12389_v1  ;;  %v11962_v58 = vld [vmem:[%s14596_s2 + $0x260] sm:$0xff]  }
 0x374   :  { %v1242_v6 = vpack.c.bf16 %v1230_v5, %v1227_v59  ;;  %10394 = vmatpush3.bf16.msra.mxu1 %v11925_v57  ;;  %v11960_v57 = vld [vmem:[%s14596_s2 + $0x250] sm:$0xff]   ;;  %v11963_v59 = vld [vmem:[%s14596_s2 + $0x268] sm:$0xff]   ;;  %v11966_v5 = vld [vmem:[%s14596_s2 + $0x280] sm:$0xff]  }
 0x375   :  { %10419 = vmatprep.subr.bf16.mxu1 %v11926_v60 }
 0x376   :  { %10395 = vmatprep.mubr.bf16.mxu1 %v1242_v6  ;;  %10652 = vmatpush3.bf16.msra.mxu0 %v12389_v1 }
 0x377   :  { %10396 = vmatmul.mubr.bf16.vlgmr.msra.gmra.mrb[0].mxu1 %v1243_v4  ;;  %10653 = vmatprep.subr.bf16.mxu0 %v12386_v0 }
 0x378   :  { %10420 = vmatpush3.bf16.msra.mxu1 %v11926_v60  ;;  %v11965_v60 = vld [vmem:[%s14596_s2 + $0x278] sm:$0xff]  }
 0x379   :  { %10421 = vmatprep.subr.bf16.mxu1 %v11927_v7 }
 0x37a   :  { %10654 = vmatpush3.bf16.msra.mxu0 %v12386_v0 }
 0x37b   :  { %10679 = vmatprep.subr.bf16.mxu0 %v12365_v23 }
 0x37c   :  { %10422 = vmatpush3.bf16.msra.mxu1 %v11927_v7 }
 0x37d   :  { %10656 = vmatmul.mubr.bf16.vlgmr.msra.gmra.mrb[68].mxu0 %v11929_v8  ;;  %10423 = vmatprep.subr.bf16.mxu1 %v11930_v9 }
 0x37e   :  { %10680 = vmatpush3.bf16.msra.mxu0 %v12365_v23  ;;  %10695 = vmatprep.mubr.bf16.mxu0 %v11938_v10  ;;  %v11967_v10 = vld [vmem:[%s14596_s2 + $0x288] sm:$0xff]  }
 0x37f   :  { %10681 = vmatprep.subr.bf16.mxu0 %v12363_v22 }
 0x380   :  { %10424 = vmatpush3.bf16.msra.mxu1 %v11930_v9 }
 0x381   :  { %10425 = vmatprep.subr.bf16.mxu1 %v11931_v11 }
 0x382   :  { %10682 = vmatpush3.bf16.msra.mxu0 %v12363_v22 }
 0x383   :  { %10683 = vmatprep.subr.bf16.mxu0 %v12373_v37 }
 0x384   :  { %10426 = vmatpush3.bf16.msra.mxu1 %v11931_v11  ;;  %v11968_v11 = vld [vmem:[%s14596_s2 + $0x290] sm:$0xff]  }
 0x385   :  { %10427 = vmatprep.subr.bf16.mxu1 %v11932_v12 }
 0x386   :  { %10684 = vmatpush3.bf16.msra.mxu0 %v12373_v37 }
 0x387   :  { %10685 = vmatprep.subr.bf16.mxu0 %v12370_v36 }
 0x388   :  { %10428 = vmatpush3.bf16.msra.mxu1 %v11932_v12  ;;  %v11969_v12 = vld [vmem:[%s14596_s2 + $0x298] sm:$0xff]  }
 0x389   :  { %10429 = vmatprep.subr.bf16.mxu1 %v11933_v13 }
 0x38a   :  { %10686 = vmatpush3.bf16.msra.mxu0 %v12370_v36 }
 0x38b   :  { %10687 = vmatprep.subr.bf16.mxu0 %v12381_v51 }
 0x38c   :  { %10430 = vmatpush3.bf16.msra.mxu1 %v11933_v13  ;;  %v11970_v13 = vld [vmem:[%s14596_s2 + $0x2a0] sm:$0xff]  }
 0x38d   :  { %10431 = vmatprep.subr.bf16.mxu1 %v11934_v14 }
 0x38e   :  { %10688 = vmatpush3.bf16.msra.mxu0 %v12381_v51 }
 0x38f   :  { %10689 = vmatprep.subr.bf16.mxu0 %v12378_v50 }
 0x390   :  { %v10417_v16 = vpop.f32.mrb[44].mxu0  ;;  %10432 = vmatpush3.bf16.msra.mxu1 %v11934_v14  ;;  %v11971_v14 = vld [vmem:[%s14596_s2 + $0x2a8] sm:$0xff]  }
 0x391   :  { %v1413_v17 = vpop.f32.mrb[45].mxu0  ;;  %10433 = vmatprep.subr.bf16.mxu1 %v11935_v15 }
 0x392   :  { %v10418_v19 = vpop.f32.mrb[46].mxu0  ;;  %10690 = vmatpush3.bf16.msra.mxu0 %v12378_v50 }
 0x393   :  { %v1429_v20 = vpack.c.bf16 %v10418_v19, %v10417_v16  ;;  %v1416_v21 = vpop.f32.mrb[47].mxu0  ;;  %10691 = vmatprep.subr.bf16.mxu0 %v12389_v1  ;;  %v11973_v16 = vld [vmem:[%s14596_s2 + $0x2b8] sm:$0xff]   ;;  %v11974_v19 = vld [vmem:[%s14596_s2 + $0x2c0] sm:$0xff]  }
 0x394   :  { %v1428_v24 = vpack.c.bf16 %v1416_v21, %v1413_v17  ;;  %10434 = vmatpush3.bf16.msra.mxu1 %v11935_v15  ;;  %v11972_v15 = vld [vmem:[%s14596_s2 + $0x2b0] sm:$0xff]  }
 0x395   :  { %10459 = vmatprep.subr.bf16.mxu1 %v11936_v18 }
 0x396   :  { %10435 = vmatprep.mubr.bf16.mxu1 %v1428_v24  ;;  %10692 = vmatpush3.bf16.msra.mxu0 %v12389_v1 }
 0x397   :  { %10436 = vmatmul.mubr.bf16.vlgmr.msra.gmra.mrb[0].mxu1 %v1429_v20  ;;  %10693 = vmatprep.subr.bf16.mxu0 %v12386_v0 }
 0x398   :  { %10460 = vmatpush3.bf16.msra.mxu1 %v11936_v18 }
 0x399   :  { %10461 = vmatprep.subr.bf16.mxu1 %v11937_v25 }
 0x39a   :  { %10694 = vmatpush3.bf16.msra.mxu0 %v12386_v0 }
 0x39b   :  { %10719 = vmatprep.subr.bf16.mxu0 %v12365_v23 }
 0x39c   :  { %10462 = vmatpush3.bf16.msra.mxu1 %v11937_v25 }
 0x39d   :  { %10696 = vmatmul.mubr.bf16.vlgmr.msra.gmra.mrb[72].mxu0 %v11939_v26  ;;  %10463 = vmatprep.subr.bf16.mxu1 %v11940_v27  ;;  %v11975_v26 = vld [vmem:[%s14596_s2 + $0x2c8] sm:$0xff]  }
 0x39e   :  { %10720 = vmatpush3.bf16.msra.mxu0 %v12365_v23  ;;  %10735 = vmatprep.mubr.bf16.mxu0 %v11948_v28  ;;  %v11977_v28 = vld [vmem:[%s14596_s2 + $0x2d8] sm:$0xff]  }
 0x39f   :  { %10721 = vmatprep.subr.bf16.mxu0 %v12363_v22 }
 0x3a0   :  { %10464 = vmatpush3.bf16.msra.mxu1 %v11940_v27  ;;  %v11976_v27 = vld [vmem:[%s14596_s2 + $0x2d0] sm:$0xff]  }
 0x3a1   :  { %10465 = vmatprep.subr.bf16.mxu1 %v11941_v29 }
 0x3a2   :  { %10722 = vmatpush3.bf16.msra.mxu0 %v12363_v22 }
 0x3a3   :  { %10723 = vmatprep.subr.bf16.mxu0 %v12373_v37 }
 0x3a4   :  { %10466 = vmatpush3.bf16.msra.mxu1 %v11941_v29  ;;  %v11978_v29 = vld [vmem:[%s14596_s2 + $0x2e0] sm:$0xff]  }
 0x3a5   :  { %10467 = vmatprep.subr.bf16.mxu1 %v11942_v30 }
 0x3a6   :  { %10724 = vmatpush3.bf16.msra.mxu0 %v12373_v37 }
 0x3a7   :  { %10725 = vmatprep.subr.bf16.mxu0 %v12370_v36 }
 0x3a8   :  { %10468 = vmatpush3.bf16.msra.mxu1 %v11942_v30  ;;  %v11979_v30 = vld [vmem:[%s14596_s2 + $0x2e8] sm:$0xff]  }
 0x3a9   :  { %10469 = vmatprep.subr.bf16.mxu1 %v11943_v31 }
 0x3aa   :  { %10726 = vmatpush3.bf16.msra.mxu0 %v12370_v36 }
 0x3ab   :  { %10727 = vmatprep.subr.bf16.mxu0 %v12381_v51 }
 0x3ac   :  { %10470 = vmatpush3.bf16.msra.mxu1 %v11943_v31  ;;  %v11980_v31 = vld [vmem:[%s14596_s2 + $0x2f0] sm:$0xff]  }
 0x3ad   :  { %10471 = vmatprep.subr.bf16.mxu1 %v11944_v32 }
 0x3ae   :  { %10728 = vmatpush3.bf16.msra.mxu0 %v12381_v51 }
 0x3af   :  { %10729 = vmatprep.subr.bf16.mxu0 %v12378_v50 }
 0x3b0   :  { %v10457_v34 = vpop.f32.mrb[48].mxu0  ;;  %10472 = vmatpush3.bf16.msra.mxu1 %v11944_v32  ;;  %v11981_v32 = vld [vmem:[%s14596_s2 + $0x2f8] sm:$0xff]  }
 0x3b1   :  { %v1599_v35 = vpop.f32.mrb[49].mxu0  ;;  %10473 = vmatprep.subr.bf16.mxu1 %v11945_v33 }
 0x3b2   :  { %v10458_v39 = vpop.f32.mrb[50].mxu0  ;;  %10730 = vmatpush3.bf16.msra.mxu0 %v12378_v50 }
 0x3b3   :  { %v1615_v40 = vpack.c.bf16 %v10458_v39, %v10457_v34  ;;  %v1602_v41 = vpop.f32.mrb[51].mxu0  ;;  %10731 = vmatprep.subr.bf16.mxu0 %v12389_v1 }
 0x3b4   :  { %v1614_v42 = vpack.c.bf16 %v1602_v41, %v1599_v35  ;;  %10474 = vmatpush3.bf16.msra.mxu1 %v11945_v33  ;;  %v11982_v35 = vld [vmem:[%s14596_s2 + $0x300] sm:$0xff]  }
 0x3b5   :  { %10499 = vmatprep.subr.bf16.mxu1 %v11946_v38 }
 0x3b6   :  { %10475 = vmatprep.mubr.bf16.mxu1 %v1614_v42  ;;  %10732 = vmatpush3.bf16.msra.mxu0 %v12389_v1  ;;  %v11983_v42 = vld [vmem:[%s14596_s2 + $0x308] sm:$0xff]  }
 0x3b7   :  { %10476 = vmatmul.mubr.bf16.vlgmr.msra.gmra.mrb[0].mxu1 %v1615_v40  ;;  %10733 = vmatprep.subr.bf16.mxu0 %v12386_v0 }
 0x3b8   :  { %10500 = vmatpush3.bf16.msra.mxu1 %v11946_v38 }
 0x3b9   :  { %10501 = vmatprep.subr.bf16.mxu1 %v11947_v43 }
 0x3ba   :  { %10734 = vmatpush3.bf16.msra.mxu0 %v12386_v0 }
 0x3bb   :  { %10759 = vmatprep.subr.bf16.mxu0 %v12365_v23 }
 0x3bc   :  { %10502 = vmatpush3.bf16.msra.mxu1 %v11947_v43  ;;  %v11984_v43 = vld [vmem:[%s14596_s2 + $0x310] sm:$0xff]  }
 0x3bd   :  { %10736 = vmatmul.mubr.bf16.vlgmr.msra.gmra.mrb[76].mxu0 %v11949_v44  ;;  %10503 = vmatprep.subr.bf16.mxu1 %v11950_v45  ;;  %v11985_v44 = vld [vmem:[%s14596_s2 + $0x318] sm:$0xff]  }
 0x3be   :  { %10760 = vmatpush3.bf16.msra.mxu0 %v12365_v23  ;;  %10775 = vmatprep.mubr.bf16.mxu0 %v11958_v46  ;;  %v11954_v23 = vld [vmem:[%s14596_s2 + $0x230] sm:$0xff]   ;;  %v11987_v46 = vld [vmem:[%s14596_s2 + $0x328] sm:$0xff]  }
 0x3bf   :  { %10761 = vmatprep.subr.bf16.mxu0 %v12363_v22 }
 0x3c0   :  { %10504 = vmatpush3.bf16.msra.mxu1 %v11950_v45  ;;  %v11986_v45 = vld [vmem:[%s14596_s2 + $0x320] sm:$0xff]  }
 0x3c1   :  { %10505 = vmatprep.subr.bf16.mxu1 %v11951_v47 }
 0x3c2   :  { %10762 = vmatpush3.bf16.msra.mxu0 %v12363_v22  ;;  %v11955_v22 = vld [vmem:[%s14596_s2 + $0x238] sm:$0xff]  }
 0x3c3   :  { %10763 = vmatprep.subr.bf16.mxu0 %v12373_v37 }
 0x3c4   :  { %10506 = vmatpush3.bf16.msra.mxu1 %v11951_v47  ;;  %v11988_v47 = vld [vmem:[%s14596_s2 + $0x330] sm:$0xff]  }
 0x3c5   :  { %10507 = vmatprep.subr.bf16.mxu1 %v11952_v48 }
 0x3c6   :  { %10764 = vmatpush3.bf16.msra.mxu0 %v12373_v37 }
 0x3c7   :  { %10765 = vmatprep.subr.bf16.mxu0 %v12370_v36 }
 0x3c8   :  { %10508 = vmatpush3.bf16.msra.mxu1 %v11952_v48  ;;  %v11989_v48 = vld [vmem:[%s14596_s2 + $0x338] sm:$0xff]  }
 0x3c9   :  { %10509 = vmatprep.subr.bf16.mxu1 %v11953_v49 }
 0x3ca   :  { %10766 = vmatpush3.bf16.msra.mxu0 %v12370_v36  ;;  %v11956_v36 = vld [vmem:[%s14596_s2 + $0x240] sm:$0xff]  }
 0x3cb   :  { %10767 = vmatprep.subr.bf16.mxu0 %v12381_v51 }
 0x3cc   :  { %10510 = vmatpush3.bf16.msra.mxu1 %v11953_v49 }
 0x3cd   :  { %10511 = vmatprep.subr.bf16.mxu1 %v11954_v23 }
 0x3ce   :  { %10768 = vmatpush3.bf16.msra.mxu0 %v12381_v51  ;;  %v11957_v51 = vld [vmem:[%s14596_s2 + $0x248] sm:$0xff]  }
 0x3cf   :  { %10769 = vmatprep.subr.bf16.mxu0 %v12378_v50 }
 0x3d0   :  { %v10497_v37 = vpop.f32.mrb[52].mxu0  ;;  %10512 = vmatpush3.bf16.msra.mxu1 %v11954_v23 }
 0x3d1   :  { %v1785_v52 = vpop.f32.mrb[53].mxu0  ;;  %10513 = vmatprep.subr.bf16.mxu1 %v11955_v22 }
 0x3d2   :  { %v10498_v53 = vpop.f32.mrb[54].mxu0  ;;  %10770 = vmatpush3.bf16.msra.mxu0 %v12378_v50  ;;  %v11959_v50 = vld [vmem:[%s14595_s5 + $0xf8] sm:$0xff]  }
 0x3d3   :  { %v1801_v54 = vpack.c.bf16 %v10498_v53, %v10497_v37  ;;  %v1788_v55 = vpop.f32.mrb[55].mxu0  ;;  %10771 = vmatprep.subr.bf16.mxu0 %v12389_v1 }
 0x3d4   :  { %v1800_v56 = vpack.c.bf16 %v1788_v55, %v1785_v52  ;;  %10514 = vmatpush3.bf16.msra.mxu1 %v11955_v22  ;;  %v11990_v22 = vld [vmem:[%s14596_s2 + $0x340] sm:$0xff]   ;;  %v11992_v55 = vld [vmem:[%s14596_s2 + $0x350] sm:$0xff]  }
 0x3d5   :  { %10539 = vmatprep.subr.bf16.mxu1 %v11956_v36 }
 0x3d6   :  { %10515 = vmatprep.mubr.bf16.mxu1 %v1800_v56  ;;  %10772 = vmatpush3.bf16.msra.mxu0 %v12389_v1  ;;  %v11961_v1 = vld [vmem:[%s14596_s2 + $0x258] sm:$0xff]  }
 0x3d7   :  { %10516 = vmatmul.mubr.bf16.vlgmr.msra.gmra.mrb[0].mxu1 %v1801_v54  ;;  %10773 = vmatprep.subr.bf16.mxu0 %v12386_v0  ;;  %v11991_v54 = vld [vmem:[%s14596_s2 + $0x348] sm:$0xff]   ;;  %v11993_v56 = vld [vmem:[%s14596_s2 + $0x358] sm:$0xff]  }
 0x3d8   :  { %10540 = vmatpush3.bf16.msra.mxu1 %v11956_v36 }
 0x3d9   :  { %10541 = vmatprep.subr.bf16.mxu1 %v11957_v51 }
 0x3da   :  { %10774 = vmatpush3.bf16.msra.mxu0 %v12386_v0  ;;  %v11964_v0 = vld [vmem:[%s14596_s2 + $0x270] sm:$0xff]  }
 0x3dc   :  { %10542 = vmatpush3.bf16.msra.mxu1 %v11957_v51  ;;  %v11994_v51 = vld [vmem:[%s14596_s2 + $0x360] sm:$0xff]  }
 0x3dd   :  { %10776 = vmatmul.mubr.bf16.vlgmr.msra.gmra.mrb[80].mxu0 %v11959_v50  ;;  %10543 = vmatprep.subr.bf16.mxu1 %v11960_v57  ;;  %v11995_v50 = vld [vmem:[%s14596_s2 + $0x368] sm:$0xff]  }
 0x3e0   :  { %10544 = vmatpush3.bf16.msra.mxu1 %v11960_v57  ;;  %v11996_v57 = vld [vmem:[%s14596_s2 + $0x370] sm:$0xff]  }
 0x3e1   :  { %10545 = vmatprep.subr.bf16.mxu1 %v11961_v1 }
 0x3e4   :  { %10546 = vmatpush3.bf16.msra.mxu1 %v11961_v1  ;;  %v11997_v1 = vld [vmem:[%s14596_s2 + $0x378] sm:$0xff]  }
 0x3e5   :  { %10547 = vmatprep.subr.bf16.mxu1 %v11962_v58 }
 0x3e8   :  { %10548 = vmatpush3.bf16.msra.mxu1 %v11962_v58 }
 0x3e9   :  { %10549 = vmatprep.subr.bf16.mxu1 %v11963_v59 }
 0x3ec   :  { %10550 = vmatpush3.bf16.msra.mxu1 %v11963_v59 }
 0x3ed   :  { %10551 = vmatprep.subr.bf16.mxu1 %v11964_v0 }
 0x3f0   :  { %v10537_v3 = vpop.f32.mrb[56].mxu0  ;;  %10552 = vmatpush3.bf16.msra.mxu1 %v11964_v0  ;;  %v11998_v0 = vld [vmem:[%s14596_s2 + $0x380] sm:$0xff]  }
 0x3f1   :  { %v1971_v4 = vpop.f32.mrb[57].mxu0  ;;  %10553 = vmatprep.subr.bf16.mxu1 %v11965_v60 }
 0x3f2   :  { %v10538_v6 = vpop.f32.mrb[58].mxu0 }
 0x3f3   :  { %v1987_v7 = vpack.c.bf16 %v10538_v6, %v10537_v3  ;;  %v1974_v8 = vpop.f32.mrb[59].mxu0  ;;  %v11999_v6 = vld [vmem:[%s14596_s2 + $0x388] sm:$0xff]  }
 0x3f4   :  { %v1986_v9 = vpack.c.bf16 %v1974_v8, %v1971_v4  ;;  %10554 = vmatpush3.bf16.msra.mxu1 %v11965_v60  ;;  %v12001_v8 = vld [vmem:[%s14596_s2 + $0x398] sm:$0xff]  }
 0x3f5   :  { %10579 = vmatprep.subr.bf16.mxu1 %v11966_v5 }
 0x3f6   :  { %10555 = vmatprep.mubr.bf16.mxu1 %v1986_v9  ;;  %v12002_v9 = vld [vmem:[%s14596_s2 + $0x3a0] sm:$0xff]  }
 0x3f7   :  { %10556 = vmatmul.mubr.bf16.vlgmr.msra.gmra.mrb[0].mxu1 %v1987_v7  ;;  %v12000_v7 = vld [vmem:[%s14596_s2 + $0x390] sm:$0xff]  }
 0x3f8   :  { %10580 = vmatpush3.bf16.msra.mxu1 %v11966_v5 }
 0x3f9   :  { %10581 = vmatprep.subr.bf16.mxu1 %v11967_v10 }
 0x3fc   :  { %10582 = vmatpush3.bf16.msra.mxu1 %v11967_v10  ;;  %v12003_v10 = vld [vmem:[%s14596_s2 + $0x3a8] sm:$0xff]  }
 0x3fd   :  { %10583 = vmatprep.subr.bf16.mxu1 %v11968_v11 }
 0x400   :  { %10584 = vmatpush3.bf16.msra.mxu1 %v11968_v11  ;;  %v12004_v11 = vld [vmem:[%s14596_s2 + $0x3b0] sm:$0xff]  }
 0x401   :  { %10585 = vmatprep.subr.bf16.mxu1 %v11969_v12 }
 0x404   :  { %10586 = vmatpush3.bf16.msra.mxu1 %v11969_v12  ;;  %v12005_v12 = vld [vmem:[%s14596_s2 + $0x3b8] sm:$0xff]  }
 0x405   :  { %10587 = vmatprep.subr.bf16.mxu1 %v11970_v13 }
 0x408   :  { %10588 = vmatpush3.bf16.msra.mxu1 %v11970_v13 }
 0x409   :  { %10589 = vmatprep.subr.bf16.mxu1 %v11971_v14 }
 0x40c   :  { %10590 = vmatpush3.bf16.msra.mxu1 %v11971_v14 }
 0x40d   :  { %10591 = vmatprep.subr.bf16.mxu1 %v11972_v15 }
 0x410   :  { %v10577_v17 = vpop.f32.mrb[60].mxu0  ;;  %10592 = vmatpush3.bf16.msra.mxu1 %v11972_v15  ;;  %v12006_v15 = vld [vmem:[%s14596_s2 + $0x3c0] sm:$0xff]  }
 0x411   :  { %v2157_v18 = vpop.f32.mrb[61].mxu0  ;;  %10593 = vmatprep.subr.bf16.mxu1 %v11973_v16 }
 0x412   :  { %v10578_v20 = vpop.f32.mrb[62].mxu0 }
 0x413   :  { %v2173_v21 = vpack.c.bf16 %v10578_v20, %v10577_v17  ;;  %v2160_v24 = vpop.f32.mrb[63].mxu0  ;;  %v12007_v20 = vld [vmem:[%s14596_s2 + $0x3c8] sm:$0xff]  }
 0x414   :  { %v2172_v25 = vpack.c.bf16 %v2160_v24, %v2157_v18  ;;  %10594 = vmatpush3.bf16.msra.mxu1 %v11973_v16  ;;  %v12009_v24 = vld [vmem:[%s14596_s2 + $0x3d8] sm:$0xff]  }
 0x415   :  { %10619 = vmatprep.subr.bf16.mxu1 %v11974_v19 }
 0x416   :  { %10595 = vmatprep.mubr.bf16.mxu1 %v2172_v25  ;;  %v12010_v25 = vld [vmem:[%s14596_s2 + $0x3e0] sm:$0xff]  }
 0x417   :  { %10596 = vmatmul.mubr.bf16.vlgmr.msra.gmra.mrb[0].mxu1 %v2173_v21  ;;  %v12008_v21 = vld [vmem:[%s14596_s2 + $0x3d0] sm:$0xff]  }
 0x418   :  { %10620 = vmatpush3.bf16.msra.mxu1 %v11974_v19 }
 0x419   :  { %10621 = vmatprep.subr.bf16.mxu1 %v11975_v26 }
 0x41c   :  { %10622 = vmatpush3.bf16.msra.mxu1 %v11975_v26  ;;  %v12011_v26 = vld [vmem:[%s14596_s2 + $0x3e8] sm:$0xff]  }
 0x41d   :  { %10623 = vmatprep.subr.bf16.mxu1 %v11976_v27 }
 0x420   :  { %10624 = vmatpush3.bf16.msra.mxu1 %v11976_v27  ;;  %v12012_v27 = vld [vmem:[%s14596_s2 + $0x3f0] sm:$0xff]  }
 0x421   :  { %10625 = vmatprep.subr.bf16.mxu1 %v11977_v28 }
 0x424   :  { %10626 = vmatpush3.bf16.msra.mxu1 %v11977_v28  ;;  %v12013_v28 = vld [vmem:[%s14596_s2 + $0x3f8] sm:$0xff]  }
 0x425   :  { %10627 = vmatprep.subr.bf16.mxu1 %v11978_v29 }
 0x428   :  { %10628 = vmatpush3.bf16.msra.mxu1 %v11978_v29 }
 0x429   :  { %10629 = vmatprep.subr.bf16.mxu1 %v11979_v30 }
 0x42c   :  { %10630 = vmatpush3.bf16.msra.mxu1 %v11979_v30 }
 0x42d   :  { %10631 = vmatprep.subr.bf16.mxu1 %v11980_v31 }
 0x430   :  { %v10617_v33 = vpop.f32.mrb[64].mxu0  ;;  %10632 = vmatpush3.bf16.msra.mxu1 %v11980_v31 }
 0x431   :  { %v2343_v34 = vpop.f32.mrb[65].mxu0  ;;  %10633 = vmatprep.subr.bf16.mxu1 %v11981_v32 }
 0x432   :  { %v10618_v38 = vpop.f32.mrb[66].mxu0 }
 0x433   :  { %v2359_v39 = vpack.c.bf16 %v10618_v38, %v10617_v33  ;;  %v2346_v40 = vpop.f32.mrb[67].mxu0 }
 0x434   :  { %v2358_v41 = vpack.c.bf16 %v2346_v40, %v2343_v34  ;;  %10634 = vmatpush3.bf16.msra.mxu1 %v11981_v32 }
 0x435   :  { %10659 = vmatprep.subr.bf16.mxu1 %v11982_v35 }
 0x436   :  { %10635 = vmatprep.mubr.bf16.mxu1 %v2358_v41 }
 0x437   :  { %10636 = vmatmul.mubr.bf16.vlgmr.msra.gmra.mrb[0].mxu1 %v2359_v39 }
 0x438   :  { %10660 = vmatpush3.bf16.msra.mxu1 %v11982_v35  ;;  %v12278_v35 = vmov 0.0  }
 0x439   :  { %10661 = vmatprep.subr.bf16.mxu1 %v11983_v42  ;;  %10807 = vmatprep.subr.bf16.mxu0 %v12278_v35 }
 0x43a   :  { %10811 = vmatprep.mubr.msk.bf16.mxu0 %vm12279_vm1, %v12278_v35 }
 0x43c   :  { %10662 = vmatpush3.bf16.msra.mxu1 %v11983_v42 }
 0x43d   :  { %10663 = vmatprep.subr.bf16.mxu1 %v11984_v43 }
 0x440   :  { %10664 = vmatpush3.bf16.msra.mxu1 %v11984_v43 }
 0x441   :  { %10665 = vmatprep.subr.bf16.mxu1 %v11985_v44 }
 0x444   :  { %10666 = vmatpush3.bf16.msra.mxu1 %v11985_v44 }
 0x445   :  { %10667 = vmatprep.subr.bf16.mxu1 %v11986_v45 }
 0x448   :  { %10668 = vmatpush3.bf16.msra.mxu1 %v11986_v45 }
 0x449   :  { %10669 = vmatprep.subr.bf16.mxu1 %v11987_v46 }
 0x44c   :  { %10670 = vmatpush3.bf16.msra.mxu1 %v11987_v46 }
 0x44d   :  { %10671 = vmatprep.subr.bf16.mxu1 %v11988_v47 }
 0x450   :  { %v10657_v49 = vpop.f32.mrb[68].mxu0  ;;  %10672 = vmatpush3.bf16.msra.mxu1 %v11988_v47 }
 0x451   :  { %v2529_v23 = vpop.f32.mrb[69].mxu0  ;;  %10673 = vmatprep.subr.bf16.mxu1 %v11989_v48 }
 0x452   :  { %v10658_v37 = vpop.f32.mrb[70].mxu0 }
 0x453   :  { %v2545_v52 = vpack.c.bf16 %v10658_v37, %v10657_v49  ;;  %v2532_v36 = vpop.f32.mrb[71].mxu0 }
 0x454   :  { %v2544_v53 = vpack.c.bf16 %v2532_v36, %v2529_v23  ;;  %10674 = vmatpush3.bf16.msra.mxu1 %v11989_v48 }
 0x455   :  { %10699 = vmatprep.subr.bf16.mxu1 %v11990_v22 }
 0x456   :  { %10675 = vmatprep.mubr.bf16.mxu1 %v2544_v53 }
 0x457   :  { %10676 = vmatmul.mubr.bf16.vlgmr.msra.gmra.mrb[0].mxu1 %v2545_v52 }
 0x458   :  { %10700 = vmatpush3.bf16.msra.mxu1 %v11990_v22 }
 0x459   :  { %10701 = vmatprep.subr.bf16.mxu1 %v11991_v54 }
 0x45c   :  { %10702 = vmatpush3.bf16.msra.mxu1 %v11991_v54 }
 0x45d   :  { %10703 = vmatprep.subr.bf16.mxu1 %v11992_v55 }
 0x460   :  { %10704 = vmatpush3.bf16.msra.mxu1 %v11992_v55 }
 0x461   :  { %10705 = vmatprep.subr.bf16.mxu1 %v11993_v56 }
 0x464   :  { %10706 = vmatpush3.bf16.msra.mxu1 %v11993_v56 }
 0x465   :  { %10707 = vmatprep.subr.bf16.mxu1 %v11994_v51 }
 0x468   :  { %10708 = vmatpush3.bf16.msra.mxu1 %v11994_v51 }
 0x469   :  { %10709 = vmatprep.subr.bf16.mxu1 %v11995_v50 }
 0x46c   :  { %10710 = vmatpush3.bf16.msra.mxu1 %v11995_v50 }
 0x46d   :  { %10711 = vmatprep.subr.bf16.mxu1 %v11996_v57 }
 0x470   :  { %v10697_v58 = vpop.f32.mrb[72].mxu0  ;;  %10712 = vmatpush3.bf16.msra.mxu1 %v11996_v57 }
 0x471   :  { %v2715_v59 = vpop.f32.mrb[73].mxu0  ;;  %10713 = vmatprep.subr.bf16.mxu1 %v11997_v1 }
 0x472   :  { %v10698_v60 = vpop.f32.mrb[74].mxu0 }
 0x473   :  { %v2731_v3 = vpack.c.bf16 %v10698_v60, %v10697_v58  ;;  %v2718_v4 = vpop.f32.mrb[75].mxu0 }
 0x474   :  { %v2730_v5 = vpack.c.bf16 %v2718_v4, %v2715_v59  ;;  %10714 = vmatpush3.bf16.msra.mxu1 %v11997_v1 }
 0x475   :  { %10739 = vmatprep.subr.bf16.mxu1 %v11998_v0 }
 0x476   :  { %10715 = vmatprep.mubr.bf16.mxu1 %v2730_v5 }
 0x477   :  { %10716 = vmatmul.mubr.bf16.vlgmr.msra.gmra.mrb[0].mxu1 %v2731_v3 }
 0x478   :  { %10740 = vmatpush3.bf16.msra.mxu1 %v11998_v0 }
 0x479   :  { %10741 = vmatprep.subr.bf16.mxu1 %v11999_v6 }
 0x47c   :  { %10742 = vmatpush3.bf16.msra.mxu1 %v11999_v6 }
 0x47d   :  { %10743 = vmatprep.subr.bf16.mxu1 %v12000_v7 }
 0x480   :  { %10744 = vmatpush3.bf16.msra.mxu1 %v12000_v7 }
 0x481   :  { %10745 = vmatprep.subr.bf16.mxu1 %v12001_v8 }
 0x484   :  { %10746 = vmatpush3.bf16.msra.mxu1 %v12001_v8 }
 0x485   :  { %10747 = vmatprep.subr.bf16.mxu1 %v12002_v9 }
 0x488   :  { %10748 = vmatpush3.bf16.msra.mxu1 %v12002_v9 }
 0x489   :  { %10749 = vmatprep.subr.bf16.mxu1 %v12003_v10 }
 0x48c   :  { %10750 = vmatpush3.bf16.msra.mxu1 %v12003_v10 }
 0x48d   :  { %10751 = vmatprep.subr.bf16.mxu1 %v12004_v11 }
 0x490   :  { %v10737_v13 = vpop.f32.mrb[76].mxu0  ;;  %10752 = vmatpush3.bf16.msra.mxu1 %v12004_v11 }
 0x491   :  { %v2901_v14 = vpop.f32.mrb[77].mxu0  ;;  %10753 = vmatprep.subr.bf16.mxu1 %v12005_v12 }
 0x492   :  { %v10738_v16 = vpop.f32.mrb[78].mxu0 }
 0x493   :  { %v2917_v17 = vpack.c.bf16 %v10738_v16, %v10737_v13  ;;  %v2904_v18 = vpop.f32.mrb[79].mxu0 }
 0x494   :  { %v2916_v19 = vpack.c.bf16 %v2904_v18, %v2901_v14  ;;  %10754 = vmatpush3.bf16.msra.mxu1 %v12005_v12 }
 0x495   :  { %10779 = vmatprep.subr.bf16.mxu1 %v12006_v15 }
 0x496   :  { %10755 = vmatprep.mubr.bf16.mxu1 %v2916_v19 }
 0x497   :  { %10756 = vmatmul.mubr.bf16.vlgmr.msra.gmra.mrb[0].mxu1 %v2917_v17 }
 0x498   :  { %10780 = vmatpush3.bf16.msra.mxu1 %v12006_v15 }
 0x499   :  { %10781 = vmatprep.subr.bf16.mxu1 %v12007_v20 }
 0x49c   :  { %10782 = vmatpush3.bf16.msra.mxu1 %v12007_v20 }
 0x49d   :  { %10783 = vmatprep.subr.bf16.mxu1 %v12008_v21 }
 0x4a0   :  { %10784 = vmatpush3.bf16.msra.mxu1 %v12008_v21 }
 0x4a1   :  { %10785 = vmatprep.subr.bf16.mxu1 %v12009_v24 }
 0x4a4   :  { %10786 = vmatpush3.bf16.msra.mxu1 %v12009_v24 }
 0x4a5   :  { %10787 = vmatprep.subr.bf16.mxu1 %v12010_v25 }
 0x4a8   :  { %10788 = vmatpush3.bf16.msra.mxu1 %v12010_v25 }
 0x4a9   :  { %10789 = vmatprep.subr.bf16.mxu1 %v12011_v26 }
 0x4ac   :  { %10790 = vmatpush3.bf16.msra.mxu1 %v12011_v26 }
 0x4ad   :  { %10791 = vmatprep.subr.bf16.mxu1 %v12012_v27 }
 0x4b0   :  { %v10777_v29 = vpop.f32.mrb[80].mxu0  ;;  %10792 = vmatpush3.bf16.msra.mxu1 %v12012_v27 }
 0x4b1   :  { %v3087_v30 = vpop.f32.mrb[81].mxu0  ;;  %10793 = vmatprep.subr.bf16.mxu1 %v12013_v28 }
 0x4b2   :  { %v10778_v31 = vpop.f32.mrb[82].mxu0 }
 0x4b3   :  { %v3103_v32 = vpack.c.bf16 %v10778_v31, %v10777_v29  ;;  %v3090_v33 = vpop.f32.mrb[83].mxu0  ;;  %v8647_v29 = vld [vmem:[%s14598_s6 + $0x4] sm:$0xf] }
 0x4b4   :  { %v3102_v34 = vpack.c.bf16 %v3090_v33, %v3087_v30  ;;  %10794 = vmatpush3.bf16.msra.mxu1 %v12013_v28  ;;  %v3272_v30 = vld [vmem:[%s14598_s6] sm:$0xf]  ;;  %v8681_v33 = vld [vmem:[%s14598_s6 + $0x8] sm:$0xf] }
 0x4b5   :  { %10799 = vmatprep.subr.bf16.mxu1 %v12278_v35  ;;  %v12014_v31 = vld [vmem:[%s14597_s3 + $0x40] sm:$0xff]  }
 0x4b6   :  { %10795 = vmatprep.mubr.bf16.mxu1 %v3102_v34  ;;  %v12016_v34 = vld [vmem:[%s14597_s3 + $0x50] sm:$0xff]  }
 0x4b7   :  { %10796 = vmatmul.mubr.bf16.vlgmr.msra.gmra.mrb[0].mxu1 %v3103_v32  ;;  %v12015_v32 = vld [vmem:[%s14597_s3 + $0x48] sm:$0xff]  }
 0x4b8   :  { %10803 = vmatprep.mubr.msk.bf16.mxu1 %vm12279_vm1, %v12278_v35 }
 0x58a   :  { %v10797_v38 = vpop.f32.mrb[0].mxu1 }
 0x58b   :  { %v11663_v39 = vadd.f32 %v10797_v38, %v12644_v61  ;;  %v3203_v40 = vpop.f32.mrb[1].mxu1  ;;  %v12017_v38 = vld [vmem:[%s14597_s3 + $0x58] sm:$0xff]  }
 0x58c   :  { %v11664_v41 = vadd.f32 %v3203_v40, %v12646_v62  ;;  %v10798_v42 = vpop.f32.mrb[2].mxu1  ;;  %v12018_v40 = vld [vmem:[%s14597_s3 + $0x60] sm:$0xff]  }
 0x58d   :  { %v11665_v43 = vadd.f32 %v10798_v42, %v12648_v63  ;;  %v3206_v44 = vpop.f32.mrb[3].mxu1  ;;  %v8733_v42 = vld [vmem:[%s14598_s6 + $0x10] sm:$0xf] }
 0x58e   :  { %v11666_v45 = vadd.f32 %v3206_v44, %v12651_v2  ;;  %v12021_v44 = vld [vmem:[%s14597_s3 + $0x78] sm:$0xff]  }
 0x590   :  { %v3222_v46 = vadd.f32 %v11666_v45, %v11664_v41 }
 0x592   :  { %v3223_v47 = vadd.f32 %v11663_v39, %v3222_v46  ;;  %v8785_v46 = vld [vmem:[%s14598_s6 + $0x18] sm:$0xf] }
 0x594   :  { %v3224_v48 = vadd.f32 %v11665_v43, %v3223_v47  ;;  %v8811_v47 = vld [vmem:[%s14598_s6 + $0x1c] sm:$0xf] }
 0x596   :  { %v3225_v49 = vrot.slane %v3224_v48, 4 }
 0x598   :  { %v3226_v23 = vadd.f32 %v3225_v49, %v3224_v48  ;;  %v8837_v48 = vld [vmem:[%s14598_s6 + $0x20] sm:$0xf]  ;;  %v8863_v49 = vld [vmem:[%s14598_s6 + $0x24] sm:$0xf] }
 0x59a   :  { %v3227_v22 = vrot.slane %v3226_v23, 2 }
 0x59c   :  { %v3228_v37 = vadd.f32 %v3227_v22, %v3226_v23  ;;  %v8889_v23 = vld [vmem:[%s14598_s6 + $0x28] sm:$0xf]  ;;  %v8915_v22 = vld [vmem:[%s14598_s6 + $0x2c] sm:$0xf] }
 0x59e   :  { %v3229_v52 = vrot.slane %v3228_v37, 1 }
 0x5a0   :  { %v3230_v36 = vadd.f32 %v3229_v52, %v3228_v37  ;;  %v8941_v37 = vld [vmem:[%s14598_s6 + $0x30] sm:$0xf]  ;;  %v8967_v52 = vld [vmem:[%s14598_s6 + $0x34] sm:$0xf] }
 0x5a2   :  { %v3232_v53 = vmul.f32 0.03125, %v3230_v36  ;;  %v8993_v36 = vld [vmem:[%s14598_s6 + $0x38] sm:$0xf] }
 0x5a4   :  { %v3233_v61 = vsub.f32 %v11664_v41, %v3232_v53  ;;  %v3234_v54 = vsub.f32 %v11666_v45, %v3232_v53  ;;  %v3235_v55 = vsub.f32 %v11663_v39, %v3232_v53  ;;  %v3236_v62 = vsub.f32 %v11665_v43, %v3232_v53 }
 0x5a6   :  { %v3237_v56 = vmul.f32 %v3233_v61, %v3233_v61  ;;  %v3238_v51 = vmul.f32 %v3234_v54, %v3234_v54  ;;  %v3239_v63 = vmul.f32 %v3235_v55, %v3235_v55  ;;  %v3240_v57 = vmul.f32 %v3236_v62, %v3236_v62  ;;  %v12022_v61 = vld [vmem:[%s14597_s3] sm:$0xff]  }
 0x5a8   :  { %v3241_v50 = vadd.f32 %v3238_v51, %v3237_v56 }
 0x5aa   :  { %v3242_v2 = vadd.f32 %v3241_v50, %v3239_v63 }
 0x5ac   :  { %v3243_v1 = vadd.f32 %v3242_v2, %v3240_v57  ;;  %v12023_v2 = vld [vmem:[%s14597_s3 + $0x8] sm:$0xff]  }
 0x5ae   :  { %v3244_v58 = vrot.slane %v3243_v1, 4 }
 0x5b0   :  { %v3245_v59 = vadd.f32 %v3244_v58, %v3243_v1  ;;  %v12024_v1 = vld [vmem:[%s14597_s3 + $0x10] sm:$0xff]  }
 0x5b2   :  { %v3246_v0 = vrot.slane %v3245_v59, 2 }
 0x5b4   :  { %v3247_v60 = vadd.f32 %v3246_v0, %v3245_v59 }
 0x5b6   :  { %v3248_v3 = vrot.slane %v3247_v60, 1 }
 0x5b8   :  { %v3249_v4 = vadd.f32 %v3248_v3, %v3247_v60  ;;  %v12025_v3 = vld [vmem:[%s14597_s3 + $0x18] sm:$0xff]  }
 0x5ba   :  { %v3250_v5 = vmul.f32 0.03125, %v3249_v4  ;;  %v12026_v4 = vld [vmem:[%s14597_s3 + $0x20] sm:$0xff]  }
 0x5bc   :  { %v3251_v6 = vadd.f32 1e-05, %v3250_v5 }
 0x5be   :  { %12270 = vrsqrt.f32 %v3251_v6 }
 0x5c8   :  { %v12271_v7 = vpop.eup %12270 }
 0x5c9   :  { %v3253_v8 = vmul.f32 %v12271_v7, %v11664_v41  ;;  %v3254_v9 = vmul.f32 %v12271_v7, %v11666_v45  ;;  %v3255_v10 = vmul.f32 %v12271_v7, %v11663_v39  ;;  %v3256_v11 = vmul.f32 %v12271_v7, %v11665_v43  ;;  %v8707_v39 = vld [vmem:[%s14598_s6 + $0xc] sm:$0xf]  ;;  %v12020_v43 = vld [vmem:[%s14597_s3 + $0x70] sm:$0xff]  }
 0x5ca   :  { %v3257_v12 = vmul.f32 %v12271_v7, %v3232_v53  ;;  %v12019_v41 = vld [vmem:[%s14597_s3 + $0x68] sm:$0xff]   ;;  %v8759_v45 = vld [vmem:[%s14598_s6 + $0x14] sm:$0xf] }
 0x5cc   :  { %v3258_v13 = vsub.f32 %v3253_v8, %v3257_v12  ;;  %v3259_v14 = vsub.f32 %v3254_v9, %v3257_v12  ;;  %v3260_v15 = vsub.f32 %v3255_v10, %v3257_v12  ;;  %v3261_v16 = vsub.f32 %v3256_v11, %v3257_v12  ;;  %v12027_v9 = vld [vmem:[%s14597_s3 + $0x28] sm:$0xff]   ;;  %v12028_v10 = vld [vmem:[%s14597_s3 + $0x30] sm:$0xff]  }
 0x5ce   :  { %v3262_v17 = vmul.f32 0.2, %v3258_v13  ;;  %v3263_v18 = vmul.f32 0.2, %v3259_v14  ;;  %v3264_v19 = vmul.f32 0.2, %v3260_v15 }
 0x5cf   :  { %v3265_v20 = vmul.f32 0.2, %v3261_v16 }
 0x5d0   :  { %v3266_v21 = vmax.f32 %v3258_v13, %v3262_v17  ;;  %v3267_v24 = vmax.f32 %v3259_v14, %v3263_v18  ;;  %v3268_v25 = vmax.f32 %v3260_v15, %v3264_v19  ;;  %v12029_v15 = vld [vmem:[%s14597_s3 + $0x38] sm:$0xff]   ;;  %v12030_v17 = vld [vmem:[%s14597_s3 + $0x80] sm:$0xff]  }
 0x5d1   :  { %v3269_v26 = vmax.f32 %v3261_v16, %v3265_v20 }
 0x5d2   :  { %v13134_v27 = vpack.c.bf16 %v3267_v24, %v3266_v21  ;;  %v12031_v24 = vld [vmem:[%s14597_s3 + $0x88] sm:$0xff]  }
 0x5d3   :  { %v13136_v28 = vpack.c.bf16 %v3269_v26, %v3268_v25  ;;  %v12032_v25 = vld [vmem:[%s14597_s3 + $0x90] sm:$0xff]   ;;  %v12033_v26 = vld [vmem:[%s14597_s3 + $0x98] sm:$0xff]  }
 0x5d4   :  { %10800 = vmatpush3.bf16.msra.mxu1 %v13134_v27  ;;  %10808 = vmatpush3.bf16.msra.mxu0 %v13134_v27 }
 0x5d5   :  { %10801 = vmatprep.subr.bf16.mxu1 %v12278_v35  ;;  %10809 = vmatprep.subr.bf16.mxu0 %v12278_v35 }
 0x5d8   :  { %10802 = vmatpush3.bf16.msra.mxu1 %v13136_v28  ;;  %10810 = vmatpush3.bf16.msra.mxu0 %v13136_v28 }
 0x5d9   :  { %10855 = vmatprep.subr.bf16.mxu1 %v12278_v35  ;;  %10815 = vmatprep.subr.bf16.mxu0 %v12278_v35 }
 0x5db   :  { %10812 = vmatmul.mubr.msk.bf16.vlgmr.msra.gmra.mrb[84].mxu0 %vm3273_vm2, %v8647_v29  ;;  %10804 = vmatmul.mubr.msk.bf16.vlgmr.msra.gmra.mrb[4].mxu1 %vm3273_vm2, %v3272_v30  ;;  %v12036_v29 = vld [vmem:[%s14597_s3 + $0xb0] sm:$0xff]   ;;  %v12037_v30 = vld [vmem:[%s14597_s3 + $0xb8] sm:$0xff]  }
 0x5dc   :  { %10856 = vmatpush3.bf16.msra.mxu1 %v13134_v27  ;;  %10859 = vmatprep.mubr.msk.bf16.mxu1 %vm12279_vm1, %v12278_v35 }
 0x5dd   :  { %10857 = vmatprep.subr.bf16.mxu1 %v12278_v35  ;;  %10816 = vmatpush3.bf16.msra.mxu0 %v12014_v31 }
 0x5de   :  { %10817 = vmatprep.subr.bf16.mxu0 %v12278_v35  ;;  %10831 = vmatprep.mubr.msk.bf16.mxu0 %vm12279_vm1, %v12278_v35 }
 0x5e0   :  { %10858 = vmatpush3.bf16.msra.mxu1 %v13136_v28 }
 0x5e1   :  { %10883 = vmatprep.subr.bf16.mxu1 %v12278_v35  ;;  %10818 = vmatpush3.bf16.msra.mxu0 %v12015_v32 }
 0x5e2   :  { %10819 = vmatprep.subr.bf16.mxu0 %v12278_v35 }
 0x5e3   :  { %10860 = vmatmul.mubr.msk.bf16.vlgmr.msra.gmra.mrb[8].mxu1 %vm3273_vm2, %v8681_v33 }
 0x5e4   :  { %10884 = vmatpush3.bf16.msra.mxu1 %v13134_v27  ;;  %10887 = vmatprep.mubr.msk.bf16.mxu1 %vm12279_vm1, %v12278_v35 }
 0x5e5   :  { %10885 = vmatprep.subr.bf16.mxu1 %v12278_v35  ;;  %10820 = vmatpush3.bf16.msra.mxu0 %v12016_v34 }
 0x5e6   :  { %10821 = vmatprep.subr.bf16.mxu0 %v12278_v35 }
 0x5e8   :  { %10886 = vmatpush3.bf16.msra.mxu1 %v13136_v28 }
 0x5e9   :  { %10911 = vmatprep.subr.bf16.mxu1 %v12278_v35  ;;  %10822 = vmatpush3.bf16.msra.mxu0 %v12017_v38 }
 0x5ea   :  { %10823 = vmatprep.subr.bf16.mxu0 %v12278_v35 }
 0x5eb   :  { %10888 = vmatmul.mubr.msk.bf16.vlgmr.msra.gmra.mrb[12].mxu1 %vm3273_vm2, %v8707_v39  ;;  %v12038_v39 = vld [vmem:[%s14597_s3 + $0xc0] sm:$0xff]  }
 0x5ec   :  { %10912 = vmatpush3.bf16.msra.mxu1 %v13134_v27  ;;  %10915 = vmatprep.mubr.msk.bf16.mxu1 %vm12279_vm1, %v12278_v35 }
 0x5ed   :  { %10913 = vmatprep.subr.bf16.mxu1 %v12278_v35  ;;  %10824 = vmatpush3.bf16.msra.mxu0 %v12018_v40  ;;  %v12039_v40 = vld [vmem:[%s14597_s3 + $0xc8] sm:$0xff]  }
 0x5ee   :  { %10825 = vmatprep.subr.bf16.mxu0 %v12278_v35 }
 0x5f0   :  { %10914 = vmatpush3.bf16.msra.mxu1 %v13136_v28 }
 0x5f1   :  { %10939 = vmatprep.subr.bf16.mxu1 %v12278_v35  ;;  %10826 = vmatpush3.bf16.msra.mxu0 %v12019_v41  ;;  %v12040_v41 = vld [vmem:[%s14597_s3 + $0xd0] sm:$0xff]  }
 0x5f2   :  { %10827 = vmatprep.subr.bf16.mxu0 %v12278_v35 }
 0x5f3   :  { %10916 = vmatmul.mubr.msk.bf16.vlgmr.msra.gmra.mrb[16].mxu1 %vm3273_vm2, %v8733_v42  ;;  %v12041_v42 = vld [vmem:[%s14597_s3 + $0xd8] sm:$0xff]  }
 0x5f4   :  { %10940 = vmatpush3.bf16.msra.mxu1 %v13134_v27  ;;  %10943 = vmatprep.mubr.msk.bf16.mxu1 %vm12279_vm1, %v12278_v35 }
 0x5f5   :  { %10941 = vmatprep.subr.bf16.mxu1 %v12278_v35  ;;  %10828 = vmatpush3.bf16.msra.mxu0 %v12020_v43  ;;  %v12042_v43 = vld [vmem:[%s14597_s3 + $0xe0] sm:$0xff]  }
 0x5f6   :  { %10829 = vmatprep.subr.bf16.mxu0 %v12278_v35 }
 0x5f8   :  { %10942 = vmatpush3.bf16.msra.mxu1 %v13136_v28 }
 0x5f9   :  { %10967 = vmatprep.subr.bf16.mxu1 %v12278_v35  ;;  %10830 = vmatpush3.bf16.msra.mxu0 %v12021_v44  ;;  %v12043_v44 = vld [vmem:[%s14597_s3 + $0xe8] sm:$0xff]  }
 0x5fa   :  { %10835 = vmatprep.subr.bf16.mxu0 %v12278_v35 }
 0x5fb   :  { %10944 = vmatmul.mubr.msk.bf16.vlgmr.msra.gmra.mrb[20].mxu1 %vm3273_vm2, %v8759_v45  ;;  %v12044_v45 = vld [vmem:[%s14597_s3 + $0xf0] sm:$0xff]  }
 0x5fc   :  { %10968 = vmatpush3.bf16.msra.mxu1 %v13134_v27  ;;  %10971 = vmatprep.mubr.msk.bf16.mxu1 %vm12279_vm1, %v12278_v35 }
 0x5fd   :  { %10969 = vmatprep.subr.bf16.mxu1 %v12278_v35 }
 0x600   :  { %10970 = vmatpush3.bf16.msra.mxu1 %v13136_v28 }
 0x601   :  { %10995 = vmatprep.subr.bf16.mxu1 %v12278_v35 }
 0x603   :  { %10972 = vmatmul.mubr.msk.bf16.vlgmr.msra.gmra.mrb[24].mxu1 %vm3273_vm2, %v8785_v46  ;;  %v12045_v46 = vld [vmem:[%s14597_s3 + $0xf8] sm:$0xff]  }
 0x604   :  { %10996 = vmatpush3.bf16.msra.mxu1 %v13134_v27  ;;  %10999 = vmatprep.mubr.msk.bf16.mxu1 %vm12279_vm1, %v12278_v35 }
 0x605   :  { %10997 = vmatprep.subr.bf16.mxu1 %v12278_v35 }
 0x608   :  { %10998 = vmatpush3.bf16.msra.mxu1 %v13136_v28 }
 0x609   :  { %11023 = vmatprep.subr.bf16.mxu1 %v12278_v35 }
 0x60b   :  { %11000 = vmatmul.mubr.msk.bf16.vlgmr.msra.gmra.mrb[28].mxu1 %vm3273_vm2, %v8811_v47 }
 0x60c   :  { %11024 = vmatpush3.bf16.msra.mxu1 %v13134_v27  ;;  %11027 = vmatprep.mubr.msk.bf16.mxu1 %vm12279_vm1, %v12278_v35 }
 0x60d   :  { %11025 = vmatprep.subr.bf16.mxu1 %v12278_v35 }
 0x610   :  { %11026 = vmatpush3.bf16.msra.mxu1 %v13136_v28 }
 0x611   :  { %11051 = vmatprep.subr.bf16.mxu1 %v12278_v35 }
 0x613   :  { %11028 = vmatmul.mubr.msk.bf16.vlgmr.msra.gmra.mrb[32].mxu1 %vm3273_vm2, %v8837_v48 }
 0x614   :  { %11052 = vmatpush3.bf16.msra.mxu1 %v13134_v27  ;;  %11055 = vmatprep.mubr.msk.bf16.mxu1 %vm12279_vm1, %v12278_v35 }
 0x615   :  { %11053 = vmatprep.subr.bf16.mxu1 %v12278_v35 }
 0x618   :  { %11054 = vmatpush3.bf16.msra.mxu1 %v13136_v28 }
 0x619   :  { %11079 = vmatprep.subr.bf16.mxu1 %v12278_v35 }
 0x61b   :  { %11056 = vmatmul.mubr.msk.bf16.vlgmr.msra.gmra.mrb[36].mxu1 %vm3273_vm2, %v8863_v49 }
 0x61c   :  { %11080 = vmatpush3.bf16.msra.mxu1 %v13134_v27  ;;  %11083 = vmatprep.mubr.msk.bf16.mxu1 %vm12279_vm1, %v12278_v35 }
 0x61d   :  { %11081 = vmatprep.subr.bf16.mxu1 %v12278_v35 }
 0x620   :  { %11082 = vmatpush3.bf16.msra.mxu1 %v13136_v28 }
 0x621   :  { %11107 = vmatprep.subr.bf16.mxu1 %v12278_v35 }
 0x623   :  { %11084 = vmatmul.mubr.msk.bf16.vlgmr.msra.gmra.mrb[40].mxu1 %vm3273_vm2, %v8889_v23 }
 0x624   :  { %11108 = vmatpush3.bf16.msra.mxu1 %v13134_v27  ;;  %11111 = vmatprep.mubr.msk.bf16.mxu1 %vm12279_vm1, %v12278_v35 }
 0x625   :  { %11109 = vmatprep.subr.bf16.mxu1 %v12278_v35 }
 0x628   :  { %11110 = vmatpush3.bf16.msra.mxu1 %v13136_v28 }
 0x629   :  { %11135 = vmatprep.subr.bf16.mxu1 %v12278_v35 }
 0x62b   :  { %11112 = vmatmul.mubr.msk.bf16.vlgmr.msra.gmra.mrb[44].mxu1 %vm3273_vm2, %v8915_v22 }
 0x62c   :  { %11136 = vmatpush3.bf16.msra.mxu1 %v13134_v27  ;;  %11139 = vmatprep.mubr.msk.bf16.mxu1 %vm12279_vm1, %v12278_v35 }
 0x62d   :  { %11137 = vmatprep.subr.bf16.mxu1 %v12278_v35 }
 0x630   :  { %11138 = vmatpush3.bf16.msra.mxu1 %v13136_v28 }
 0x631   :  { %11163 = vmatprep.subr.bf16.mxu1 %v12278_v35 }
 0x633   :  { %11140 = vmatmul.mubr.msk.bf16.vlgmr.msra.gmra.mrb[48].mxu1 %vm3273_vm2, %v8941_v37  ;;  %v12046_v37 = vld [vmem:[%s14597_s3 + $0x100] sm:$0xff]  }
 0x634   :  { %11164 = vmatpush3.bf16.msra.mxu1 %v13134_v27  ;;  %11167 = vmatprep.mubr.msk.bf16.mxu1 %vm12279_vm1, %v12278_v35 }
 0x635   :  { %11165 = vmatprep.subr.bf16.mxu1 %v12278_v35 }
 0x638   :  { %11166 = vmatpush3.bf16.msra.mxu1 %v13136_v28 }
 0x639   :  { %11191 = vmatprep.subr.bf16.mxu1 %v12278_v35 }
 0x63b   :  { %11168 = vmatmul.mubr.msk.bf16.vlgmr.msra.gmra.mrb[52].mxu1 %vm3273_vm2, %v8967_v52  ;;  %v12047_v52 = vld [vmem:[%s14597_s3 + $0x108] sm:$0xff]  }
 0x63c   :  { %11192 = vmatpush3.bf16.msra.mxu1 %v13134_v27  ;;  %11195 = vmatprep.mubr.msk.bf16.mxu1 %vm12279_vm1, %v12278_v35 }
 0x63d   :  { %11193 = vmatprep.subr.bf16.mxu1 %v12278_v35 }
 0x640   :  { %11194 = vmatpush3.bf16.msra.mxu1 %v13136_v28 }
 0x641   :  { %11219 = vmatprep.subr.bf16.mxu1 %v12278_v35 }
 0x643   :  { %11196 = vmatmul.mubr.msk.bf16.vlgmr.msra.gmra.mrb[56].mxu1 %vm3273_vm2, %v8993_v36  ;;  %v12048_v36 = vld [vmem:[%s14597_s3 + $0x110] sm:$0xff]  }
 0x644   :  { %11220 = vmatpush3.bf16.msra.mxu1 %v13134_v27  ;;  %11223 = vmatprep.mubr.msk.bf16.mxu1 %vm12279_vm1, %v12278_v35  ;;  %v12034_v27 = vld [vmem:[%s14597_s3 + $0xa0] sm:$0xff]  }
 0x645   :  { %11221 = vmatprep.subr.bf16.mxu1 %v12278_v35 }
 0x648   :  { %11222 = vmatpush3.bf16.msra.mxu1 %v13136_v28  ;;  %v12035_v28 = vld [vmem:[%s14597_s3 + $0xa8] sm:$0xff]  }
 0x649   :  { %11247 = vmatprep.subr.bf16.mxu1 %v12278_v35 }
 0x6ae   :  { %v3373_v53 = vpop.f32.mrb[84].mxu0  ;;  %v3311_v54 = vpop.f32.mrb[4].mxu1 }
 0x6af   :  { %v3379_v55 = vpack.c.bf16 %v3373_v53, %v3373_v53  ;;  %v10813_v62 = vpop.f32.mrb[85].mxu0  ;;  %v10805_v56 = vpop.f32.mrb[5].mxu1  ;;  %v3317_v16 = vpack.c.bf16 %v3311_v54, %v3311_v54  ;;  %v12049_v53 = vld [vmem:[%s14597_s3 + $0x118] sm:$0xff]   ;;  %v12051_v54 = vld [vmem:[%s14597_s3 + $0x128] sm:$0xff]  }
 0x6b0   :  { %v3376_v51 = vpop.f32.mrb[86].mxu0  ;;  %v3314_v63 = vpop.f32.mrb[6].mxu1  ;;  %v12053_v62 = vld [vmem:[%s14597_s3 + $0x138] sm:$0xff]  }
 0x6b1   :  { %v10814_v50 = vpop.f32.mrb[87].mxu0  ;;  %10832 = vmatmul.mubr.bf16.vlgmr.msra.gmra.mrb[88].mxu0 %v3379_v55  ;;  %v10806_v57 = vpop.f32.mrb[7].mxu1  ;;  %v12052_v55 = vld [vmem:[%s14597_s3 + $0x130] sm:$0xff]  }
 0x6b2   :  { %10836 = vmatpush3.bf16.msra.mxu0 %v12022_v61  ;;  %10851 = vmatprep.mubr.msk.bf16.mxu0 %vm12279_vm1, %v12278_v35  ;;  %v12050_v61 = vld [vmem:[%s14597_s3 + $0x120] sm:$0xff]  }
 0x6b3   :  { %10837 = vmatprep.subr.bf16.mxu0 %v12278_v35 }
 0x6b6   :  { %10838 = vmatpush3.bf16.msra.mxu0 %v12023_v2  ;;  %v13336_v58 = vpop.f32.mrb[8].mxu1  ;;  %v12054_v2 = vld [vmem:[%s14597_s3 + $0x140] sm:$0xff]  }
 0x6b7   :  { %10839 = vmatprep.subr.bf16.mxu0 %v12278_v35  ;;  %v10861_v59 = vpop.f32.mrb[9].mxu1  ;;  %v3618_v34 = vpack.c.bf16 %v13336_v58, %v13336_v58  ;;  %v12056_v58 = vld [vmem:[%s14597_s3 + $0x150] sm:$0xff]  }
 0x6b8   :  { %v3615_v0 = vpop.f32.mrb[10].mxu1  ;;  %v9019_v59 = vld [vmem:[%s14598_s6 + $0x3c] sm:$0xf] }
 0x6b9   :  { %v10862_v60 = vpop.f32.mrb[11].mxu1  ;;  %11224 = vmatmul.mubr.msk.bf16.vlgmr.msra.gmra.mrb[60].mxu1 %vm3273_vm2, %v9019_v59  ;;  %v12057_v0 = vld [vmem:[%s14597_s3 + $0x158] sm:$0xff]   ;;  %v12094_v59 = vld [vmem:[%s14597_s3 + $0x280] sm:$0xff]  }
 0x6ba   :  { %10840 = vmatpush3.bf16.msra.mxu0 %v12024_v1  ;;  %v12055_v1 = vld [vmem:[%s14597_s3 + $0x148] sm:$0xff]   ;;  %11249 = vmatprep.mubr.msk.bf16.mxu1 %vm12279_vm1, %v12278_v35  ;;  %v12058_v60 = vld [vmem:[%s14597_s3 + $0x160] sm:$0xff]  }
 0x6bb   :  { %10841 = vmatprep.subr.bf16.mxu0 %v12278_v35 }
 0x6be   :  { %10842 = vmatpush3.bf16.msra.mxu0 %v12025_v3  ;;  %v13346_v5 = vpop.f32.mrb[12].mxu1  ;;  %v12059_v3 = vld [vmem:[%s14597_s3 + $0x168] sm:$0xff]  }
 0x6bf   :  { %10843 = vmatprep.subr.bf16.mxu0 %v12278_v35  ;;  %v10889_v6 = vpop.f32.mrb[13].mxu1  ;;  %v3770_v23 = vpack.c.bf16 %v13346_v5, %v13346_v5  ;;  %v12061_v5 = vld [vmem:[%s14597_s3 + $0x178] sm:$0xff]  }
 0x6c0   :  { %v3767_v7 = vpop.f32.mrb[14].mxu1 }
 0x6c1   :  { %v10890_v8 = vpop.f32.mrb[15].mxu1 }
 0x6c2   :  { %10844 = vmatpush3.bf16.msra.mxu0 %v12026_v4  ;;  %v12060_v4 = vld [vmem:[%s14597_s3 + $0x170] sm:$0xff]  }
 0x6c3   :  { %10845 = vmatprep.subr.bf16.mxu0 %v12278_v35 }
 0x6c6   :  { %10846 = vmatpush3.bf16.msra.mxu0 %v12027_v9  ;;  %v13356_v11 = vpop.f32.mrb[16].mxu1 }
 0x6c7   :  { %10847 = vmatprep.subr.bf16.mxu0 %v12278_v35  ;;  %v10917_v12 = vpop.f32.mrb[17].mxu1  ;;  %v3922_v50 = vpack.c.bf16 %v13356_v11, %v13356_v11  ;;  %v12062_v11 = vld [vmem:[%s14597_s3 + $0x180] sm:$0xff]  }
 0x6c8   :  { %v3919_v13 = vpop.f32.mrb[18].mxu1  ;;  %v12063_v12 = vld [vmem:[%s14597_s3 + $0x188] sm:$0xff]  }
 0x6c9   :  { %v10918_v14 = vpop.f32.mrb[19].mxu1  ;;  %v12064_v13 = vld [vmem:[%s14597_s3 + $0x190] sm:$0xff]  }
 0x6ca   :  { %10848 = vmatpush3.bf16.msra.mxu0 %v12028_v10  ;;  %v12065_v14 = vld [vmem:[%s14597_s3 + $0x198] sm:$0xff]  }
 0x6cb   :  { %10849 = vmatprep.subr.bf16.mxu0 %v12278_v35 }
 0x6ce   :  { %10850 = vmatpush3.bf16.msra.mxu0 %v12029_v15  ;;  %v13366_v18 = vpop.f32.mrb[20].mxu1  ;;  %v12066_v15 = vld [vmem:[%s14597_s3 + $0x1a0] sm:$0xff]  }
 0x6cf   :  { %10863 = vmatprep.subr.bf16.mxu0 %v12278_v35  ;;  %v10945_v19 = vpop.f32.mrb[21].mxu1  ;;  %v4074_v9 = vpack.c.bf16 %v13366_v18, %v13366_v18  ;;  %v12069_v18 = vld [vmem:[%s14597_s3 + $0x1b8] sm:$0xff]  }
 0x6d0   :  { %v4071_v20 = vpop.f32.mrb[22].mxu1 }
 0x6d1   :  { %10852 = vmatmul.mubr.bf16.vlgmr.msra.gmra.mrb[88].mxu0 %v3317_v16  ;;  %v10946_v21 = vpop.f32.mrb[23].mxu1  ;;  %v12067_v16 = vld [vmem:[%s14597_s3 + $0x1a8] sm:$0xff]  }
 0x6d2   :  { %10864 = vmatpush3.bf16.msra.mxu0 %v12030_v17  ;;  %10879 = vmatprep.mubr.msk.bf16.mxu0 %vm12279_vm1, %v12278_v35  ;;  %v12068_v17 = vld [vmem:[%s14597_s3 + $0x1b0] sm:$0xff]  }
 0x6d3   :  { %10865 = vmatprep.subr.bf16.mxu0 %v12278_v35 }
 0x6d6   :  { %10866 = vmatpush3.bf16.msra.mxu0 %v12031_v24  ;;  %v13398_v31 = vpop.f32.mrb[24].mxu1 }
 0x6d7   :  { %10867 = vmatprep.subr.bf16.mxu0 %v12278_v35  ;;  %v10973_v32 = vpop.f32.mrb[25].mxu1  ;;  %v4226_v24 = vpack.c.bf16 %v13398_v31, %v13398_v31  ;;  %v12075_v31 = vld [vmem:[%s14597_s3 + $0x1e8] sm:$0xff]  }
 0x6d8   :  { %v4223_v33 = vpop.f32.mrb[26].mxu1  ;;  %v12076_v32 = vld [vmem:[%s14597_s3 + $0x1f0] sm:$0xff]  }
 0x6d9   :  { %v10974_v38 = vpop.f32.mrb[27].mxu1  ;;  %v12077_v33 = vld [vmem:[%s14597_s3 + $0x1f8] sm:$0xff]  }
 0x6da   :  { %10868 = vmatpush3.bf16.msra.mxu0 %v12032_v25 }
 0x6db   :  { %10869 = vmatprep.subr.bf16.mxu0 %v12278_v35 }
 0x6de   :  { %10870 = vmatpush3.bf16.msra.mxu0 %v12033_v26  ;;  %v13436_v47 = vpop.f32.mrb[28].mxu1  ;;  %v12070_v26 = vld [vmem:[%s14597_s3 + $0x1c0] sm:$0xff]  }
 0x6df   :  { %10871 = vmatprep.subr.bf16.mxu0 %v12278_v35  ;;  %v11001_v48 = vpop.f32.mrb[29].mxu1 }
 0x6e0   :  { %v4375_v49 = vpop.f32.mrb[30].mxu1  ;;  %v12084_v48 = vld [vmem:[%s14597_s3 + $0x230] sm:$0xff]  }
 0x6e1   :  { %v11002_v22 = vpop.f32.mrb[31].mxu1  ;;  %v12085_v49 = vld [vmem:[%s14597_s3 + $0x238] sm:$0xff]  }
 0x6e2   :  { %10872 = vmatpush3.bf16.msra.mxu0 %v12034_v27  ;;  %v12071_v27 = vld [vmem:[%s14597_s3 + $0x1c8] sm:$0xff]  }
 0x6e3   :  { %10873 = vmatprep.subr.bf16.mxu0 %v12278_v35 }
 0x6e6   :  { %10874 = vmatpush3.bf16.msra.mxu0 %v12035_v28  ;;  %v13474_v56 = vpop.f32.mrb[32].mxu1  ;;  %v12072_v28 = vld [vmem:[%s14597_s3 + $0x1d0] sm:$0xff]  }
 0x6e7   :  { %10875 = vmatprep.subr.bf16.mxu0 %v12278_v35  ;;  %v11029_v51 = vpop.f32.mrb[33].mxu1 }
 0x6e8   :  { %v4527_v63 = vpop.f32.mrb[34].mxu1  ;;  %v12092_v51 = vld [vmem:[%s14597_s3 + $0x270] sm:$0xff]  }
 0x6e9   :  { %v11030_v57 = vpop.f32.mrb[35].mxu1  ;;  %v12093_v63 = vld [vmem:[%s14597_s3 + $0x278] sm:$0xff]  }
 0x6ea   :  { %10876 = vmatpush3.bf16.msra.mxu0 %v12036_v29  ;;  %v12073_v29 = vld [vmem:[%s14597_s3 + $0x1d8] sm:$0xff]  }
 0x6eb   :  { %10877 = vmatprep.subr.bf16.mxu0 %v12278_v35 }
 0x6ee   :  { %10878 = vmatpush3.bf16.msra.mxu0 %v12037_v30  ;;  %v13518_v6 = vpop.f32.mrb[36].mxu1  ;;  %v12074_v30 = vld [vmem:[%s14597_s3 + $0x1e0] sm:$0xff]  }
 0x6ef   :  { %10891 = vmatprep.subr.bf16.mxu0 %v12278_v35  ;;  %v11057_v7 = vpop.f32.mrb[37].mxu1 }
 0x6f0   :  { %v4679_v8 = vpop.f32.mrb[38].mxu1  ;;  %v12101_v7 = vld [vmem:[%s14597_s3 + $0x2b8] sm:$0xff]  }
 0x6f1   :  { %10880 = vmatmul.mubr.bf16.vlgmr.msra.gmra.mrb[88].mxu0 %v3618_v34  ;;  %v11058_v10 = vpop.f32.mrb[39].mxu1 }
 0x6f2   :  { %10892 = vmatpush3.bf16.msra.mxu0 %v12038_v39  ;;  %10907 = vmatprep.mubr.msk.bf16.mxu0 %vm12279_vm1, %v12278_v35 }
 0x6f3   :  { %10893 = vmatprep.subr.bf16.mxu0 %v12278_v35 }
 0x6f6   :  { %10894 = vmatpush3.bf16.msra.mxu0 %v12039_v40  ;;  %v13556_v19 = vpop.f32.mrb[40].mxu1  ;;  %v4378_v40 = vpack.c.bf16 %v13436_v47, %v13436_v47  ;;  %v12083_v47 = vld [vmem:[%s14597_s3 + $0x228] sm:$0xff]  }
 0x6f7   :  { %10895 = vmatprep.subr.bf16.mxu0 %v12278_v35  ;;  %v11085_v20 = vpop.f32.mrb[41].mxu1 }
 0x6f8   :  { %v4831_v21 = vpop.f32.mrb[42].mxu1  ;;  %v12109_v20 = vld [vmem:[%s14597_s3 + $0x2f8] sm:$0xff]  }
 0x6f9   :  { %v11086_v25 = vpop.f32.mrb[43].mxu1 }
 0x6fa   :  { %10896 = vmatpush3.bf16.msra.mxu0 %v12040_v41 }
 0x6fb   :  { %10897 = vmatprep.subr.bf16.mxu0 %v12278_v35 }
 0x6fe   :  { %10898 = vmatpush3.bf16.msra.mxu0 %v12041_v42  ;;  %v13594_v34 = vpop.f32.mrb[44].mxu1  ;;  %v12078_v42 = vld [vmem:[%s14597_s3 + $0x200] sm:$0xff]  }
 0x6ff   :  { %10899 = vmatprep.subr.bf16.mxu0 %v12278_v35  ;;  %v11113_v38 = vpop.f32.mrb[45].mxu1 }
 0x700   :  { %v4983_v39 = vpop.f32.mrb[46].mxu1  ;;  %v12117_v38 = vld [vmem:[%s14597_s3 + $0x338] sm:$0xff]  }
 0x701   :  { %v11114_v41 = vpop.f32.mrb[47].mxu1 }
 0x702   :  { %10900 = vmatpush3.bf16.msra.mxu0 %v12042_v43  ;;  %v12079_v43 = vld [vmem:[%s14597_s3 + $0x208] sm:$0xff]  }
 0x703   :  { %10901 = vmatprep.subr.bf16.mxu0 %v12278_v35  ;;  %v12119_v41 = vld [vmem:[%s14597_s3 + $0x348] sm:$0xff]  }
 0x706   :  { %10902 = vmatpush3.bf16.msra.mxu0 %v12043_v44  ;;  %v12080_v44 = vld [vmem:[%s14597_s3 + $0x210] sm:$0xff]  }
 0x707   :  { %10903 = vmatprep.subr.bf16.mxu0 %v12278_v35 }
 0x70a   :  { %10904 = vmatpush3.bf16.msra.mxu0 %v12044_v45  ;;  %v12081_v45 = vld [vmem:[%s14597_s3 + $0x218] sm:$0xff]  }
 0x70b   :  { %10905 = vmatprep.subr.bf16.mxu0 %v12278_v35 }
 0x70e   :  { %10906 = vmatpush3.bf16.msra.mxu0 %v12045_v46  ;;  %v12082_v46 = vld [vmem:[%s14597_s3 + $0x220] sm:$0xff]  }
 0x70f   :  { %10919 = vmatprep.subr.bf16.mxu0 %v12278_v35 }
 0x711   :  { %10908 = vmatmul.mubr.bf16.vlgmr.msra.gmra.mrb[88].mxu0 %v3770_v23  ;;  %v13632_v23 = vpop.f32.mrb[48].mxu1 }
 0x712   :  { %10920 = vmatpush3.bf16.msra.mxu0 %v12046_v37  ;;  %10935 = vmatprep.mubr.msk.bf16.mxu0 %vm12279_vm1, %v12278_v35  ;;  %v11141_v22 = vpop.f32.mrb[49].mxu1  ;;  %v5138_v39 = vpack.c.bf16 %v13632_v23, %v13632_v23  ;;  %v12127_v23 = vld [vmem:[%s14597_s3 + $0x388] sm:$0xff]  }
 0x713   :  { %10921 = vmatprep.subr.bf16.mxu0 %v12278_v35  ;;  %v5135_v37 = vpop.f32.mrb[50].mxu1  ;;  %v12128_v22 = vld [vmem:[%s14597_s3 + $0x390] sm:$0xff]  }
 0x714   :  { %v12129_v37 = vld [vmem:[%s14597_s3 + $0x398] sm:$0xff]  }
 0x716   :  { %10922 = vmatpush3.bf16.msra.mxu0 %v12047_v52  ;;  %v4530_v52 = vpack.c.bf16 %v13474_v56, %v13474_v56  ;;  %v12091_v56 = vld [vmem:[%s14597_s3 + $0x268] sm:$0xff]  }
 0x717   :  { %10923 = vmatprep.subr.bf16.mxu0 %v12278_v35 }
 0x71a   :  { %10924 = vmatpush3.bf16.msra.mxu0 %v12048_v36  ;;  %v11142_v36 = vpop.f32.mrb[51].mxu1 }
 0x71b   :  { %10925 = vmatprep.subr.bf16.mxu0 %v12278_v35  ;;  %v12131_v36 = vld [vmem:[%s14597_s3 + $0x3a8] sm:$0xff]  }
 0x71e   :  { %10926 = vmatpush3.bf16.msra.mxu0 %v12049_v53  ;;  %v12086_v53 = vld [vmem:[%s14597_s3 + $0x240] sm:$0xff]  }
 0x71f   :  { %10927 = vmatprep.subr.bf16.mxu0 %v12278_v35 }
 0x722   :  { %10928 = vmatpush3.bf16.msra.mxu0 %v12050_v61  ;;  %v12087_v61 = vld [vmem:[%s14597_s3 + $0x248] sm:$0xff]  }
 0x723   :  { %10929 = vmatprep.subr.bf16.mxu0 %v12278_v35 }
 0x726   :  { %10930 = vmatpush3.bf16.msra.mxu0 %v12051_v54  ;;  %v12088_v54 = vld [vmem:[%s14597_s3 + $0x250] sm:$0xff]  }
 0x727   :  { %10931 = vmatprep.subr.bf16.mxu0 %v12278_v35 }
 0x72a   :  { %10932 = vmatpush3.bf16.msra.mxu0 %v12052_v55  ;;  %v12089_v55 = vld [vmem:[%s14597_s3 + $0x258] sm:$0xff]  }
 0x72b   :  { %10933 = vmatprep.subr.bf16.mxu0 %v12278_v35 }
 0x72e   :  { %10934 = vmatpush3.bf16.msra.mxu0 %v12053_v62  ;;  %v12090_v62 = vld [vmem:[%s14597_s3 + $0x260] sm:$0xff]  }
 0x72f   :  { %10947 = vmatprep.subr.bf16.mxu0 %v12278_v35 }
 0x731   :  { %10936 = vmatmul.mubr.bf16.vlgmr.msra.gmra.mrb[88].mxu0 %v3922_v50  ;;  %v13670_v50 = vpop.f32.mrb[52].mxu1 }
 0x732   :  { %10948 = vmatpush3.bf16.msra.mxu0 %v12054_v2  ;;  %10963 = vmatprep.mubr.msk.bf16.mxu0 %vm12279_vm1, %v12278_v35  ;;  %v11169_v57 = vpop.f32.mrb[53].mxu1 }
 0x733   :  { %10949 = vmatprep.subr.bf16.mxu0 %v12278_v35  ;;  %v5287_v2 = vpop.f32.mrb[54].mxu1  ;;  %v12140_v57 = vld [vmem:[%s14597_s3 + $0x3f0] sm:$0xff]  }
 0x734   :  { %v12141_v2 = vld [vmem:[%s14597_s3 + $0x3f8] sm:$0xff]  }
 0x736   :  { %10950 = vmatpush3.bf16.msra.mxu0 %v12055_v1  ;;  %v4682_v1 = vpack.c.bf16 %v13518_v6, %v13518_v6  ;;  %v12100_v6 = vld [vmem:[%s14597_s3 + $0x2b0] sm:$0xff]  }
 0x737   :  { %10951 = vmatprep.subr.bf16.mxu0 %v12278_v35 }
 0x73a   :  { %10952 = vmatpush3.bf16.msra.mxu0 %v12056_v58  ;;  %v11170_v58 = vpop.f32.mrb[55].mxu1 }
 0x73b   :  { %10953 = vmatprep.subr.bf16.mxu0 %v12278_v35  ;;  %v13708_v8 = vpop.f32.mrb[56].mxu1 }
 0x73e   :  { %10954 = vmatpush3.bf16.msra.mxu0 %v12057_v0  ;;  %v12095_v0 = vld [vmem:[%s14597_s3 + $0x288] sm:$0xff]  }
 0x73f   :  { %10955 = vmatprep.subr.bf16.mxu0 %v12278_v35 }
 0x742   :  { %10956 = vmatpush3.bf16.msra.mxu0 %v12058_v60  ;;  %v12096_v60 = vld [vmem:[%s14597_s3 + $0x290] sm:$0xff]  }
 0x743   :  { %10957 = vmatprep.subr.bf16.mxu0 %v12278_v35 }
 0x746   :  { %10958 = vmatpush3.bf16.msra.mxu0 %v12059_v3  ;;  %v12097_v3 = vld [vmem:[%s14597_s3 + $0x298] sm:$0xff]  }
 0x747   :  { %10959 = vmatprep.subr.bf16.mxu0 %v12278_v35 }
 0x74a   :  { %10960 = vmatpush3.bf16.msra.mxu0 %v12060_v4  ;;  %v12098_v4 = vld [vmem:[%s14597_s3 + $0x2a0] sm:$0xff]  }
 0x74b   :  { %10961 = vmatprep.subr.bf16.mxu0 %v12278_v35 }
 0x74e   :  { %10962 = vmatpush3.bf16.msra.mxu0 %v12061_v5  ;;  %v12099_v5 = vld [vmem:[%s14597_s3 + $0x2a8] sm:$0xff]  }
 0x74f   :  { %10975 = vmatprep.subr.bf16.mxu0 %v12278_v35 }
 0x751   :  { %10964 = vmatmul.mubr.bf16.vlgmr.msra.gmra.mrb[88].mxu0 %v4074_v9  ;;  %v11197_v9 = vpop.f32.mrb[57].mxu1 }
 0x752   :  { %10976 = vmatpush3.bf16.msra.mxu0 %v12062_v11  ;;  %10991 = vmatprep.mubr.msk.bf16.mxu0 %vm12279_vm1, %v12278_v35  ;;  %v5439_v10 = vpop.f32.mrb[58].mxu1  ;;  %v4834_v11 = vpack.c.bf16 %v13556_v19, %v13556_v19  ;;  %v12108_v19 = vld [vmem:[%s14597_s3 + $0x2f0] sm:$0xff]  }
 0x753   :  { %10977 = vmatprep.subr.bf16.mxu0 %v12278_v35 }
 0x756   :  { %10978 = vmatpush3.bf16.msra.mxu0 %v12063_v12  ;;  %v11198_v12 = vpop.f32.mrb[59].mxu1 }
 0x757   :  { %10979 = vmatprep.subr.bf16.mxu0 %v12278_v35 }
 0x75a   :  { %10980 = vmatpush3.bf16.msra.mxu0 %v12064_v13  ;;  %v12102_v13 = vld [vmem:[%s14597_s3 + $0x2c0] sm:$0xff]  }
 0x75b   :  { %10981 = vmatprep.subr.bf16.mxu0 %v12278_v35 }
 0x75e   :  { %10982 = vmatpush3.bf16.msra.mxu0 %v12065_v14  ;;  %v12103_v14 = vld [vmem:[%s14597_s3 + $0x2c8] sm:$0xff]  }
 0x75f   :  { %10983 = vmatprep.subr.bf16.mxu0 %v12278_v35 }
 0x762   :  { %10984 = vmatpush3.bf16.msra.mxu0 %v12066_v15  ;;  %v12104_v15 = vld [vmem:[%s14597_s3 + $0x2d0] sm:$0xff]  }
 0x763   :  { %10985 = vmatprep.subr.bf16.mxu0 %v12278_v35 }
 0x766   :  { %10986 = vmatpush3.bf16.msra.mxu0 %v12067_v16  ;;  %v12105_v16 = vld [vmem:[%s14597_s3 + $0x2d8] sm:$0xff]  }
 0x767   :  { %10987 = vmatprep.subr.bf16.mxu0 %v12278_v35 }
 0x76a   :  { %10988 = vmatpush3.bf16.msra.mxu0 %v12068_v17  ;;  %v12106_v17 = vld [vmem:[%s14597_s3 + $0x2e0] sm:$0xff]  }
 0x76b   :  { %10989 = vmatprep.subr.bf16.mxu0 %v12278_v35 }
 0x76e   :  { %10990 = vmatpush3.bf16.msra.mxu0 %v12069_v18  ;;  %v12107_v18 = vld [vmem:[%s14597_s3 + $0x2e8] sm:$0xff]  }
 0x76f   :  { %11003 = vmatprep.subr.bf16.mxu0 %v12278_v35 }
 0x771   :  { %10992 = vmatmul.mubr.bf16.vlgmr.msra.gmra.mrb[88].mxu0 %v4226_v24 }
 0x772   :  { %11004 = vmatpush3.bf16.msra.mxu0 %v12070_v26  ;;  %11019 = vmatprep.mubr.msk.bf16.mxu0 %vm12279_vm1, %v12278_v35  ;;  %v4986_v26 = vpack.c.bf16 %v13594_v34, %v13594_v34  ;;  %v12116_v34 = vld [vmem:[%s14597_s3 + $0x330] sm:$0xff]  }
 0x773   :  { %11005 = vmatprep.subr.bf16.mxu0 %v12278_v35 }
 0x776   :  { %11006 = vmatpush3.bf16.msra.mxu0 %v12071_v27 }
 0x777   :  { %11007 = vmatprep.subr.bf16.mxu0 %v12278_v35 }
 0x77a   :  { %11008 = vmatpush3.bf16.msra.mxu0 %v12072_v28  ;;  %v12110_v28 = vld [vmem:[%s14597_s3 + $0x300] sm:$0xff]  }
 0x77b   :  { %11009 = vmatprep.subr.bf16.mxu0 %v12278_v35 }
 0x77e   :  { %11010 = vmatpush3.bf16.msra.mxu0 %v12073_v29  ;;  %v12111_v29 = vld [vmem:[%s14597_s3 + $0x308] sm:$0xff]  }
 0x77f   :  { %11011 = vmatprep.subr.bf16.mxu0 %v12278_v35 }
 0x782   :  { %11012 = vmatpush3.bf16.msra.mxu0 %v12074_v30  ;;  %v12112_v30 = vld [vmem:[%s14597_s3 + $0x310] sm:$0xff]  }
 0x783   :  { %11013 = vmatprep.subr.bf16.mxu0 %v12278_v35 }
 0x786   :  { %11014 = vmatpush3.bf16.msra.mxu0 %v12075_v31  ;;  %v12113_v31 = vld [vmem:[%s14597_s3 + $0x318] sm:$0xff]  }
 0x787   :  { %11015 = vmatprep.subr.bf16.mxu0 %v12278_v35 }
 0x78a   :  { %11016 = vmatpush3.bf16.msra.mxu0 %v12076_v32  ;;  %v12114_v32 = vld [vmem:[%s14597_s3 + $0x320] sm:$0xff]  }
 0x78b   :  { %11017 = vmatprep.subr.bf16.mxu0 %v12278_v35 }
 0x78c   :  { %v13746_v21 = vpop.f32.mrb[60].mxu1 }
 0x78d   :  { %v11225_v24 = vpop.f32.mrb[61].mxu1 }
 0x78e   :  { %11018 = vmatpush3.bf16.msra.mxu0 %v12077_v33  ;;  %v5591_v25 = vpop.f32.mrb[62].mxu1  ;;  %v12115_v33 = vld [vmem:[%s14597_s3 + $0x328] sm:$0xff]  }
 0x78f   :  { %11031 = vmatprep.subr.bf16.mxu0 %v12278_v35  ;;  %v11226_v27 = vpop.f32.mrb[63].mxu1 }
 0x791   :  { %11020 = vmatmul.mubr.bf16.vlgmr.msra.gmra.mrb[88].mxu0 %v4378_v40  ;;  %v12118_v40 = vld [vmem:[%s14597_s3 + $0x340] sm:$0xff]  }
 0x792   :  { %11032 = vmatpush3.bf16.msra.mxu0 %v12078_v42  ;;  %11047 = vmatprep.mubr.msk.bf16.mxu0 %vm12279_vm1, %v12278_v35  ;;  %v12120_v42 = vld [vmem:[%s14597_s3 + $0x350] sm:$0xff]  }
 0x793   :  { %11033 = vmatprep.subr.bf16.mxu0 %v12278_v35 }
 0x796   :  { %11034 = vmatpush3.bf16.msra.mxu0 %v12079_v43  ;;  %v12121_v43 = vld [vmem:[%s14597_s3 + $0x358] sm:$0xff]  }
 0x797   :  { %11035 = vmatprep.subr.bf16.mxu0 %v12278_v35 }
 0x79a   :  { %11036 = vmatpush3.bf16.msra.mxu0 %v12080_v44  ;;  %v12122_v44 = vld [vmem:[%s14597_s3 + $0x360] sm:$0xff]  }
 0x79b   :  { %11037 = vmatprep.subr.bf16.mxu0 %v12278_v35 }
 0x79e   :  { %11038 = vmatpush3.bf16.msra.mxu0 %v12081_v45  ;;  %v12123_v45 = vld [vmem:[%s14597_s3 + $0x368] sm:$0xff]  }
 0x79f   :  { %11039 = vmatprep.subr.bf16.mxu0 %v12278_v35 }
 0x7a2   :  { %11040 = vmatpush3.bf16.msra.mxu0 %v12082_v46  ;;  %v12124_v46 = vld [vmem:[%s14597_s3 + $0x370] sm:$0xff]  }
 0x7a3   :  { %11041 = vmatprep.subr.bf16.mxu0 %v12278_v35 }
 0x7a6   :  { %11042 = vmatpush3.bf16.msra.mxu0 %v12083_v47  ;;  %v12125_v47 = vld [vmem:[%s14597_s3 + $0x378] sm:$0xff]  }
 0x7a7   :  { %11043 = vmatprep.subr.bf16.mxu0 %v12278_v35 }
 0x7aa   :  { %11044 = vmatpush3.bf16.msra.mxu0 %v12084_v48  ;;  %v5290_v48 = vpack.c.bf16 %v13670_v50, %v13670_v50  ;;  %v12139_v50 = vld [vmem:[%s14597_s3 + $0x3e8] sm:$0xff]  }
 0x7ab   :  { %11045 = vmatprep.subr.bf16.mxu0 %v12278_v35 }
 0x7ae   :  { %11046 = vmatpush3.bf16.msra.mxu0 %v12085_v49  ;;  %v12126_v49 = vld [vmem:[%s14597_s3 + $0x380] sm:$0xff]  }
 0x7af   :  { %11059 = vmatprep.subr.bf16.mxu0 %v12278_v35 }
 0x7b1   :  { %11048 = vmatmul.mubr.bf16.vlgmr.msra.gmra.mrb[88].mxu0 %v4530_v52  ;;  %v12130_v52 = vld [vmem:[%s14597_s3 + $0x3a0] sm:$0xff]  }
 0x7b2   :  { %11060 = vmatpush3.bf16.msra.mxu0 %v12086_v53  ;;  %11075 = vmatprep.mubr.msk.bf16.mxu0 %vm12279_vm1, %v12278_v35  ;;  %v12132_v53 = vld [vmem:[%s14597_s3 + $0x3b0] sm:$0xff]  }
 0x7b3   :  { %11061 = vmatprep.subr.bf16.mxu0 %v12278_v35 }
 0x7b6   :  { %11062 = vmatpush3.bf16.msra.mxu0 %v12087_v61  ;;  %v12133_v61 = vld [vmem:[%s14597_s3 + $0x3b8] sm:$0xff]  }
 0x7b7   :  { %11063 = vmatprep.subr.bf16.mxu0 %v12278_v35 }
 0x7ba   :  { %11064 = vmatpush3.bf16.msra.mxu0 %v12088_v54  ;;  %v5442_v54 = vpack.c.bf16 %v13708_v8, %v13708_v8 }
 0x7bb   :  { %11065 = vmatprep.subr.bf16.mxu0 %v12278_v35 }
 0x7be   :  { %11066 = vmatpush3.bf16.msra.mxu0 %v12089_v55  ;;  %v12134_v55 = vld [vmem:[%s14597_s3 + $0x3c0] sm:$0xff]  }
 0x7bf   :  { %11067 = vmatprep.subr.bf16.mxu0 %v12278_v35 }
 0x7c2   :  { %11068 = vmatpush3.bf16.msra.mxu0 %v12090_v62  ;;  %v12135_v62 = vld [vmem:[%s14597_s3 + $0x3c8] sm:$0xff]  }
 0x7c3   :  { %11069 = vmatprep.subr.bf16.mxu0 %v12278_v35 }
 0x7c6   :  { %11070 = vmatpush3.bf16.msra.mxu0 %v12091_v56  ;;  %v12136_v56 = vld [vmem:[%s14597_s3 + $0x3d0] sm:$0xff]  }
 0x7c7   :  { %11071 = vmatprep.subr.bf16.mxu0 %v12278_v35 }
 0x7ca   :  { %11072 = vmatpush3.bf16.msra.mxu0 %v12092_v51  ;;  %v12137_v51 = vld [vmem:[%s14597_s3 + $0x3d8] sm:$0xff]  }
 0x7cb   :  { %11073 = vmatprep.subr.bf16.mxu0 %v12278_v35 }
 0x7ce   :  { %11074 = vmatpush3.bf16.msra.mxu0 %v12093_v63  ;;  %v12138_v63 = vld [vmem:[%s14597_s3 + $0x3e0] sm:$0xff]  }
 0x7cf   :  { %11087 = vmatprep.subr.bf16.mxu0 %v12278_v35 }
 0x7d1   :  { %11076 = vmatmul.mubr.bf16.vlgmr.msra.gmra.mrb[88].mxu0 %v4682_v1  ;;  %v5594_v1 = vpack.c.bf16 %v13746_v21, %v13746_v21 }
 0x7d2   :  { %11088 = vmatpush3.bf16.msra.mxu0 %v12094_v59  ;;  %11103 = vmatprep.mubr.msk.bf16.mxu0 %vm12279_vm1, %v12278_v35 }
 0x7d3   :  { %11089 = vmatprep.subr.bf16.mxu0 %v12278_v35 }
 0x7d6   :  { %11090 = vmatpush3.bf16.msra.mxu0 %v12095_v0 }
 0x7d7   :  { %11091 = vmatprep.subr.bf16.mxu0 %v12278_v35 }
 0x7da   :  { %11092 = vmatpush3.bf16.msra.mxu0 %v12096_v60 }
 0x7db   :  { %11093 = vmatprep.subr.bf16.mxu0 %v12278_v35 }
 0x7de   :  { %11094 = vmatpush3.bf16.msra.mxu0 %v12097_v3 }
 0x7df   :  { %11095 = vmatprep.subr.bf16.mxu0 %v12278_v35 }
 0x7e2   :  { %11096 = vmatpush3.bf16.msra.mxu0 %v12098_v4 }
 0x7e3   :  { %11097 = vmatprep.subr.bf16.mxu0 %v12278_v35 }
 0x7e6   :  { %11098 = vmatpush3.bf16.msra.mxu0 %v12099_v5 }
 0x7e7   :  { %11099 = vmatprep.subr.bf16.mxu0 %v12278_v35 }
 0x7ea   :  { %11100 = vmatpush3.bf16.msra.mxu0 %v12100_v6 }
 0x7eb   :  { %11101 = vmatprep.subr.bf16.mxu0 %v12278_v35 }
 0x7ee   :  { %11102 = vmatpush3.bf16.msra.mxu0 %v12101_v7 }
 0x7ef   :  { %11115 = vmatprep.subr.bf16.mxu0 %v12278_v35 }
 0x7f1   :  { %11104 = vmatmul.mubr.bf16.vlgmr.msra.gmra.mrb[88].mxu0 %v4834_v11 }
 0x7f2   :  { %11116 = vmatpush3.bf16.msra.mxu0 %v12102_v13  ;;  %11131 = vmatprep.mubr.msk.bf16.mxu0 %vm12279_vm1, %v12278_v35 }
 0x7f3   :  { %11117 = vmatprep.subr.bf16.mxu0 %v12278_v35 }
 0x7f6   :  { %11118 = vmatpush3.bf16.msra.mxu0 %v12103_v14 }
 0x7f7   :  { %11119 = vmatprep.subr.bf16.mxu0 %v12278_v35 }
 0x7fa   :  { %11120 = vmatpush3.bf16.msra.mxu0 %v12104_v15 }
 0x7fb   :  { %11121 = vmatprep.subr.bf16.mxu0 %v12278_v35 }
 0x7fe   :  { %11122 = vmatpush3.bf16.msra.mxu0 %v12105_v16 }
 0x7ff   :  { %11123 = vmatprep.subr.bf16.mxu0 %v12278_v35 }
 0x802   :  { %11124 = vmatpush3.bf16.msra.mxu0 %v12106_v17 }
 0x803   :  { %11125 = vmatprep.subr.bf16.mxu0 %v12278_v35 }
 0x806   :  { %11126 = vmatpush3.bf16.msra.mxu0 %v12107_v18 }
 0x807   :  { %11127 = vmatprep.subr.bf16.mxu0 %v12278_v35 }
 0x80a   :  { %11128 = vmatpush3.bf16.msra.mxu0 %v12108_v19 }
 0x80b   :  { %11129 = vmatprep.subr.bf16.mxu0 %v12278_v35 }
 0x80e   :  { %11130 = vmatpush3.bf16.msra.mxu0 %v12109_v20 }
 0x80f   :  { %11143 = vmatprep.subr.bf16.mxu0 %v12278_v35 }
 0x811   :  { %11132 = vmatmul.mubr.bf16.vlgmr.msra.gmra.mrb[88].mxu0 %v4986_v26 }
 0x812   :  { %11144 = vmatpush3.bf16.msra.mxu0 %v12110_v28  ;;  %11159 = vmatprep.mubr.msk.bf16.mxu0 %vm12279_vm1, %v12278_v35 }
 0x813   :  { %11145 = vmatprep.subr.bf16.mxu0 %v12278_v35 }
 0x816   :  { %11146 = vmatpush3.bf16.msra.mxu0 %v12111_v29  ;;  %v5726_v29 = vld [vmem:[%s14600_s7] sm:$0x1] }
 0x817   :  { %11147 = vmatprep.subr.bf16.mxu0 %v12278_v35 }
 0x81a   :  { %11148 = vmatpush3.bf16.msra.mxu0 %v12112_v30  ;;  %v9262_v30 = vld [vmem:[%s14600_s7 + $0x9] sm:$0x1] }
 0x81b   :  { %11149 = vmatprep.subr.bf16.mxu0 %v12278_v35 }
 0x81e   :  { %11150 = vmatpush3.bf16.msra.mxu0 %v12113_v31 }
 0x81f   :  { %11151 = vmatprep.subr.bf16.mxu0 %v12278_v35 }
 0x822   :  { %11152 = vmatpush3.bf16.msra.mxu0 %v12114_v32  ;;  %v9046_v32 = vld [vmem:[%s14600_s7 + $0x1] sm:$0x1] }
 0x823   :  { %11153 = vmatprep.subr.bf16.mxu0 %v12278_v35 }
 0x826   :  { %11154 = vmatpush3.bf16.msra.mxu0 %v12115_v33  ;;  %v9288_v33 = vld [vmem:[%s14600_s7 + $0xa] sm:$0x1] }
 0x827   :  { %11155 = vmatprep.subr.bf16.mxu0 %v12278_v35 }
 0x82a   :  { %11156 = vmatpush3.bf16.msra.mxu0 %v12116_v34  ;;  %v12142_v34 = vld [vmem:[%s14599_s4 + $0x40] sm:$0xff]  }
 0x82b   :  { %11157 = vmatprep.subr.bf16.mxu0 %v12278_v35 }
 0x82e   :  { %11158 = vmatpush3.bf16.msra.mxu0 %v12117_v38  ;;  %v12143_v38 = vld [vmem:[%s14599_s4 + $0x48] sm:$0xff]  }
 0x82f   :  { %11171 = vmatprep.subr.bf16.mxu0 %v12278_v35 }
 0x831   :  { %11160 = vmatmul.mubr.bf16.vlgmr.msra.gmra.mrb[88].mxu0 %v5138_v39  ;;  %v9314_v39 = vld [vmem:[%s14600_s7 + $0xb] sm:$0x1] }
 0x832   :  { %11172 = vmatpush3.bf16.msra.mxu0 %v12118_v40  ;;  %11187 = vmatprep.mubr.msk.bf16.mxu0 %vm12279_vm1, %v12278_v35  ;;  %v12144_v40 = vld [vmem:[%s14599_s4 + $0x50] sm:$0xff]  }
 0x833   :  { %11173 = vmatprep.subr.bf16.mxu0 %v12278_v35 }
 0x836   :  { %11174 = vmatpush3.bf16.msra.mxu0 %v12119_v41  ;;  %v12145_v41 = vld [vmem:[%s14599_s4 + $0x58] sm:$0xff]  }
 0x837   :  { %11175 = vmatprep.subr.bf16.mxu0 %v12278_v35 }
 0x83a   :  { %11176 = vmatpush3.bf16.msra.mxu0 %v12120_v42  ;;  %v9340_v42 = vld [vmem:[%s14600_s7 + $0xc] sm:$0x1] }
 0x83b   :  { %11177 = vmatprep.subr.bf16.mxu0 %v12278_v35 }
 0x83e   :  { %11178 = vmatpush3.bf16.msra.mxu0 %v12121_v43  ;;  %v12146_v43 = vld [vmem:[%s14599_s4 + $0x60] sm:$0xff]  }
 0x83f   :  { %11179 = vmatprep.subr.bf16.mxu0 %v12278_v35 }
 0x842   :  { %11180 = vmatpush3.bf16.msra.mxu0 %v12122_v44  ;;  %v12147_v44 = vld [vmem:[%s14599_s4 + $0x68] sm:$0xff]  }
 0x843   :  { %11181 = vmatprep.subr.bf16.mxu0 %v12278_v35 }
 0x846   :  { %11182 = vmatpush3.bf16.msra.mxu0 %v12123_v45  ;;  %v9366_v45 = vld [vmem:[%s14600_s7 + $0xd] sm:$0x1] }
 0x847   :  { %11183 = vmatprep.subr.bf16.mxu0 %v12278_v35 }
 0x84a   :  { %11184 = vmatpush3.bf16.msra.mxu0 %v12124_v46  ;;  %v9392_v46 = vld [vmem:[%s14600_s7 + $0xe] sm:$0x1] }
 0x84b   :  { %11185 = vmatprep.subr.bf16.mxu0 %v12278_v35 }
 0x84e   :  { %11186 = vmatpush3.bf16.msra.mxu0 %v12125_v47  ;;  %v12148_v47 = vld [vmem:[%s14599_s4 + $0x70] sm:$0xff]  }
 0x84f   :  { %11199 = vmatprep.subr.bf16.mxu0 %v12278_v35 }
 0x851   :  { %11188 = vmatmul.mubr.bf16.vlgmr.msra.gmra.mrb[88].mxu0 %v5290_v48  ;;  %v12149_v48 = vld [vmem:[%s14599_s4 + $0x78] sm:$0xff]  }
 0x852   :  { %11200 = vmatpush3.bf16.msra.mxu0 %v12126_v49  ;;  %11215 = vmatprep.mubr.msk.bf16.mxu0 %vm12279_vm1, %v12278_v35 }
 0x853   :  { %11201 = vmatprep.subr.bf16.mxu0 %v12278_v35 }
 0x856   :  { %11202 = vmatpush3.bf16.msra.mxu0 %v12127_v23 }
 0x857   :  { %11203 = vmatprep.subr.bf16.mxu0 %v12278_v35 }
 0x85a   :  { %11204 = vmatpush3.bf16.msra.mxu0 %v12128_v22 }
 0x85b   :  { %11205 = vmatprep.subr.bf16.mxu0 %v12278_v35 }
 0x85e   :  { %11206 = vmatpush3.bf16.msra.mxu0 %v12129_v37 }
 0x85f   :  { %11207 = vmatprep.subr.bf16.mxu0 %v12278_v35 }
 0x862   :  { %11208 = vmatpush3.bf16.msra.mxu0 %v12130_v52 }
 0x863   :  { %11209 = vmatprep.subr.bf16.mxu0 %v12278_v35 }
 0x866   :  { %11210 = vmatpush3.bf16.msra.mxu0 %v12131_v36  ;;  %v12150_v36 = vld [vmem:[%s14599_s4] sm:$0xff]  }
 0x867   :  { %11211 = vmatprep.subr.bf16.mxu0 %v12278_v35 }
 0x86a   :  { %11212 = vmatpush3.bf16.msra.mxu0 %v12132_v53 }
 0x86b   :  { %11213 = vmatprep.subr.bf16.mxu0 %v12278_v35 }
 0x86e   :  { %11214 = vmatpush3.bf16.msra.mxu0 %v12133_v61 }
 0x86f   :  { %11227 = vmatprep.subr.bf16.mxu0 %v12278_v35 }
 0x871   :  { %11216 = vmatmul.mubr.bf16.vlgmr.msra.gmra.mrb[88].mxu0 %v5442_v54 }
 0x872   :  { %11228 = vmatpush3.bf16.msra.mxu0 %v12134_v55  ;;  %11243 = vmatprep.mubr.msk.bf16.mxu0 %vm12279_vm1, %v12278_v35 }
 0x873   :  { %11229 = vmatprep.subr.bf16.mxu0 %v12278_v35 }
 0x876   :  { %11230 = vmatpush3.bf16.msra.mxu0 %v12135_v62  ;;  %v12151_v62 = vld [vmem:[%s14599_s4 + $0x8] sm:$0xff]  }
 0x877   :  { %11231 = vmatprep.subr.bf16.mxu0 %v12278_v35 }
 0x87a   :  { %11232 = vmatpush3.bf16.msra.mxu0 %v12136_v56  ;;  %v12152_v56 = vld [vmem:[%s14599_s4 + $0x10] sm:$0xff]  }
 0x87b   :  { %11233 = vmatprep.subr.bf16.mxu0 %v12278_v35 }
 0x87e   :  { %11234 = vmatpush3.bf16.msra.mxu0 %v12137_v51  ;;  %v12153_v51 = vld [vmem:[%s14599_s4 + $0x18] sm:$0xff]  }
 0x87f   :  { %11235 = vmatprep.subr.bf16.mxu0 %v12278_v35 }
 0x882   :  { %11236 = vmatpush3.bf16.msra.mxu0 %v12138_v63  ;;  %v12154_v63 = vld [vmem:[%s14599_s4 + $0x20] sm:$0xff]  }
 0x883   :  { %11237 = vmatprep.subr.bf16.mxu0 %v12278_v35 }
 0x886   :  { %11238 = vmatpush3.bf16.msra.mxu0 %v12139_v50  ;;  %v12155_v50 = vld [vmem:[%s14599_s4 + $0x28] sm:$0xff]  }
 0x887   :  { %11239 = vmatprep.subr.bf16.mxu0 %v12278_v35 }
 0x88a   :  { %11240 = vmatpush3.bf16.msra.mxu0 %v12140_v57  ;;  %v12156_v57 = vld [vmem:[%s14599_s4 + $0x30] sm:$0xff]  }
 0x88b   :  { %11241 = vmatprep.subr.bf16.mxu0 %v12278_v35 }
 0x88e   :  { %11242 = vmatpush3.bf16.msra.mxu0 %v12141_v2  ;;  %v12157_v2 = vld [vmem:[%s14599_s4 + $0x38] sm:$0xff]  }
 0x88f   :  { %11481 = vmatprep.subr.bf16.mxu0 %v12278_v35 }
 0x891   :  { %11244 = vmatmul.mubr.bf16.vlgmr.msra.gmra.mrb[88].mxu0 %v5594_v1 }
 0x892   :  { %11483 = vmatprep.mubr.msk.bf16.mxu0 %vm12279_vm1, %v12278_v35 }
 0x964   :  { %v5694_v58 = vpop.f32.mrb[88].mxu0 }
 0x965   :  { %v5701_v59 = vrot.slane %v5694_v58, 4  ;;  %v11245_v0 = vpop.f32.mrb[89].mxu0 }
 0x966   :  { %v5697_v60 = vpop.f32.mrb[90].mxu0  ;;  %v12159_v0 = vld [vmem:[%s14599_s4 + $0x88] sm:$0xff]  }
 0x967   :  { %v5702_v3 = vadd.f32 %v5701_v59, %v5694_v58  ;;  %v11246_v4 = vpop.f32.mrb[91].mxu0  ;;  %v12158_v59 = vld [vmem:[%s14599_s4 + $0x80] sm:$0xff]   ;;  %v12160_v60 = vld [vmem:[%s14599_s4 + $0x90] sm:$0xff]  }
 0x968   :  { %v12162_v4 = vld [vmem:[%s14599_s4 + $0xa0] sm:$0xff]  }
 0x969   :  { %v5703_v5 = vrot.slane %v5702_v3, 2 }
 0x96b   :  { %v5704_v6 = vadd.f32 %v5703_v5, %v5702_v3  ;;  %v12161_v3 = vld [vmem:[%s14599_s4 + $0x98] sm:$0xff]   ;;  %v12163_v5 = vld [vmem:[%s14599_s4 + $0xa8] sm:$0xff]  }
 0x96d   :  { %v5705_v7 = vrot.slane %v5704_v6, 1 }
 0x96f   :  { %v5706_v8 = vadd.f32 %v5705_v7, %v5704_v6  ;;  %v12164_v6 = vld [vmem:[%s14599_s4 + $0xb0] sm:$0xff]   ;;  %v12165_v7 = vld [vmem:[%s14599_s4 + $0xb8] sm:$0xff]  }
 0x971   :  { %v5708_v9 = vmul.f32 0.125, %v5706_v8 }
 0x973   :  { %v5709_v10 = vsub.f32 %v5694_v58, %v5708_v9 }
 0x975   :  { %v5710_v11 = vmul.f32 %v5709_v10, %v5709_v10 }
 0x977   :  { %v5711_v12 = vrot.slane %v5710_v11, 4 }
 0x979   :  { %v5712_v13 = vadd.f32 %v5711_v12, %v5710_v11 }
 0x97b   :  { %v5713_v14 = vrot.slane %v5712_v13, 2 }
 0x97d   :  { %v5714_v15 = vadd.f32 %v5713_v14, %v5712_v13  ;;  %v9106_v13 = vld [vmem:[%s14600_s7 + $0x3] sm:$0x1] }
 0x97e   :  { %v12166_v14 = vld [vmem:[%s14599_s4 + $0xc0] sm:$0xff]  }
 0x97f   :  { %v5715_v16 = vrot.slane %v5714_v15, 1 }
 0x981   :  { %v5716_v17 = vadd.f32 %v5715_v16, %v5714_v15  ;;  %v12167_v15 = vld [vmem:[%s14599_s4 + $0xc8] sm:$0xff]   ;;  %v12168_v16 = vld [vmem:[%s14599_s4 + $0xd0] sm:$0xff]  }
 0x983   :  { %v5717_v18 = vmul.f32 0.125, %v5716_v17  ;;  %v12169_v17 = vld [vmem:[%s14599_s4 + $0xd8] sm:$0xff]  }
 0x985   :  { %v5718_v19 = vadd.f32 1e-05, %v5717_v18  ;;  %v12170_v18 = vld [vmem:[%s14599_s4 + $0xe0] sm:$0xff]  }
 0x987   :  { %12272 = vrsqrt.f32 %v5718_v19  ;;  %v12171_v19 = vld [vmem:[%s14599_s4 + $0xe8] sm:$0xff]  }
 0x991   :  { %v12273_v20 = vpop.eup %12272 }
 0x992   :  { %v5720_v21 = vmul.f32 %v12273_v20, %v5694_v58  ;;  %v5721_v24 = vmul.f32 %v12273_v20, %v5708_v9  ;;  %v9080_v58 = vld [vmem:[%s14600_s7 + $0x2] sm:$0x1]  ;;  %v12172_v20 = vld [vmem:[%s14599_s4 + $0xf0] sm:$0xff]  }
 0x994   :  { %v5722_v25 = vsub.f32 %v5720_v21, %v5721_v24  ;;  %v12173_v21 = vld [vmem:[%s14599_s4 + $0xf8] sm:$0xff]  }
 0x996   :  { %v5723_v26 = vmul.f32 0.2, %v5722_v25 }
 0x998   :  { %v5724_v27 = vmax.f32 %v5722_v25, %v5723_v26 }
 0x99a   :  { %v5725_v28 = vpack.c.bf16 %v5724_v27, %v5724_v27 }
 0x99c   :  { %v13904_v31 = vsel %vm5731_vm3, %v5725_v28, 0 }
 0x99d   :  { %11248 = vmatpush3.bf16.msra.mxu1 %v13904_v31  ;;  %11482 = vmatpush3.bf16.msra.mxu0 %v13904_v31 }
 0x99e   :  { %11253 = vmatprep.subr.bf16.mxu1 %v12278_v35  ;;  %11507 = vmatprep.subr.bf16.mxu0 %v12278_v35 }
 0x9a0   :  { %11250 = vmatmul.mubr.msk.bf16.vlgmr.msra.gmra.mrb[64].mxu1 %vm5727_vm4, %v5726_v29  ;;  %11484 = vmatmul.mubr.msk.bf16.vlgmr.msra.gmra.mrb[92].mxu0 %vm5727_vm4, %v9262_v30  ;;  %v9132_v29 = vld [vmem:[%s14600_s7 + $0x4] sm:$0x1] }
 0x9a1   :  { %11254 = vmatpush3.bf16.msra.mxu1 %v13904_v31  ;;  %11508 = vmatpush3.bf16.msra.mxu0 %v13904_v31  ;;  %v12174_v30 = vld [vmem:[%s14599_s4 + $0x100] sm:$0xff]  }
 0x9a2   :  { %11255 = vmatprep.mubr.msk.bf16.mxu1 %vm12279_vm1, %v12278_v35  ;;  %11509 = vmatprep.mubr.msk.bf16.mxu0 %vm12279_vm1, %v12278_v35 }
 0x9a3   :  { %11533 = vmatprep.subr.bf16.mxu0 %v12278_v35  ;;  %11259 = vmatprep.subr.bf16.mxu1 %v12278_v35 }
 0x9a8   :  { %11256 = vmatmul.mubr.msk.bf16.vlgmr.msra.gmra.mrb[68].mxu1 %vm5727_vm4, %v9046_v32  ;;  %11510 = vmatmul.mubr.msk.bf16.vlgmr.msra.gmra.mrb[96].mxu0 %vm5727_vm4, %v9288_v33  ;;  %v12175_v32 = vld [vmem:[%s14599_s4 + $0x108] sm:$0xff]   ;;  %v12176_v33 = vld [vmem:[%s14599_s4 + $0x110] sm:$0xff]  }
 0x9a9   :  { %11534 = vmatpush3.bf16.msra.mxu0 %v13904_v31  ;;  %11535 = vmatprep.mubr.msk.bf16.mxu0 %vm12279_vm1, %v12278_v35 }
 0x9aa   :  { %11559 = vmatprep.subr.bf16.mxu0 %v12278_v35  ;;  %11260 = vmatpush3.bf16.msra.mxu1 %v12142_v34  ;;  %v12177_v34 = vld [vmem:[%s14599_s4 + $0x118] sm:$0xff]  }
 0x9ab   :  { %11261 = vmatprep.subr.bf16.mxu1 %v12278_v35  ;;  %11275 = vmatprep.mubr.msk.bf16.mxu1 %vm12279_vm1, %v12278_v35 }
 0x9ae   :  { %11262 = vmatpush3.bf16.msra.mxu1 %v12143_v38  ;;  %v12178_v38 = vld [vmem:[%s14599_s4 + $0x120] sm:$0xff]  }
 0x9af   :  { %11263 = vmatprep.subr.bf16.mxu1 %v12278_v35 }
 0x9b0   :  { %11536 = vmatmul.mubr.msk.bf16.vlgmr.msra.gmra.mrb[100].mxu0 %vm5727_vm4, %v9314_v39  ;;  %v12179_v39 = vld [vmem:[%s14599_s4 + $0x128] sm:$0xff]  }
 0x9b1   :  { %11560 = vmatpush3.bf16.msra.mxu0 %v13904_v31  ;;  %11561 = vmatprep.mubr.msk.bf16.mxu0 %vm12279_vm1, %v12278_v35 }
 0x9b2   :  { %11585 = vmatprep.subr.bf16.mxu0 %v12278_v35  ;;  %11264 = vmatpush3.bf16.msra.mxu1 %v12144_v40  ;;  %v12180_v40 = vld [vmem:[%s14599_s4 + $0x130] sm:$0xff]  }
 0x9b3   :  { %11265 = vmatprep.subr.bf16.mxu1 %v12278_v35 }
 0x9b6   :  { %11266 = vmatpush3.bf16.msra.mxu1 %v12145_v41  ;;  %v12181_v41 = vld [vmem:[%s14599_s4 + $0x138] sm:$0xff]  }
 0x9b7   :  { %11267 = vmatprep.subr.bf16.mxu1 %v12278_v35 }
 0x9b8   :  { %11562 = vmatmul.mubr.msk.bf16.vlgmr.msra.gmra.mrb[104].mxu0 %vm5727_vm4, %v9340_v42 }
 0x9b9   :  { %11586 = vmatpush3.bf16.msra.mxu0 %v13904_v31  ;;  %11587 = vmatprep.mubr.msk.bf16.mxu0 %vm12279_vm1, %v12278_v35 }
 0x9ba   :  { %11611 = vmatprep.subr.bf16.mxu0 %v12278_v35  ;;  %11268 = vmatpush3.bf16.msra.mxu1 %v12146_v43 }
 0x9bb   :  { %11269 = vmatprep.subr.bf16.mxu1 %v12278_v35 }
 0x9be   :  { %11270 = vmatpush3.bf16.msra.mxu1 %v12147_v44 }
 0x9bf   :  { %11271 = vmatprep.subr.bf16.mxu1 %v12278_v35 }
 0x9c0   :  { %11588 = vmatmul.mubr.msk.bf16.vlgmr.msra.gmra.mrb[108].mxu0 %vm5727_vm4, %v9366_v45 }
 0x9c1   :  { %11612 = vmatpush3.bf16.msra.mxu0 %v13904_v31  ;;  %11613 = vmatprep.mubr.msk.bf16.mxu0 %vm12279_vm1, %v12278_v35 }
 0x9c2   :  { %11637 = vmatprep.subr.bf16.mxu0 %v12278_v35  ;;  %11272 = vmatpush3.bf16.msra.mxu1 %v12148_v47  ;;  %v9158_v47 = vld [vmem:[%s14600_s7 + $0x5] sm:$0x1] }
 0x9c3   :  { %11273 = vmatprep.subr.bf16.mxu1 %v12278_v35 }
 0x9c6   :  { %11274 = vmatpush3.bf16.msra.mxu1 %v12149_v48  ;;  %v12182_v48 = vld [vmem:[%s14599_s4 + $0x140] sm:$0xff]  }
 0x9c7   :  { %11279 = vmatprep.subr.bf16.mxu1 %v12278_v35 }
 0x9c8   :  { %11614 = vmatmul.mubr.msk.bf16.vlgmr.msra.gmra.mrb[112].mxu0 %vm5727_vm4, %v9392_v46 }
 0x9c9   :  { %11638 = vmatpush3.bf16.msra.mxu0 %v13904_v31  ;;  %11639 = vmatprep.mubr.msk.bf16.mxu0 %vm12279_vm1, %v12278_v35 }
 0xa73   :  { %v5769_v49 = vpop.f32.mrb[64].mxu1 }
 0xa74   :  { %v11251_v23 = vpop.f32.mrb[65].mxu1  ;;  %v5775_v1 = vpack.c.bf16 %v5769_v49, %v5769_v49  ;;  %v12183_v49 = vld [vmem:[%s14599_s4 + $0x148] sm:$0xff]  }
 0xa75   :  { %v5772_v22 = vpop.f32.mrb[66].mxu1  ;;  %v12184_v23 = vld [vmem:[%s14599_s4 + $0x150] sm:$0xff]  }
 0xa76   :  { %v11252_v37 = vpop.f32.mrb[67].mxu1  ;;  %v12185_v22 = vld [vmem:[%s14599_s4 + $0x158] sm:$0xff]  }
 0xa77   :  { %v12186_v37 = vld [vmem:[%s14599_s4 + $0x160] sm:$0xff]  }
 0xa7b   :  { %v5831_v52 = vpop.f32.mrb[68].mxu1 }
 0xa7c   :  { %v5837_v53 = vpack.c.bf16 %v5831_v52, %v5831_v52  ;;  %v11257_v61 = vpop.f32.mrb[69].mxu1  ;;  %v12187_v52 = vld [vmem:[%s14599_s4 + $0x168] sm:$0xff]  }
 0xa7d   :  { %v5834_v54 = vpop.f32.mrb[70].mxu1 }
 0xa7e   :  { %11276 = vmatmul.mubr.bf16.vlgmr.msra.gmra.mrb[72].mxu1 %v5837_v53  ;;  %v11258_v55 = vpop.f32.mrb[71].mxu1  ;;  %v12189_v53 = vld [vmem:[%s14599_s4 + $0x178] sm:$0xff]  }
 0xa7f   :  { %11280 = vmatpush3.bf16.msra.mxu1 %v12150_v36  ;;  %11295 = vmatprep.mubr.msk.bf16.mxu1 %vm12279_vm1, %v12278_v35  ;;  %v12188_v36 = vld [vmem:[%s14599_s4 + $0x170] sm:$0xff]  }
 0xa80   :  { %11281 = vmatprep.subr.bf16.mxu1 %v12278_v35 }
 0xa83   :  { %11282 = vmatpush3.bf16.msra.mxu1 %v12151_v62 }
 0xa84   :  { %11283 = vmatprep.subr.bf16.mxu1 %v12278_v35 }
 0xa87   :  { %11284 = vmatpush3.bf16.msra.mxu1 %v12152_v56 }
 0xa88   :  { %11285 = vmatprep.subr.bf16.mxu1 %v12278_v35 }
 0xa8b   :  { %11286 = vmatpush3.bf16.msra.mxu1 %v12153_v51  ;;  %v9184_v51 = vld [vmem:[%s14600_s7 + $0x6] sm:$0x1] }
 0xa8c   :  { %11287 = vmatprep.subr.bf16.mxu1 %v12278_v35 }
 0xa8f   :  { %11288 = vmatpush3.bf16.msra.mxu1 %v12154_v63  ;;  %v12190_v63 = vld [vmem:[%s14599_s4 + $0x180] sm:$0xff]  }
 0xa90   :  { %11289 = vmatprep.subr.bf16.mxu1 %v12278_v35 }
 0xa93   :  { %11290 = vmatpush3.bf16.msra.mxu1 %v12155_v50  ;;  %v12191_v50 = vld [vmem:[%s14599_s4 + $0x188] sm:$0xff]  }
 0xa94   :  { %11291 = vmatprep.subr.bf16.mxu1 %v12278_v35 }
 0xa97   :  { %11292 = vmatpush3.bf16.msra.mxu1 %v12156_v57  ;;  %v12192_v57 = vld [vmem:[%s14599_s4 + $0x190] sm:$0xff]  }
 0xa98   :  { %11293 = vmatprep.subr.bf16.mxu1 %v12278_v35 }
 0xa9b   :  { %11294 = vmatpush3.bf16.msra.mxu1 %v12157_v2  ;;  %v12193_v2 = vld [vmem:[%s14599_s4 + $0x198] sm:$0xff]  }
 0xa9c   :  { %11299 = vmatprep.subr.bf16.mxu1 %v12278_v35 }
 0xa9e   :  { %11296 = vmatmul.mubr.bf16.vlgmr.msra.gmra.mrb[72].mxu1 %v5775_v1  ;;  %v12194_v1 = vld [vmem:[%s14599_s4 + $0x1a0] sm:$0xff]  }
 0xa9f   :  { %11300 = vmatpush3.bf16.msra.mxu1 %v13904_v31  ;;  %11301 = vmatprep.mubr.msk.bf16.mxu1 %vm12279_vm1, %v12278_v35 }
 0xaa0   :  { %11305 = vmatprep.subr.bf16.mxu1 %v12278_v35 }
 0xaa6   :  { %11302 = vmatmul.mubr.msk.bf16.vlgmr.msra.gmra.mrb[76].mxu1 %vm5727_vm4, %v9080_v58  ;;  %v12195_v58 = vld [vmem:[%s14599_s4 + $0x1a8] sm:$0xff]  }
 0xaa7   :  { %11306 = vmatpush3.bf16.msra.mxu1 %v12158_v59  ;;  %11321 = vmatprep.mubr.msk.bf16.mxu1 %vm12279_vm1, %v12278_v35  ;;  %v12196_v59 = vld [vmem:[%s14599_s4 + $0x1b0] sm:$0xff]  }
 0xaa8   :  { %11307 = vmatprep.subr.bf16.mxu1 %v12278_v35 }
 0xaab   :  { %11308 = vmatpush3.bf16.msra.mxu1 %v12159_v0  ;;  %v12197_v0 = vld [vmem:[%s14599_s4 + $0x1b8] sm:$0xff]  }
 0xaac   :  { %11309 = vmatprep.subr.bf16.mxu1 %v12278_v35 }
 0xaaf   :  { %11310 = vmatpush3.bf16.msra.mxu1 %v12160_v60 }
 0xab0   :  { %11311 = vmatprep.subr.bf16.mxu1 %v12278_v35 }
 0xab3   :  { %11312 = vmatpush3.bf16.msra.mxu1 %v12161_v3 }
 0xab4   :  { %11313 = vmatprep.subr.bf16.mxu1 %v12278_v35 }
 0xab7   :  { %11314 = vmatpush3.bf16.msra.mxu1 %v12162_v4 }
 0xab8   :  { %11315 = vmatprep.subr.bf16.mxu1 %v12278_v35 }
 0xabb   :  { %11316 = vmatpush3.bf16.msra.mxu1 %v12163_v5 }
 0xabc   :  { %11317 = vmatprep.subr.bf16.mxu1 %v12278_v35 }
 0xabf   :  { %11318 = vmatpush3.bf16.msra.mxu1 %v12164_v6 }
 0xac0   :  { %11319 = vmatprep.subr.bf16.mxu1 %v12278_v35 }
 0xac3   :  { %11320 = vmatpush3.bf16.msra.mxu1 %v12165_v7  ;;  %v9210_v7 = vld [vmem:[%s14600_s7 + $0x7] sm:$0x1] }
 0xac4   :  { %11325 = vmatprep.subr.bf16.mxu1 %v12278_v35 }
 0xb79   :  { %v6070_v8 = vpop.f32.mrb[76].mxu1 }
 0xb7a   :  { %v6076_v9 = vpack.c.bf16 %v6070_v8, %v6070_v8  ;;  %v11303_v10 = vpop.f32.mrb[77].mxu1  ;;  %v12198_v8 = vld [vmem:[%s14599_s4 + $0x1c0] sm:$0xff]  }
 0xb7b   :  { %v6073_v11 = vpop.f32.mrb[78].mxu1  ;;  %v12200_v10 = vld [vmem:[%s14599_s4 + $0x1d0] sm:$0xff]  }
 0xb7c   :  { %11322 = vmatmul.mubr.bf16.vlgmr.msra.gmra.mrb[72].mxu1 %v6076_v9  ;;  %v11304_v12 = vpop.f32.mrb[79].mxu1  ;;  %v12199_v9 = vld [vmem:[%s14599_s4 + $0x1c8] sm:$0xff]   ;;  %v12201_v11 = vld [vmem:[%s14599_s4 + $0x1d8] sm:$0xff]  }
 0xb7d   :  { %11326 = vmatpush3.bf16.msra.mxu1 %v13904_v31  ;;  %11327 = vmatprep.mubr.msk.bf16.mxu1 %vm12279_vm1, %v12278_v35  ;;  %v12202_v12 = vld [vmem:[%s14599_s4 + $0x1e0] sm:$0xff]  }
 0xb7e   :  { %11331 = vmatprep.subr.bf16.mxu1 %v12278_v35 }
 0xb84   :  { %11328 = vmatmul.mubr.msk.bf16.vlgmr.msra.gmra.mrb[80].mxu1 %vm5727_vm4, %v9106_v13  ;;  %v12203_v13 = vld [vmem:[%s14599_s4 + $0x1e8] sm:$0xff]  }
 0xb85   :  { %11332 = vmatpush3.bf16.msra.mxu1 %v12166_v14  ;;  %11347 = vmatprep.mubr.msk.bf16.mxu1 %vm12279_vm1, %v12278_v35  ;;  %v12204_v14 = vld [vmem:[%s14599_s4 + $0x1f0] sm:$0xff]  }
 0xb86   :  { %11333 = vmatprep.subr.bf16.mxu1 %v12278_v35 }
 0xb89   :  { %11334 = vmatpush3.bf16.msra.mxu1 %v12167_v15  ;;  %v12205_v15 = vld [vmem:[%s14599_s4 + $0x1f8] sm:$0xff]  }
 0xb8a   :  { %11335 = vmatprep.subr.bf16.mxu1 %v12278_v35 }
 0xb8d   :  { %11336 = vmatpush3.bf16.msra.mxu1 %v12168_v16 }
 0xb8e   :  { %11337 = vmatprep.subr.bf16.mxu1 %v12278_v35 }
 0xb91   :  { %11338 = vmatpush3.bf16.msra.mxu1 %v12169_v17 }
 0xb92   :  { %11339 = vmatprep.subr.bf16.mxu1 %v12278_v35 }
 0xb95   :  { %11340 = vmatpush3.bf16.msra.mxu1 %v12170_v18 }
 0xb96   :  { %11341 = vmatprep.subr.bf16.mxu1 %v12278_v35 }
 0xb99   :  { %11342 = vmatpush3.bf16.msra.mxu1 %v12171_v19 }
 0xb9a   :  { %11343 = vmatprep.subr.bf16.mxu1 %v12278_v35 }
 0xb9d   :  { %11344 = vmatpush3.bf16.msra.mxu1 %v12172_v20 }
 0xb9e   :  { %11345 = vmatprep.subr.bf16.mxu1 %v12278_v35 }
 0xba1   :  { %11346 = vmatpush3.bf16.msra.mxu1 %v12173_v21  ;;  %v9236_v21 = vld [vmem:[%s14600_s7 + $0x8] sm:$0x1] }
 0xba2   :  { %11351 = vmatprep.subr.bf16.mxu1 %v12278_v35 }
 0xc57   :  { %v6222_v24 = vpop.f32.mrb[80].mxu1 }
 0xc58   :  { %v6228_v25 = vpack.c.bf16 %v6222_v24, %v6222_v24  ;;  %v11329_v26 = vpop.f32.mrb[81].mxu1  ;;  %v12206_v24 = vld [vmem:[%s14599_s4 + $0x200] sm:$0xff]  }
 0xc59   :  { %v6225_v27 = vpop.f32.mrb[82].mxu1  ;;  %v12209_v26 = vld [vmem:[%s14599_s4 + $0x218] sm:$0xff]  }
 0xc5a   :  { %11348 = vmatmul.mubr.bf16.vlgmr.msra.gmra.mrb[72].mxu1 %v6228_v25  ;;  %v11330_v28 = vpop.f32.mrb[83].mxu1  ;;  %v12208_v25 = vld [vmem:[%s14599_s4 + $0x210] sm:$0xff]   ;;  %v12210_v27 = vld [vmem:[%s14599_s4 + $0x220] sm:$0xff]  }
 0xc5b   :  { %11352 = vmatpush3.bf16.msra.mxu1 %v13904_v31  ;;  %11353 = vmatprep.mubr.msk.bf16.mxu1 %vm12279_vm1, %v12278_v35  ;;  %v12211_v28 = vld [vmem:[%s14599_s4 + $0x228] sm:$0xff]  }
 0xc5c   :  { %11357 = vmatprep.subr.bf16.mxu1 %v12278_v35 }
 0xc62   :  { %11354 = vmatmul.mubr.msk.bf16.vlgmr.msra.gmra.mrb[84].mxu1 %vm5727_vm4, %v9132_v29  ;;  %v12212_v29 = vld [vmem:[%s14599_s4 + $0x230] sm:$0xff]  }
 0xc63   :  { %11358 = vmatpush3.bf16.msra.mxu1 %v12174_v30  ;;  %11373 = vmatprep.mubr.msk.bf16.mxu1 %vm12279_vm1, %v12278_v35  ;;  %v12213_v30 = vld [vmem:[%s14599_s4 + $0x238] sm:$0xff]  }
 0xc64   :  { %11359 = vmatprep.subr.bf16.mxu1 %v12278_v35 }
 0xc67   :  { %11360 = vmatpush3.bf16.msra.mxu1 %v12175_v32  ;;  %v9418_v32 = vld [vmem:[%s14600_s7 + $0xf] sm:$0x1] }
 0xc68   :  { %11361 = vmatprep.subr.bf16.mxu1 %v12278_v35  ;;  %11640 = vmatmul.mubr.msk.bf16.vlgmr.msra.gmra.mrb[116].mxu0 %vm5727_vm4, %v9418_v32  ;;  %v12240_v32 = vld [vmem:[%s14599_s4 + $0x310] sm:$0xff]  }
 0xc6b   :  { %11362 = vmatpush3.bf16.msra.mxu1 %v12176_v33  ;;  %v7134_v33 = vpop.f32.mrb[92].mxu0 }
 0xc6c   :  { %11363 = vmatprep.subr.bf16.mxu1 %v12278_v35 }
 0xc6f   :  { %11364 = vmatpush3.bf16.msra.mxu1 %v12177_v34  ;;  %v11485_v34 = vpop.f32.mrb[93].mxu0 }
 0xc70   :  { %11365 = vmatprep.subr.bf16.mxu1 %v12278_v35  ;;  %v12242_v34 = vld [vmem:[%s14599_s4 + $0x320] sm:$0xff]  }
 0xc73   :  { %11366 = vmatpush3.bf16.msra.mxu1 %v12178_v38  ;;  %v7137_v38 = vpop.f32.mrb[94].mxu0 }
 0xc74   :  { %11367 = vmatprep.subr.bf16.mxu1 %v12278_v35  ;;  %v12243_v38 = vld [vmem:[%s14599_s4 + $0x328] sm:$0xff]  }
 0xc77   :  { %11368 = vmatpush3.bf16.msra.mxu1 %v12179_v39  ;;  %v11486_v39 = vpop.f32.mrb[95].mxu0 }
 0xc78   :  { %11369 = vmatprep.subr.bf16.mxu1 %v12278_v35  ;;  %v12244_v39 = vld [vmem:[%s14599_s4 + $0x330] sm:$0xff]  }
 0xc7b   :  { %11370 = vmatpush3.bf16.msra.mxu1 %v12180_v40  ;;  %v14329_v40 = vpop.f32.mrb[96].mxu0 }
 0xc7c   :  { %11371 = vmatprep.subr.bf16.mxu1 %v12278_v35 }
 0xc7f   :  { %11372 = vmatpush3.bf16.msra.mxu1 %v12181_v41  ;;  %v11511_v41 = vpop.f32.mrb[97].mxu0 }
 0xc80   :  { %11377 = vmatprep.subr.bf16.mxu1 %v12278_v35 }
 0xd35   :  { %v6374_v42 = vpop.f32.mrb[84].mxu1 }
 0xd36   :  { %v6380_v43 = vpack.c.bf16 %v6374_v42, %v6374_v42  ;;  %v11355_v44 = vpop.f32.mrb[85].mxu1  ;;  %v7289_v42 = vpop.f32.mrb[98].mxu0 }
 0xd37   :  { %v6377_v45 = vpop.f32.mrb[86].mxu1  ;;  %v12246_v42 = vld [vmem:[%s14599_s4 + $0x340] sm:$0xff]  }
 0xd38   :  { %11374 = vmatmul.mubr.bf16.vlgmr.msra.gmra.mrb[72].mxu1 %v6380_v43  ;;  %v11356_v46 = vpop.f32.mrb[87].mxu1  ;;  %v11512_v43 = vpop.f32.mrb[99].mxu0 }
 0xd39   :  { %11378 = vmatpush3.bf16.msra.mxu1 %v13904_v31  ;;  %11379 = vmatprep.mubr.msk.bf16.mxu1 %vm12279_vm1, %v12278_v35  ;;  %v14331_v44 = vpop.f32.mrb[100].mxu0  ;;  %v12247_v43 = vld [vmem:[%s14599_s4 + $0x348] sm:$0xff]  }
 0xd3a   :  { %11383 = vmatprep.subr.bf16.mxu1 %v12278_v35  ;;  %v11537_v45 = vpop.f32.mrb[101].mxu0 }
 0xd3b   :  { %v7441_v46 = vpop.f32.mrb[102].mxu0  ;;  %v12249_v45 = vld [vmem:[%s14599_s4 + $0x358] sm:$0xff]  }
 0xd3c   :  { %v12250_v46 = vld [vmem:[%s14599_s4 + $0x360] sm:$0xff]  }
 0xd40   :  { %11380 = vmatmul.mubr.msk.bf16.vlgmr.msra.gmra.mrb[88].mxu1 %vm5727_vm4, %v9158_v47  ;;  %v11538_v47 = vpop.f32.mrb[103].mxu0 }
 0xd41   :  { %11384 = vmatpush3.bf16.msra.mxu1 %v12182_v48  ;;  %11399 = vmatprep.mubr.msk.bf16.mxu1 %vm12279_vm1, %v12278_v35  ;;  %v14333_v48 = vpop.f32.mrb[104].mxu0  ;;  %v12251_v47 = vld [vmem:[%s14599_s4 + $0x368] sm:$0xff]  }
 0xd42   :  { %11385 = vmatprep.subr.bf16.mxu1 %v12278_v35  ;;  %v7596_v41 = vpack.c.bf16 %v14333_v48, %v14333_v48  ;;  %v12252_v48 = vld [vmem:[%s14599_s4 + $0x370] sm:$0xff]  }
 0xd45   :  { %11386 = vmatpush3.bf16.msra.mxu1 %v12183_v49  ;;  %v11563_v49 = vpop.f32.mrb[105].mxu0 }
 0xd46   :  { %11387 = vmatprep.subr.bf16.mxu1 %v12278_v35  ;;  %v12253_v49 = vld [vmem:[%s14599_s4 + $0x378] sm:$0xff]  }
 0xd49   :  { %11388 = vmatpush3.bf16.msra.mxu1 %v12184_v23 }
 0xd4a   :  { %11389 = vmatprep.subr.bf16.mxu1 %v12278_v35 }
 0xd4d   :  { %11390 = vmatpush3.bf16.msra.mxu1 %v12185_v22  ;;  %v12214_v22 = vld [vmem:[%s14599_s4 + $0x240] sm:$0xff]  }
 0xd4e   :  { %11391 = vmatprep.subr.bf16.mxu1 %v12278_v35 }
 0xd51   :  { %11392 = vmatpush3.bf16.msra.mxu1 %v12186_v37  ;;  %v7593_v37 = vpop.f32.mrb[106].mxu0 }
 0xd52   :  { %11393 = vmatprep.subr.bf16.mxu1 %v12278_v35  ;;  %v12255_v37 = vld [vmem:[%s14599_s4 + $0x388] sm:$0xff]  }
 0xd55   :  { %11394 = vmatpush3.bf16.msra.mxu1 %v12187_v52 }
 0xd56   :  { %11395 = vmatprep.subr.bf16.mxu1 %v12278_v35 }
 0xd59   :  { %11396 = vmatpush3.bf16.msra.mxu1 %v12188_v36 }
 0xd5a   :  { %11397 = vmatprep.subr.bf16.mxu1 %v12278_v35 }
 0xd5d   :  { %11398 = vmatpush3.bf16.msra.mxu1 %v12189_v53  ;;  %v11564_v53 = vpop.f32.mrb[107].mxu0 }
 0xd5e   :  { %11403 = vmatprep.subr.bf16.mxu1 %v12278_v35  ;;  %v12258_v53 = vld [vmem:[%s14599_s4 + $0x3a0] sm:$0xff]  }
 0xe13   :  { %v6526_v61 = vpop.f32.mrb[88].mxu1 }
 0xe14   :  { %v6532_v54 = vpack.c.bf16 %v6526_v61, %v6526_v61  ;;  %v11381_v55 = vpop.f32.mrb[89].mxu1 }
 0xe15   :  { %v6529_v62 = vpop.f32.mrb[90].mxu1  ;;  %v12215_v55 = vld [vmem:[%s14599_s4 + $0x248] sm:$0xff]  }
 0xe16   :  { %11400 = vmatmul.mubr.bf16.vlgmr.msra.gmra.mrb[72].mxu1 %v6532_v54  ;;  %v11382_v56 = vpop.f32.mrb[91].mxu1  ;;  %v12216_v62 = vld [vmem:[%s14599_s4 + $0x250] sm:$0xff]  }
 0xe17   :  { %11404 = vmatpush3.bf16.msra.mxu1 %v13904_v31  ;;  %11405 = vmatprep.mubr.msk.bf16.mxu1 %vm12279_vm1, %v12278_v35  ;;  %v12217_v56 = vld [vmem:[%s14599_s4 + $0x258] sm:$0xff]  }
 0xe18   :  { %11409 = vmatprep.subr.bf16.mxu1 %v12278_v35 }
 0xe1e   :  { %11406 = vmatmul.mubr.msk.bf16.vlgmr.msra.gmra.mrb[92].mxu1 %vm5727_vm4, %v9184_v51  ;;  %v12218_v51 = vld [vmem:[%s14599_s4 + $0x260] sm:$0xff]  }
 0xe1f   :  { %11410 = vmatpush3.bf16.msra.mxu1 %v12190_v63  ;;  %11425 = vmatprep.mubr.msk.bf16.mxu1 %vm12279_vm1, %v12278_v35  ;;  %v12219_v63 = vld [vmem:[%s14599_s4 + $0x268] sm:$0xff]  }
 0xe20   :  { %11411 = vmatprep.subr.bf16.mxu1 %v12278_v35 }
 0xe23   :  { %11412 = vmatpush3.bf16.msra.mxu1 %v12191_v50  ;;  %v12220_v50 = vld [vmem:[%s14599_s4 + $0x270] sm:$0xff]  }
 0xe24   :  { %11413 = vmatprep.subr.bf16.mxu1 %v12278_v35 }
 0xe27   :  { %11414 = vmatpush3.bf16.msra.mxu1 %v12192_v57  ;;  %v12221_v57 = vld [vmem:[%s14599_s4 + $0x278] sm:$0xff]  }
 0xe28   :  { %11415 = vmatprep.subr.bf16.mxu1 %v12278_v35 }
 0xe2b   :  { %11416 = vmatpush3.bf16.msra.mxu1 %v12193_v2  ;;  %v14368_v2 = vpop.f32.mrb[108].mxu0 }
 0xe2c   :  { %11417 = vmatprep.subr.bf16.mxu1 %v12278_v35 }
 0xe2f   :  { %11418 = vmatpush3.bf16.msra.mxu1 %v12194_v1  ;;  %v7140_v1 = vpack.c.bf16 %v7134_v33, %v7134_v33  ;;  %v12241_v33 = vld [vmem:[%s14599_s4 + $0x318] sm:$0xff]  }
 0xe30   :  { %11419 = vmatprep.subr.bf16.mxu1 %v12278_v35 }
 0xe33   :  { %11420 = vmatpush3.bf16.msra.mxu1 %v12195_v58  ;;  %v11589_v58 = vpop.f32.mrb[109].mxu0 }
 0xe34   :  { %11421 = vmatprep.subr.bf16.mxu1 %v12278_v35  ;;  %v12269_v58 = vld [vmem:[%s14599_s4 + $0x3f8] sm:$0xff]  }
 0xe37   :  { %11422 = vmatpush3.bf16.msra.mxu1 %v12196_v59  ;;  %v12222_v59 = vld [vmem:[%s14599_s4 + $0x280] sm:$0xff]  }
 0xe38   :  { %11423 = vmatprep.subr.bf16.mxu1 %v12278_v35 }
 0xe3b   :  { %11424 = vmatpush3.bf16.msra.mxu1 %v12197_v0  ;;  %v7745_v0 = vpop.f32.mrb[110].mxu0 }
 0xe3c   :  { %11429 = vmatprep.subr.bf16.mxu1 %v12278_v35 }
 0xef1   :  { %v6678_v60 = vpop.f32.mrb[92].mxu1 }
 0xef2   :  { %v6684_v3 = vpack.c.bf16 %v6678_v60, %v6678_v60  ;;  %v11407_v4 = vpop.f32.mrb[93].mxu1  ;;  %v11590_v60 = vpop.f32.mrb[111].mxu0 }
 0xef3   :  { %v6681_v5 = vpop.f32.mrb[94].mxu1  ;;  %v12224_v4 = vld [vmem:[%s14599_s4 + $0x290] sm:$0xff]  }
 0xef4   :  { %11426 = vmatmul.mubr.bf16.vlgmr.msra.gmra.mrb[72].mxu1 %v6684_v3  ;;  %v11408_v6 = vpop.f32.mrb[95].mxu1  ;;  %v12223_v3 = vld [vmem:[%s14599_s4 + $0x288] sm:$0xff]   ;;  %v12225_v5 = vld [vmem:[%s14599_s4 + $0x298] sm:$0xff]  }
 0xef5   :  { %11430 = vmatpush3.bf16.msra.mxu1 %v13904_v31  ;;  %11431 = vmatprep.mubr.msk.bf16.mxu1 %vm12279_vm1, %v12278_v35  ;;  %v12226_v6 = vld [vmem:[%s14599_s4 + $0x2a0] sm:$0xff]  }
 0xef6   :  { %11435 = vmatprep.subr.bf16.mxu1 %v12278_v35 }
 0xefc   :  { %11432 = vmatmul.mubr.msk.bf16.vlgmr.msra.gmra.mrb[96].mxu1 %vm5727_vm4, %v9210_v7  ;;  %v12227_v7 = vld [vmem:[%s14599_s4 + $0x2a8] sm:$0xff]  }
 0xefd   :  { %11436 = vmatpush3.bf16.msra.mxu1 %v12198_v8  ;;  %11451 = vmatprep.mubr.msk.bf16.mxu1 %vm12279_vm1, %v12278_v35  ;;  %v12228_v8 = vld [vmem:[%s14599_s4 + $0x2b0] sm:$0xff]  }
 0xefe   :  { %11437 = vmatprep.subr.bf16.mxu1 %v12278_v35 }
 0xf01   :  { %11438 = vmatpush3.bf16.msra.mxu1 %v12199_v9  ;;  %v12229_v9 = vld [vmem:[%s14599_s4 + $0x2b8] sm:$0xff]  }
 0xf02   :  { %11439 = vmatprep.subr.bf16.mxu1 %v12278_v35 }
 0xf05   :  { %11440 = vmatpush3.bf16.msra.mxu1 %v12200_v10  ;;  %v14404_v10 = vpop.f32.mrb[112].mxu0 }
 0xf06   :  { %11441 = vmatprep.subr.bf16.mxu1 %v12278_v35 }
 0xf09   :  { %11442 = vmatpush3.bf16.msra.mxu1 %v12201_v11  ;;  %v7292_v11 = vpack.c.bf16 %v14329_v40, %v14329_v40  ;;  %v12245_v40 = vld [vmem:[%s14599_s4 + $0x338] sm:$0xff]  }
 0xf0a   :  { %11443 = vmatprep.subr.bf16.mxu1 %v12278_v35 }
 0xf0d   :  { %11444 = vmatpush3.bf16.msra.mxu1 %v12202_v12  ;;  %v11615_v12 = vpop.f32.mrb[113].mxu0 }
 0xf0e   :  { %11445 = vmatprep.subr.bf16.mxu1 %v12278_v35 }
 0xf11   :  { %11446 = vmatpush3.bf16.msra.mxu1 %v12203_v13  ;;  %v12230_v13 = vld [vmem:[%s14599_s4 + $0x2c0] sm:$0xff]  }
 0xf12   :  { %11447 = vmatprep.subr.bf16.mxu1 %v12278_v35 }
 0xf15   :  { %11448 = vmatpush3.bf16.msra.mxu1 %v12204_v14  ;;  %v7897_v14 = vpop.f32.mrb[114].mxu0 }
 0xf16   :  { %11449 = vmatprep.subr.bf16.mxu1 %v12278_v35 }
 0xf19   :  { %11450 = vmatpush3.bf16.msra.mxu1 %v12205_v15  ;;  %v11616_v15 = vpop.f32.mrb[115].mxu0 }
 0xf1a   :  { %11455 = vmatprep.subr.bf16.mxu1 %v12278_v35 }
 0xfcf   :  { %v6830_v16 = vpop.f32.mrb[96].mxu1 }
 0xfd0   :  { %v6836_v17 = vpack.c.bf16 %v6830_v16, %v6830_v16  ;;  %v11433_v18 = vpop.f32.mrb[97].mxu1  ;;  %v12231_v16 = vld [vmem:[%s14599_s4 + $0x2c8] sm:$0xff]  }
 0xfd1   :  { %v6833_v19 = vpop.f32.mrb[98].mxu1  ;;  %v12233_v18 = vld [vmem:[%s14599_s4 + $0x2d8] sm:$0xff]  }
 0xfd2   :  { %11452 = vmatmul.mubr.bf16.vlgmr.msra.gmra.mrb[72].mxu1 %v6836_v17  ;;  %v11434_v20 = vpop.f32.mrb[99].mxu1  ;;  %v12232_v17 = vld [vmem:[%s14599_s4 + $0x2d0] sm:$0xff]   ;;  %v12234_v19 = vld [vmem:[%s14599_s4 + $0x2e0] sm:$0xff]  }
 0xfd3   :  { %11456 = vmatpush3.bf16.msra.mxu1 %v13904_v31  ;;  %11457 = vmatprep.mubr.msk.bf16.mxu1 %vm12279_vm1, %v12278_v35  ;;  %v12207_v31 = vld [vmem:[%s14599_s4 + $0x208] sm:$0xff]  }
 0xfd4   :  { %11461 = vmatprep.subr.bf16.mxu1 %v12278_v35  ;;  %v12235_v20 = vld [vmem:[%s14599_s4 + $0x2e8] sm:$0xff]  }
 0xfda   :  { %11458 = vmatmul.mubr.msk.bf16.vlgmr.msra.gmra.mrb[100].mxu1 %vm5727_vm4, %v9236_v21  ;;  %v12236_v21 = vld [vmem:[%s14599_s4 + $0x2f0] sm:$0xff]  }
 0xfdb   :  { %11462 = vmatpush3.bf16.msra.mxu1 %v12206_v24  ;;  %11477 = vmatprep.mubr.msk.bf16.mxu1 %vm12279_vm1, %v12278_v35  ;;  %v12237_v24 = vld [vmem:[%s14599_s4 + $0x2f8] sm:$0xff]  }
 0xfdc   :  { %11463 = vmatprep.subr.bf16.mxu1 %v12278_v35 }
 0xfdf   :  { %11464 = vmatpush3.bf16.msra.mxu1 %v12207_v31  ;;  %v14442_v31 = vpop.f32.mrb[116].mxu0 }
 0xfe0   :  { %11465 = vmatprep.subr.bf16.mxu1 %v12278_v35 }
 0xfe3   :  { %11466 = vmatpush3.bf16.msra.mxu1 %v12208_v25  ;;  %v11641_v25 = vpop.f32.mrb[117].mxu0 }
 0xfe4   :  { %11467 = vmatprep.subr.bf16.mxu1 %v12278_v35 }
 0xfe7   :  { %11468 = vmatpush3.bf16.msra.mxu1 %v12209_v26  ;;  %v7444_v26 = vpack.c.bf16 %v14331_v44, %v14331_v44  ;;  %v12248_v44 = vld [vmem:[%s14599_s4 + $0x350] sm:$0xff]  }
 0xfe8   :  { %11469 = vmatprep.subr.bf16.mxu1 %v12278_v35 }
 0xfeb   :  { %11470 = vmatpush3.bf16.msra.mxu1 %v12210_v27  ;;  %v8049_v27 = vpop.f32.mrb[118].mxu0 }
 0xfec   :  { %11471 = vmatprep.subr.bf16.mxu1 %v12278_v35 }
 0xfef   :  { %11472 = vmatpush3.bf16.msra.mxu1 %v12211_v28  ;;  %v12238_v28 = vld [vmem:[%s14599_s4 + $0x300] sm:$0xff]  }
 0xff0   :  { %11473 = vmatprep.subr.bf16.mxu1 %v12278_v35 }
 0xff3   :  { %11474 = vmatpush3.bf16.msra.mxu1 %v12212_v29  ;;  %v11642_v29 = vpop.f32.mrb[119].mxu0 }
 0xff4   :  { %11475 = vmatprep.subr.bf16.mxu1 %v12278_v35 }
 0xff7   :  { %11476 = vmatpush3.bf16.msra.mxu1 %v12213_v30  ;;  %v12239_v30 = vld [vmem:[%s14599_s4 + $0x308] sm:$0xff]  }
 0xff8   :  { %11487 = vmatprep.subr.bf16.mxu1 %v12278_v35 }
0x10ad   :  { %v6982_v23 = vpop.f32.mrb[100].mxu1 }
0x10ae   :  { %v6988_v52 = vpack.c.bf16 %v6982_v23, %v6982_v23  ;;  %v11459_v36 = vpop.f32.mrb[101].mxu1  ;;  %v7748_v23 = vpack.c.bf16 %v14368_v2, %v14368_v2  ;;  %v12267_v2 = vld [vmem:[%s14599_s4 + $0x3e8] sm:$0xff]  }
0x10af   :  { %v6985_v61 = vpop.f32.mrb[102].mxu1  ;;  %v12257_v36 = vld [vmem:[%s14599_s4 + $0x398] sm:$0xff]  }
0x10b0   :  { %11478 = vmatmul.mubr.bf16.vlgmr.msra.gmra.mrb[72].mxu1 %v6988_v52  ;;  %v11460_v54 = vpop.f32.mrb[103].mxu1  ;;  %v12256_v52 = vld [vmem:[%s14599_s4 + $0x390] sm:$0xff]   ;;  %v12259_v61 = vld [vmem:[%s14599_s4 + $0x3a8] sm:$0xff]  }
0x10b1   :  { %11488 = vmatpush3.bf16.msra.mxu1 %v12214_v22  ;;  %11503 = vmatprep.mubr.msk.bf16.mxu1 %vm12279_vm1, %v12278_v35  ;;  %v12254_v22 = vld [vmem:[%s14599_s4 + $0x380] sm:$0xff]   ;;  %v12260_v54 = vld [vmem:[%s14599_s4 + $0x3b0] sm:$0xff]  }
0x10b2   :  { %11489 = vmatprep.subr.bf16.mxu1 %v12278_v35 }
0x10b5   :  { %11490 = vmatpush3.bf16.msra.mxu1 %v12215_v55  ;;  %v12261_v55 = vld [vmem:[%s14599_s4 + $0x3b8] sm:$0xff]  }
0x10b6   :  { %11491 = vmatprep.subr.bf16.mxu1 %v12278_v35 }
0x10b9   :  { %11492 = vmatpush3.bf16.msra.mxu1 %v12216_v62  ;;  %v7900_v62 = vpack.c.bf16 %v14404_v10, %v14404_v10 }
0x10ba   :  { %11493 = vmatprep.subr.bf16.mxu1 %v12278_v35 }
0x10bd   :  { %11494 = vmatpush3.bf16.msra.mxu1 %v12217_v56  ;;  %v12262_v56 = vld [vmem:[%s14599_s4 + $0x3c0] sm:$0xff]  }
0x10be   :  { %11495 = vmatprep.subr.bf16.mxu1 %v12278_v35 }
0x10c1   :  { %11496 = vmatpush3.bf16.msra.mxu1 %v12218_v51  ;;  %v12263_v51 = vld [vmem:[%s14599_s4 + $0x3c8] sm:$0xff]  }
0x10c2   :  { %11497 = vmatprep.subr.bf16.mxu1 %v12278_v35 }
0x10c5   :  { %11498 = vmatpush3.bf16.msra.mxu1 %v12219_v63  ;;  %v12264_v63 = vld [vmem:[%s14599_s4 + $0x3d0] sm:$0xff]  }
0x10c6   :  { %11499 = vmatprep.subr.bf16.mxu1 %v12278_v35 }
0x10c9   :  { %11500 = vmatpush3.bf16.msra.mxu1 %v12220_v50  ;;  %v12265_v50 = vld [vmem:[%s14599_s4 + $0x3d8] sm:$0xff]  }
0x10ca   :  { %11501 = vmatprep.subr.bf16.mxu1 %v12278_v35 }
0x10cd   :  { %11502 = vmatpush3.bf16.msra.mxu1 %v12221_v57  ;;  %v12266_v57 = vld [vmem:[%s14599_s4 + $0x3e0] sm:$0xff]  }
0x10ce   :  { %11513 = vmatprep.subr.bf16.mxu1 %v12278_v35 }
0x10d0   :  { %11504 = vmatmul.mubr.bf16.vlgmr.msra.gmra.mrb[72].mxu1 %v7140_v1  ;;  %v12268_v1 = vld [vmem:[%s14599_s4 + $0x3f0] sm:$0xff]  }
0x10d1   :  { %11514 = vmatpush3.bf16.msra.mxu1 %v12222_v59  ;;  %11529 = vmatprep.mubr.msk.bf16.mxu1 %vm12279_vm1, %v12278_v35  ;;  %v8052_v59 = vpack.c.bf16 %v14442_v31, %v14442_v31 }
0x10d2   :  { %11515 = vmatprep.subr.bf16.mxu1 %v12278_v35 }
0x10d5   :  { %11516 = vmatpush3.bf16.msra.mxu1 %v12223_v3 }
0x10d6   :  { %11517 = vmatprep.subr.bf16.mxu1 %v12278_v35 }
0x10d9   :  { %11518 = vmatpush3.bf16.msra.mxu1 %v12224_v4 }
0x10da   :  { %11519 = vmatprep.subr.bf16.mxu1 %v12278_v35 }
0x10dd   :  { %11520 = vmatpush3.bf16.msra.mxu1 %v12225_v5 }
0x10de   :  { %11521 = vmatprep.subr.bf16.mxu1 %v12278_v35 }
0x10e1   :  { %11522 = vmatpush3.bf16.msra.mxu1 %v12226_v6 }
0x10e2   :  { %11523 = vmatprep.subr.bf16.mxu1 %v12278_v35 }
0x10e5   :  { %11524 = vmatpush3.bf16.msra.mxu1 %v12227_v7 }
0x10e6   :  { %11525 = vmatprep.subr.bf16.mxu1 %v12278_v35 }
0x10e9   :  { %11526 = vmatpush3.bf16.msra.mxu1 %v12228_v8 }
0x10ea   :  { %11527 = vmatprep.subr.bf16.mxu1 %v12278_v35 }
0x10ed   :  { %11528 = vmatpush3.bf16.msra.mxu1 %v12229_v9 }
0x10ee   :  { %11539 = vmatprep.subr.bf16.mxu1 %v12278_v35 }
0x10f0   :  { %11530 = vmatmul.mubr.bf16.vlgmr.msra.gmra.mrb[72].mxu1 %v7292_v11 }
0x10f1   :  { %11540 = vmatpush3.bf16.msra.mxu1 %v12230_v13  ;;  %11555 = vmatprep.mubr.msk.bf16.mxu1 %vm12279_vm1, %v12278_v35 }
0x10f2   :  { %11541 = vmatprep.subr.bf16.mxu1 %v12278_v35 }
0x10f5   :  { %11542 = vmatpush3.bf16.msra.mxu1 %v12231_v16 }
0x10f6   :  { %11543 = vmatprep.subr.bf16.mxu1 %v12278_v35 }
0x10f9   :  { %11544 = vmatpush3.bf16.msra.mxu1 %v12232_v17 }
0x10fa   :  { %11545 = vmatprep.subr.bf16.mxu1 %v12278_v35 }
0x10fd   :  { %11546 = vmatpush3.bf16.msra.mxu1 %v12233_v18 }
0x10fe   :  { %11547 = vmatprep.subr.bf16.mxu1 %v12278_v35 }
0x1101   :  { %11548 = vmatpush3.bf16.msra.mxu1 %v12234_v19 }
0x1102   :  { %11549 = vmatprep.subr.bf16.mxu1 %v12278_v35 }
0x1105   :  { %11550 = vmatpush3.bf16.msra.mxu1 %v12235_v20 }
0x1106   :  { %11551 = vmatprep.subr.bf16.mxu1 %v12278_v35 }
0x1109   :  { %11552 = vmatpush3.bf16.msra.mxu1 %v12236_v21 }
0x110a   :  { %11553 = vmatprep.subr.bf16.mxu1 %v12278_v35 }
0x110d   :  { %11554 = vmatpush3.bf16.msra.mxu1 %v12237_v24 }
0x110e   :  { %11565 = vmatprep.subr.bf16.mxu1 %v12278_v35 }
0x1110   :  { %11556 = vmatmul.mubr.bf16.vlgmr.msra.gmra.mrb[72].mxu1 %v7444_v26 }
0x1111   :  { %11566 = vmatpush3.bf16.msra.mxu1 %v12238_v28  ;;  %11581 = vmatprep.mubr.msk.bf16.mxu1 %vm12279_vm1, %v12278_v35 }
0x1112   :  { %11567 = vmatprep.subr.bf16.mxu1 %v12278_v35 }
0x1115   :  { %11568 = vmatpush3.bf16.msra.mxu1 %v12239_v30 }
0x1116   :  { %11569 = vmatprep.subr.bf16.mxu1 %v12278_v35 }
0x1119   :  { %11570 = vmatpush3.bf16.msra.mxu1 %v12240_v32 }
0x111a   :  { %11571 = vmatprep.subr.bf16.mxu1 %v12278_v35 }
0x111d   :  { %11572 = vmatpush3.bf16.msra.mxu1 %v12241_v33 }
0x111e   :  { %11573 = vmatprep.subr.bf16.mxu1 %v12278_v35 }
0x1121   :  { %11574 = vmatpush3.bf16.msra.mxu1 %v12242_v34 }
0x1122   :  { %11575 = vmatprep.subr.bf16.mxu1 %v12278_v35 }
0x1125   :  { %11576 = vmatpush3.bf16.msra.mxu1 %v12243_v38 }
0x1126   :  { %11577 = vmatprep.subr.bf16.mxu1 %v12278_v35 }
0x1129   :  { %11578 = vmatpush3.bf16.msra.mxu1 %v12244_v39 }
0x112a   :  { %11579 = vmatprep.subr.bf16.mxu1 %v12278_v35 }
0x112d   :  { %11580 = vmatpush3.bf16.msra.mxu1 %v12245_v40 }
0x112e   :  { %11591 = vmatprep.subr.bf16.mxu1 %v12278_v35 }
0x1130   :  { %11582 = vmatmul.mubr.bf16.vlgmr.msra.gmra.mrb[72].mxu1 %v7596_v41 }
0x1131   :  { %11592 = vmatpush3.bf16.msra.mxu1 %v12246_v42  ;;  %11607 = vmatprep.mubr.msk.bf16.mxu1 %vm12279_vm1, %v12278_v35 }
0x1132   :  { %11593 = vmatprep.subr.bf16.mxu1 %v12278_v35 }
0x1135   :  { %11594 = vmatpush3.bf16.msra.mxu1 %v12247_v43 }
0x1136   :  { %11595 = vmatprep.subr.bf16.mxu1 %v12278_v35 }
0x1139   :  { %11596 = vmatpush3.bf16.msra.mxu1 %v12248_v44 }
0x113a   :  { %11597 = vmatprep.subr.bf16.mxu1 %v12278_v35 }
0x113d   :  { %11598 = vmatpush3.bf16.msra.mxu1 %v12249_v45 }
0x113e   :  { %11599 = vmatprep.subr.bf16.mxu1 %v12278_v35 }
0x1141   :  { %11600 = vmatpush3.bf16.msra.mxu1 %v12250_v46 }
0x1142   :  { %11601 = vmatprep.subr.bf16.mxu1 %v12278_v35 }
0x1145   :  { %11602 = vmatpush3.bf16.msra.mxu1 %v12251_v47 }
0x1146   :  { %11603 = vmatprep.subr.bf16.mxu1 %v12278_v35 }
0x1149   :  { %11604 = vmatpush3.bf16.msra.mxu1 %v12252_v48 }
0x114a   :  { %11605 = vmatprep.subr.bf16.mxu1 %v12278_v35 }
0x114d   :  { %11606 = vmatpush3.bf16.msra.mxu1 %v12253_v49 }
0x114e   :  { %11617 = vmatprep.subr.bf16.mxu1 %v12278_v35 }
0x1150   :  { %11608 = vmatmul.mubr.bf16.vlgmr.msra.gmra.mrb[72].mxu1 %v7748_v23 }
0x1151   :  { %11618 = vmatpush3.bf16.msra.mxu1 %v12254_v22  ;;  %11633 = vmatprep.mubr.msk.bf16.mxu1 %vm12279_vm1, %v12278_v35 }
0x1152   :  { %11619 = vmatprep.subr.bf16.mxu1 %v12278_v35 }
0x1155   :  { %11620 = vmatpush3.bf16.msra.mxu1 %v12255_v37 }
0x1156   :  { %11621 = vmatprep.subr.bf16.mxu1 %v12278_v35 }
0x1159   :  { %11622 = vmatpush3.bf16.msra.mxu1 %v12256_v52 }
0x115a   :  { %11623 = vmatprep.subr.bf16.mxu1 %v12278_v35 }
0x115d   :  { %11624 = vmatpush3.bf16.msra.mxu1 %v12257_v36 }
0x115e   :  { %11625 = vmatprep.subr.bf16.mxu1 %v12278_v35 }
0x1161   :  { %11626 = vmatpush3.bf16.msra.mxu1 %v12258_v53 }
0x1162   :  { %11627 = vmatprep.subr.bf16.mxu1 %v12278_v35 }
0x1165   :  { %11628 = vmatpush3.bf16.msra.mxu1 %v12259_v61 }
0x1166   :  { %11629 = vmatprep.subr.bf16.mxu1 %v12278_v35 }
0x1169   :  { %11630 = vmatpush3.bf16.msra.mxu1 %v12260_v54 }
0x116a   :  { %11631 = vmatprep.subr.bf16.mxu1 %v12278_v35 }
0x116d   :  { %11632 = vmatpush3.bf16.msra.mxu1 %v12261_v55 }
0x116e   :  { %11643 = vmatprep.subr.bf16.mxu1 %v12278_v35 }
0x1170   :  { %11634 = vmatmul.mubr.bf16.vlgmr.msra.gmra.mrb[72].mxu1 %v7900_v62 }
0x1171   :  { %11644 = vmatpush3.bf16.msra.mxu1 %v12262_v56  ;;  %11659 = vmatprep.mubr.msk.bf16.mxu1 %vm12279_vm1, %v12278_v35 }
0x1172   :  { %11645 = vmatprep.subr.bf16.mxu1 %v12278_v35 }
0x1175   :  { %11646 = vmatpush3.bf16.msra.mxu1 %v12263_v51 }
0x1176   :  { %11647 = vmatprep.subr.bf16.mxu1 %v12278_v35 }
0x1179   :  { %11648 = vmatpush3.bf16.msra.mxu1 %v12264_v63 }
0x117a   :  { %11649 = vmatprep.subr.bf16.mxu1 %v12278_v35 }
0x117d   :  { %11650 = vmatpush3.bf16.msra.mxu1 %v12265_v50 }
0x117e   :  { %11651 = vmatprep.subr.bf16.mxu1 %v12278_v35 }
0x1181   :  { %11652 = vmatpush3.bf16.msra.mxu1 %v12266_v57 }
0x1182   :  { %11653 = vmatprep.subr.bf16.mxu1 %v12278_v35 }
0x1185   :  { %11654 = vmatpush3.bf16.msra.mxu1 %v12267_v2 }
0x1186   :  { %11655 = vmatprep.subr.bf16.mxu1 %v12278_v35 }
0x1189   :  { %11656 = vmatpush3.bf16.msra.mxu1 %v12268_v1 }
0x118a   :  { %11657 = vmatprep.subr.bf16.mxu1 %v12278_v35 }
0x118d   :  { %11658 = vmatpush3.bf16.msra.mxu1 %v12269_v58 }
0x1190   :  { %11660 = vmatmul.mubr.bf16.vlgmr.msra.gmra.mrb[72].mxu1 %v8052_v59 }
0x1263   :  { %v8152_v0 = vpop.f32.mrb[72].mxu1 }
0x1264   :  { %v8159_v60 = vsub.f32 0.0, %v8152_v0  ;;  %v11661_v3 = vpop.f32.mrb[73].mxu1 }
0x1265   :  { %v8155_v4 = vpop.f32.mrb[74].mxu1 }
0x1266   :  { %v8160_v5 = vmul.f32 1.442695, %v8159_v60  ;;  %v11662_v6 = vpop.f32.mrb[75].mxu1 }
0x1268   :  { %12274 = vpow2.f32 %v8160_v5 }
0x1272   :  { %v12275_v7 = vpop.eup %12274 }
0x1273   :  { %v8162_v8 = vadd.f32 1.0, %v12275_v7 }
0x1275   :  { %12276 = vrcp.f32 %v8162_v8 }
0x127f   :  { %v12277_v9 = vpop.eup %12276 }
0x1280   :  { %8164 = vst [vmem:[%s14601_s8] sm:$0x3] %v12277_v9 }

</bundles_post_ra>
